<compile_context>
chip_gen: v7x
topology: tpu7x:2x2x1
jax: 0.10.0
libtpu: 0.0.40
codegen_flags: <defaults>
</compile_context>

<pallas_src>
import jax
import jax.numpy as jnp
from jax.experimental import pallas as pl
from jax.experimental.pallas import tpu as pltpu

C_IN = 2048       # fixed by nn.Linear(2048, ...) in the module
HIDDEN = 1024
FEAT_DIM = 512
PARAM_DIM = 62
PARAM_PAD = 128   # param head padded to a lane-dense 128 columns inside the kernel
FUSED_OUT = HIDDEN + PARAM_PAD   # 1152 = 9 * 128
TB_MAX = 256      # batch-tile rows when the fused (2*B) batch is large


def _sia_head_kernel(x_ref, w13_ref, b13_ref, w2_ref, b2_ref, feat_ref, param_ref):
    # x_ref:    (TB, 2048)   bf16 pooled features (L and R stacked on batch)
    # w13_ref:  (2048, 1152) bf16  = [W1 | pad(W3)]   (stored as (in, out) = W.T)
    # b13_ref:  (1, 1152)    f32   = [b1 | pad(b3)]
    # w2_ref:   (1024, 512)  bf16
    # b2_ref:   (1, 512)     f32
    x = x_ref[...]                                                      # (TB, 2048) bf16

    # Fused fc1_0[0] + fc1_1: one MXU pass over the pooled activations.
    h_all = jnp.dot(x, w13_ref[...],
                    preferred_element_type=jnp.float32) + b13_ref[...]  # (TB, 1152) f32
    h = h_all[:, :HIDDEN]                                               # (TB, 1024)
    param = h_all[:, HIDDEN:]                                           # (TB, 128); cols >=62 are zero

    # fc1_0[1]: Linear(1024, 512)
    feat = jnp.dot(h.astype(w2_ref.dtype), w2_ref[...],
                   preferred_element_type=jnp.float32) + b2_ref[...]    # (TB, 512) f32

    feat_ref[...] = feat.astype(feat_ref.dtype)
    param_ref[...] = param.astype(param_ref.dtype)


def pack_head_params(params):
    """Cast Linear weights to bf16 and fuse/pad them for the kernel.

    `params` holds PyTorch-equivalent tensors stored as (in, out) = W.T, biases (1, out).
    NOTE: the kernel relies on columns 62..127 of the param block being ZERO-padded
    here; packing elsewhere must preserve that.
    """
    w1, b1, w2, b2, w3, b3 = params
    w3_pad = jnp.pad(w3, ((0, 0), (0, PARAM_PAD - PARAM_DIM)))
    b3_pad = jnp.pad(b3, ((0, 0), (0, PARAM_PAD - PARAM_DIM)))
    w13 = jnp.concatenate([w1, w3_pad], axis=1).astype(jnp.bfloat16)   # (2048, 1152)
    b13 = jnp.concatenate([b1, b3_pad], axis=1).astype(jnp.float32)    # (1, 1152)
    return w13, b13, w2.astype(jnp.bfloat16), b2.astype(jnp.float32)


def _const_spec(shape):
    # Constant block index -> stays VMEM-resident across grid steps;
    # Buffered(1): no double-buffer needed for a never-changing block.
    return pl.BlockSpec(shape, lambda i: (0, 0), pipeline_mode=pl.Buffered(1))


@jax.jit
def sia_net_forward(input_l, input_r, packed_params):
    """Siamese forward: shared head applied to both inputs (like the PyTorch module).

    input_l / input_r: (B, 2048, H, W) f32 backbone feature maps.
    """
    B, C, H, W = input_l.shape
    assert C == C_IN and input_r.shape == input_l.shape
    w13, b13, w2, b2 = packed_params

    # AdaptiveAvgPool2d(1) == global mean over spatial; hoisted to plain JAX so the
    # kernel only streams the tiny pooled tensor (no NCHW->NHWC transpose round trip).
    pooled_l = jnp.mean(input_l, axis=(2, 3))
    pooled_r = jnp.mean(input_r, axis=(2, 3))
    # L/R folded into the batch axis: weights are DMA'd once for both sides.
    pooled = jnp.concatenate([pooled_l, pooled_r], axis=0).astype(jnp.bfloat16)  # (2B, 2048)

    total = 2 * B
    if total <= TB_MAX:
        tb = total                  # single block equal to full batch extent
        padded = total
    else:
        tb = TB_MAX                 # tile batch; pad rows to a multiple of TB
        padded = pl.cdiv(total, tb) * tb
        pooled = jnp.pad(pooled, ((0, padded - total), (0, 0)))
    grid = (padded // tb,)

    flops = 2 * padded * (C_IN * FUSED_OUT + HIDDEN * FEAT_DIM)
    bytes_accessed = (
        w13.size * 2 + w2.size * 2 + b13.size * 4 + b2.size * 4   # weights/biases
        + padded * C_IN * 2                                        # activations in (bf16)
        + padded * (FEAT_DIM + PARAM_PAD) * 4                      # activations out (f32)
    )

    feat_all, param_all = pl.pallas_call(
        _sia_head_kernel,
        grid=grid,
        out_shape=(
            jax.ShapeDtypeStruct((padded, FEAT_DIM), jnp.float32),
            jax.ShapeDtypeStruct((padded, PARAM_PAD), jnp.float32),
        ),
        in_specs=[
            pl.BlockSpec((tb, C_IN), lambda i: (i, 0)),
            _const_spec((C_IN, FUSED_OUT)),
            _const_spec((1, FUSED_OUT)),
            _const_spec((HIDDEN, FEAT_DIM)),
            _const_spec((1, FEAT_DIM)),
        ],
        out_specs=(
            pl.BlockSpec((tb, FEAT_DIM), lambda i: (i, 0)),
            pl.BlockSpec((tb, PARAM_PAD), lambda i: (i, 0)),
        ),
        compiler_params=pltpu.CompilerParams(
            # "arbitrary": keep all batch tiles on one TensorCore so the
            # dominant weight DMA is NOT duplicated across v7x's 2 TCs.
            dimension_semantics=("arbitrary",),
            vmem_limit_bytes=32 * 1024 * 1024,   # ~7-10 MiB actual footprint
        ),
        cost_estimate=pl.CostEstimate(
            flops=flops, transcendentals=0, bytes_accessed=bytes_accessed),
    )(pooled, w13, b13, w2, b2)

    feature_l = feat_all[:B]
    feature_r = feat_all[B:total]
    param_l = param_all[:B, :PARAM_DIM]
    param_r = param_all[B:total, :PARAM_DIM]
    return feature_l, feature_r, param_l, param_r


def init_params(key):
    """Deterministic parameter init. Weights stored as (in, out) = PyTorch W.T; biases as (1, out)."""
    k1, k2, k3, k4, k5, k6 = jax.random.split(key, 6)
    w1 = 0.02 * jax.random.normal(k1, (C_IN, HIDDEN), jnp.float32)
    b1 = 0.01 * jax.random.normal(k2, (1, HIDDEN), jnp.float32)
    w2 = 0.02 * jax.random.normal(k3, (HIDDEN, FEAT_DIM), jnp.float32)
    b2 = 0.01 * jax.random.normal(k4, (1, FEAT_DIM), jnp.float32)
    w3 = 0.02 * jax.random.normal(k5, (C_IN, PARAM_DIM), jnp.float32)
    b3 = 0.01 * jax.random.normal(k6, (1, PARAM_DIM), jnp.float32)
    return (w1, b1, w2, b2, w3, b3)


def _reference_forward_once(x_nchw, params):
    """Pure-JAX reference mirroring the kernel's bf16 weight/activation streaming."""
    w1, b1, w2, b2, w3, b3 = params
    pooled = jnp.mean(x_nchw, axis=(2, 3))
    p = pooled.astype(jnp.bfloat16).astype(jnp.float32)
    w1b = w1.astype(jnp.bfloat16).astype(jnp.float32)
    w2b = w2.astype(jnp.bfloat16).astype(jnp.float32)
    w3b = w3.astype(jnp.bfloat16).astype(jnp.float32)
    h = p @ w1b + b1
    feat = h.astype(jnp.bfloat16).astype(jnp.float32) @ w2b + b2
    prm = p @ w3b + b3
    return feat, prm


if __name__ == "__main__":
    key = jax.random.PRNGKey(0)
    kx_l, kx_r, kp = jax.random.split(key, 3)

    # Small spatial extent; channel count is fixed at 2048 by the Linear layers.
    B, H, W = 2, 4, 4
    input_l = jax.random.normal(kx_l, (B, C_IN, H, W), jnp.float32)
    input_r = jax.random.normal(kx_r, (B, C_IN, H, W), jnp.float32)
    params = init_params(kp)
    packed_params = pack_head_params(params)

    feature_l, feature_r, param_l, param_r = jax.block_until_ready(
        sia_net_forward(input_l, input_r, packed_params)
    )

    # Sanity check against a plain-JAX reference (same bf16 weight/activation rounding).
    ref_feat_l, ref_param_l = _reference_forward_once(input_l, params)
    ref_feat_r, ref_param_r = _reference_forward_once(input_r, params)
    assert feature_l.shape == (B, FEAT_DIM) and param_l.shape == (B, PARAM_DIM)
    assert feature_r.shape == (B, FEAT_DIM) and param_r.shape == (B, PARAM_DIM)
    assert jnp.allclose(feature_l, ref_feat_l, atol=2e-3, rtol=2e-3)
    assert jnp.allclose(feature_r, ref_feat_r, atol=2e-3, rtol=2e-3)
    assert jnp.allclose(param_l, ref_param_l, atol=2e-3, rtol=2e-3)
    assert jnp.allclose(param_r, ref_param_r, atol=2e-3, rtol=2e-3)

    print("KERNEL_OK")
</pallas_src>

<mosaic_0001>
module attributes {stable_mosaic.version = 11 : i64} {
  func.func @_sia_head_kernel(%arg0: i32, %arg1: memref<4x2048xbf16, #tpu.memory_space<vmem>>, %arg2: memref<2048x1152xbf16, #tpu.memory_space<vmem>>, %arg3: memref<1x1152xf32, #tpu.memory_space<vmem>>, %arg4: memref<1024x512xbf16, #tpu.memory_space<vmem>>, %arg5: memref<1x512xf32, #tpu.memory_space<vmem>>, %arg6: memref<4x512xf32, #tpu.memory_space<vmem>>, %arg7: memref<4x128xf32, #tpu.memory_space<vmem>>) attributes {dimension_semantics = [#tpu.dimension_semantics<arbitrary>], iteration_bounds = array<i64: 1>, scalar_prefetch = 0 : i64, scratch_operands = 0 : i64, tpu.core_type = #tpu.core_type<tc>, window_params = [{transform_indices = @transform_0, window_bounds = array<i64: 4, 2048>}, {pipeline_mode = #tpu.pipeline_mode<synchronous>, transform_indices = @transform_1, window_bounds = array<i64: 2048, 1152>}, {pipeline_mode = #tpu.pipeline_mode<synchronous>, transform_indices = @transform_2, window_bounds = array<i64: 1, 1152>}, {pipeline_mode = #tpu.pipeline_mode<synchronous>, transform_indices = @transform_3, window_bounds = array<i64: 1024, 512>}, {pipeline_mode = #tpu.pipeline_mode<synchronous>, transform_indices = @transform_4, window_bounds = array<i64: 1, 512>}, {transform_indices = @transform_5, window_bounds = array<i64: 4, 512>}, {transform_indices = @transform_6, window_bounds = array<i64: 4, 128>}]} {
    %c0 = arith.constant 0 : index
    %c0_0 = arith.constant 0 : index
    %0 = vector.load %arg1[%c0, %c0_0] : memref<4x2048xbf16, #tpu.memory_space<vmem>>, vector<4x2048xbf16>
    %c0_1 = arith.constant 0 : index
    %c0_2 = arith.constant 0 : index
    %1 = vector.load %arg2[%c0_1, %c0_2] : memref<2048x1152xbf16, #tpu.memory_space<vmem>>, vector<2048x1152xbf16>
    %cst = arith.constant dense<0.000000e+00> : vector<4x1152xf32>
    %2 = tpu.matmul %0, %1, %cst {dimension_numbers = #tpu.dot_dimension_numbers<[1], [0], [0], [1], [0, 0, 1, 1], [], []>} : vector<4x2048xbf16>, vector<2048x1152xbf16>, vector<4x1152xf32> -> vector<4x1152xf32>
    %c0_3 = arith.constant 0 : index
    %c0_4 = arith.constant 0 : index
    %3 = vector.load %arg3[%c0_3, %c0_4] : memref<1x1152xf32, #tpu.memory_space<vmem>>, vector<1x1152xf32>
    %4 = vector.broadcast %3 : vector<1x1152xf32> to vector<4x1152xf32>
    %5 = arith.addf %2, %4 : vector<4x1152xf32>
    %6 = vector.extract_strided_slice %5 {offsets = [0, 0], sizes = [4, 1024], strides = [1, 1]} : vector<4x1152xf32> to vector<4x1024xf32>
    %7 = vector.extract_strided_slice %5 {offsets = [0, 1024], sizes = [4, 128], strides = [1, 1]} : vector<4x1152xf32> to vector<4x128xf32>
    %8 = arith.truncf %6 : vector<4x1024xf32> to vector<4x1024xbf16>
    %c0_5 = arith.constant 0 : index
    %c0_6 = arith.constant 0 : index
    %9 = vector.load %arg4[%c0_5, %c0_6] : memref<1024x512xbf16, #tpu.memory_space<vmem>>, vector<1024x512xbf16>
    %cst_7 = arith.constant dense<0.000000e+00> : vector<4x512xf32>
    %10 = tpu.matmul %8, %9, %cst_7 {dimension_numbers = #tpu.dot_dimension_numbers<[1], [0], [0], [1], [0, 0, 1, 1], [], []>} : vector<4x1024xbf16>, vector<1024x512xbf16>, vector<4x512xf32> -> vector<4x512xf32>
    %c0_8 = arith.constant 0 : index
    %c0_9 = arith.constant 0 : index
    %11 = vector.load %arg5[%c0_8, %c0_9] : memref<1x512xf32, #tpu.memory_space<vmem>>, vector<1x512xf32>
    %12 = vector.broadcast %11 : vector<1x512xf32> to vector<4x512xf32>
    %13 = arith.addf %10, %12 : vector<4x512xf32>
    %c0_10 = arith.constant 0 : index
    %c0_11 = arith.constant 0 : index
    %14 = vector.load %arg6[%c0_10, %c0_11] : memref<4x512xf32, #tpu.memory_space<vmem>>, vector<4x512xf32>
    tpu.vector_store %arg6[%c0_10, %c0_11], %13 {strides = array<i32>} : memref<4x512xf32, #tpu.memory_space<vmem>>, vector<4x512xf32>,
    %c0_12 = arith.constant 0 : index
    %c0_13 = arith.constant 0 : index
    %15 = vector.load %arg7[%c0_12, %c0_13] : memref<4x128xf32, #tpu.memory_space<vmem>>, vector<4x128xf32>
    tpu.vector_store %arg7[%c0_12, %c0_13], %7 {strides = array<i32>} : memref<4x128xf32, #tpu.memory_space<vmem>>, vector<4x128xf32>,
    return
  }
  func.func @transform_0(%arg0: i32) -> (i32, i32) {
    %c0_i32 = arith.constant 0 : i32
    %c0_i32_0 = arith.constant 0 : i32
    return %arg0, %c0_i32 : i32, i32
  }
  func.func @transform_1(%arg0: i32) -> (i32, i32) {
    %c0_i32 = arith.constant 0 : i32
    %c0_i32_0 = arith.constant 0 : i32
    %c0_i32_1 = arith.constant 0 : i32
    return %c0_i32, %c0_i32_0 : i32, i32
  }
  func.func @transform_2(%arg0: i32) -> (i32, i32) {
    %c0_i32 = arith.constant 0 : i32
    %c0_i32_0 = arith.constant 0 : i32
    %c0_i32_1 = arith.constant 0 : i32
    return %c0_i32, %c0_i32_0 : i32, i32
  }
  func.func @transform_3(%arg0: i32) -> (i32, i32) {
    %c0_i32 = arith.constant 0 : i32
    %c0_i32_0 = arith.constant 0 : i32
    %c0_i32_1 = arith.constant 0 : i32
    return %c0_i32, %c0_i32_0 : i32, i32
  }
  func.func @transform_4(%arg0: i32) -> (i32, i32) {
    %c0_i32 = arith.constant 0 : i32
    %c0_i32_0 = arith.constant 0 : i32
    %c0_i32_1 = arith.constant 0 : i32
    return %c0_i32, %c0_i32_0 : i32, i32
  }
  func.func @transform_5(%arg0: i32) -> (i32, i32) {
    %c0_i32 = arith.constant 0 : i32
    %c0_i32_0 = arith.constant 0 : i32
    return %arg0, %c0_i32 : i32, i32
  }
  func.func @transform_6(%arg0: i32) -> (i32, i32) {
    %c0_i32 = arith.constant 0 : i32
    %c0_i32_0 = arith.constant 0 : i32
    return %arg0, %c0_i32 : i32, i32
  }
}

</mosaic_0001>

<bundles_post_ra>
// kernel: sia_net_forward.1
= control target key start
LH: loop header
LB: loop body
LE: loop exit
PB: predicated region body
PF: predicated region fallthrough
CT: control target
= control target key end

     0   :  { %12 = vsyncpa [#allocation3], 0  ;;  %s15162_s0 = inlined_call_operand.vmem [shape: bf16[4,2048], index: 0, kind: input, shape index: {}]   ;;  %s15163_s1 = inlined_call_operand.hbm [shape: bf16[2048,1152], index: 1, kind: input, shape index: {}]   ;;  %s15164_s2 = inlined_call_operand.hbm [shape: f32[1,1152], index: 2, kind: input, shape index: {}]   ;;  %s15165_s3 = inlined_call_operand.hbm [shape: bf16[1024,512], index: 3, kind: input, shape index: {}]   ;;  %s15166_s4 = inlined_call_operand.hbm [shape: f32[1,512], index: 4, kind: input, shape index: {}]   ;;  %s15167_s5 = inlined_call_operand.vmem [shape: f32[4,512], index: 5, kind: output, shape index: {0}]   ;;  %s15168_s6 = inlined_call_operand.vmem [shape: f32[4,128], index: 6, kind: output, shape index: {1}]  }
   0x1   :  { %13 = vsyncpa [#allocation5], 0 }
   0x2   :  { %14 = vsyncpa [#allocation8], 0  ;;  %s14820_s21 = smov [#allocation4]   ;;  %s14821_s23 = smov [#allocation2]  }
   0x3   :  { %s35_s22 = sshll.u32 %s14820_s21, 4  ;;  %s22_s24 = sshll.u32 %s14821_s23, 4  ;;  %s36_s22 = int_to_ptr.vmem [resolvable:$true] %s35_s22  ;;  %s14864_s24 = int_to_ptr.vmem [resolvable:$true] %s22_s24 }
   0x4   :  { %s14726_s27 = scalar_lea.hbm %s15164_s2, 144 }
   0x5   :  { %p14727_p0 = scmp.ne.s32.totalorder %s15164_s2, %s14726_s27  ;;  %p14730_p1 = scmp.lt.u32.totalorder %s14726_s27, %s15164_s2 }
   0x7   :  { %p14732_p2 = pnand %p14730_p1, %p14727_p0 }
   0x9   :  { %14735 = shalt.err (!%p14732_p2)
}
   0xa   :  { %s14736_s8 = scalar_lea.vmem %s36_s22, 144  ;;  %s14740_s9 = scalar_lea.vmem %s36_s22, 160 }
   0xb   :  { %p14737_p3 = scmp.ne.s32.totalorder %s36_s22, %s14736_s8  ;;  %p14741_p4 = scmp.lt.s32.totalorder %s36_s22, %s36_s22 }
   0xc   :  { %p14742_p5 = scmp.lt.s32.totalorder %s14740_s9, %s14736_s8 }
   0xe   :  { %p14743_p6 = por %p14742_p5, %p14741_p4 }
  0x10   :  { %p14744_p7 = pnand %p14743_p6, %p14737_p3 }
  0x12   :  { %14747 = shalt.err (!%p14744_p7)
}
  0x13   :  { %38 = dma.hbm_to_vmem [thread:$0]  %s15164_s2, 144, %s36_s22, [#allocation5]  }
  0x14   :  { %s14748_s14 = scalar_lea.hbm %s15163_s1, 147456 }
  0x15   :  { %p14749_p8 = scmp.ne.s32.totalorder %s15163_s1, %s14748_s14  ;;  %p14752_p9 = scmp.lt.u32.totalorder %s14748_s14, %s15163_s1 }
  0x17   :  { %p14754_p10 = pnand %p14752_p9, %p14749_p8 }
  0x19   :  { %14757 = shalt.err (!%p14754_p10)
}
  0x1a   :  { %s14758_s19 = scalar_lea.vmem %s14864_s24, 147456  ;;  %p14763_p12 = scmp.lt.s32.totalorder %s14864_s24, %s14864_s24 }
  0x1b   :  { %p14759_p11 = scmp.ne.s32.totalorder %s14864_s24, %s14758_s19  ;;  %p14764_p13 = scmp.lt.s32.totalorder %s14758_s19, %s14758_s19 }
  0x1d   :  { %p14765_p0 = por %p14764_p13, %p14763_p12 }
  0x1f   :  { %p14766_p1 = pnand %p14765_p0, %p14759_p11 }
  0x21   :  { %14769 = shalt.err (!%p14766_p1)
}
  0x22   :  { %s14822_s2 = smov 576   ;;  %s14823_s20 = smov 36  }
  0x23   :  { %28 = dma.hbm_to_vmem [thread:$0]  %s15163_s1, 147456, %s14864_s24, [#allocation3], %s14822_s2, %s14822_s2, %s14823_s20  }
  0x24   :  { %s14824_s23 = smov [#allocation6]   ;;  %s14770_s28 = scalar_lea.hbm %s15165_s3, 32768 }
  0x25   :  { %s44_s25 = sshll.u32 %s14824_s23, 4  ;;  %p14771_p2 = scmp.ne.s32.totalorder %s15165_s3, %s14770_s28  ;;  %s45_s25 = int_to_ptr.vmem [resolvable:$true] %s44_s25 }
  0x26   :  { %p14774_p3 = scmp.lt.u32.totalorder %s14770_s28, %s15165_s3 }
  0x28   :  { %p14776_p4 = pnand %p14774_p3, %p14771_p2 }
  0x2a   :  { %14779 = shalt.err (!%p14776_p4)
}
  0x2b   :  { %s14780_s9 = scalar_lea.vmem %s45_s25, 32768  ;;  %p14785_p6 = scmp.lt.s32.totalorder %s45_s25, %s45_s25 }
  0x2c   :  { %p14781_p5 = scmp.ne.s32.totalorder %s45_s25, %s14780_s9  ;;  %p14786_p7 = scmp.lt.s32.totalorder %s14780_s9, %s14780_s9 }
  0x2e   :  { %p14787_p8 = por %p14786_p7, %p14785_p6 }
  0x30   :  { %p14788_p9 = pnand %p14787_p8, %p14781_p5 }
  0x32   :  { %14791 = shalt.err (!%p14788_p9)
}
  0x33   :  { %s14825_s1 = smov 256   ;;  %s14826_s24 = smov 16  }
  0x34   :  { %50 = dma.hbm_to_vmem [thread:$0]  %s15165_s3, 32768, %s45_s25, [#allocation5], %s14825_s1, %s14825_s1, %s14826_s24  }
  0x35   :  { %s14827_s12 = smov [#allocation7]   ;;  %s14792_s16 = scalar_lea.hbm %s15166_s4, 64 }
  0x36   :  { %s57_s13 = sshll.u32 %s14827_s12, 4  ;;  %p14793_p10 = scmp.ne.s32.totalorder %s15166_s4, %s14792_s16  ;;  %s58_s13 = int_to_ptr.vmem [resolvable:$true] %s57_s13 }
  0x37   :  { %p14796_p11 = scmp.lt.u32.totalorder %s14792_s16, %s15166_s4 }
  0x39   :  { %p14798_p12 = pnand %p14796_p11, %p14793_p10 }
  0x3b   :  { %14801 = shalt.err (!%p14798_p12)
}
  0x3c   :  { %s14802_s20 = scalar_lea.vmem %s58_s13, 64  ;;  %p14807_p0 = scmp.lt.s32.totalorder %s58_s13, %s58_s13 }
  0x3d   :  { %p14803_p13 = scmp.ne.s32.totalorder %s58_s13, %s14802_s20  ;;  %p14808_p1 = scmp.lt.s32.totalorder %s14802_s20, %s14802_s20 }
  0x3f   :  { %p14809_p2 = por %p14808_p1, %p14807_p0 }
  0x41   :  { %p14810_p3 = pnand %p14809_p2, %p14803_p13 }
  0x43   :  { %14813 = shalt.err (!%p14810_p3)
}
  0x44   :  { %60 = dma.hbm_to_vmem [thread:$0]  %s15166_s4, 64, %s58_s13, [#allocation8]  }
  0x45   :  { %14814 = dma.done.wait [#allocation3], 147456  }
  0x46   :  { %14815 = vsyncadd [#allocation3], 4294819840 }
  0x47   :  { %14816 = dma.done.wait [#allocation5], 32912  }
  0x48   :  { %14817 = vsyncadd [#allocation5], 4294934384 }
  0x49   :  { %14818 = dma.done.wait [#allocation8], 64  }
  0x4a   :  { %14819 = vsyncadd [#allocation8], 4294967232  ;;  %v12673_v0 = vld [vmem:[#allocation2 + $0x4] ss:$36 sps:$4 sm:$0xff]   ;;  %v12675_v1 = vld [vmem:[#allocation2 + $0xc] ss:$36 sps:$4 sm:$0xff]   ;;  %v1362_v36 = vlaneseq }
  0x4b   :  { %7383 = vmatprep.subr.bf16.mxu0 %v12673_v0  ;;  %v12677_v2 = vld [vmem:[#allocation2] ss:$36 sps:$4 sm:$0xff]   ;;  %v12678_v3 = vld [vmem:[#allocation2 + $0x8] ss:$36 sps:$4 sm:$0xff]   ;;  %7711 = vmatprep.subr.bf16.mxu1 %v12675_v1  ;;  %v12681_v5 = vld [vmem:[#allocation2 + $0x54] ss:$36 sps:$4 sm:$0xff]  }
  0x4c   :  { %v12679_v4 = vld [vmem:[#allocation2 + $0x4c] ss:$36 sps:$4 sm:$0xff]   ;;  %7384 = vmatpush1.bf16.msra.mxu0 %v12677_v2  ;;  %7712 = vmatpush1.bf16.msra.mxu1 %v12678_v3  ;;  %v12685_v8 = vld [vmem:[#allocation2 + $0x94] ss:$36 sps:$4 sm:$0xff]   ;;  %v12687_v9 = vld [vmem:[#allocation2 + $0x9c] ss:$36 sps:$4 sm:$0xff]  }
  0x4d   :  { %v12683_v6 = vld [vmem:[#allocation2 + $0x48] ss:$36 sps:$4 sm:$0xff]   ;;  %7385 = vmatprep.subr.bf16.mxu0 %v12679_v4  ;;  %v12684_v7 = vld [vmem:[#allocation2 + $0x50] ss:$36 sps:$4 sm:$0xff]   ;;  %7713 = vmatprep.subr.bf16.mxu1 %v12681_v5  ;;  %v12690_v11 = vld [vmem:[#allocation2 + $0x98] ss:$36 sps:$4 sm:$0xff]  }
  0x4e   :  { %v12689_v10 = vld [vmem:[#allocation2 + $0x90] ss:$36 sps:$4 sm:$0xff]   ;;  %v12691_v12 = vld [vmem:[#allocation2 + $0xdc] ss:$36 sps:$4 sm:$0xff]   ;;  %v12693_v13 = vld [vmem:[#allocation2 + $0xe4] ss:$36 sps:$4 sm:$0xff]  }
  0x4f   :  { %v12695_v14 = vld [vmem:[#allocation2 + $0xd8] ss:$36 sps:$4 sm:$0xff]   ;;  %v12696_v15 = vld [vmem:[#allocation2 + $0xe0] ss:$36 sps:$4 sm:$0xff]   ;;  %v12699_v17 = vld [vmem:[#allocation2 + $0x12c] ss:$36 sps:$4 sm:$0xff]  }
  0x50   :  { %7386 = vmatpush1.bf16.msra.mxu0 %v12683_v6  ;;  %7714 = vmatpush1.bf16.msra.mxu1 %v12684_v7  ;;  %v12697_v16 = vld [vmem:[#allocation2 + $0x124] ss:$36 sps:$4 sm:$0xff]   ;;  %v12703_v20 = vld [vmem:[#allocation2 + $0x16c] ss:$36 sps:$4 sm:$0xff]   ;;  %v12705_v21 = vld [vmem:[#allocation2 + $0x174] ss:$36 sps:$4 sm:$0xff]  }
  0x51   :  { %7387 = vmatprep.subr.bf16.mxu0 %v12685_v8  ;;  %7715 = vmatprep.subr.bf16.mxu1 %v12687_v9  ;;  %v12701_v18 = vld [vmem:[#allocation2 + $0x120] ss:$36 sps:$4 sm:$0xff]   ;;  %v12702_v19 = vld [vmem:[#allocation2 + $0x128] ss:$36 sps:$4 sm:$0xff]   ;;  %v12708_v23 = vld [vmem:[#allocation2 + $0x170] ss:$36 sps:$4 sm:$0xff]  }
  0x52   :  { %v12707_v22 = vld [vmem:[#allocation2 + $0x168] ss:$36 sps:$4 sm:$0xff]   ;;  %v12709_v24 = vld [vmem:[#allocation2 + $0x1b4] ss:$36 sps:$4 sm:$0xff]   ;;  %v12711_v25 = vld [vmem:[#allocation2 + $0x1bc] ss:$36 sps:$4 sm:$0xff]  }
  0x53   :  { %v12713_v26 = vld [vmem:[#allocation2 + $0x1b0] ss:$36 sps:$4 sm:$0xff]   ;;  %v12714_v27 = vld [vmem:[#allocation2 + $0x1b8] ss:$36 sps:$4 sm:$0xff]   ;;  %v12717_v29 = vld [vmem:[#allocation2 + $0x204] ss:$36 sps:$4 sm:$0xff]  }
  0x54   :  { %7388 = vmatpush1.bf16.msra.mxu0 %v12689_v10  ;;  %7716 = vmatpush1.bf16.msra.mxu1 %v12690_v11  ;;  %v12715_v28 = vld [vmem:[#allocation2 + $0x1fc] ss:$36 sps:$4 sm:$0xff]   ;;  %v12721_v32 = vld [vmem:[#allocation2 + $0x244] ss:$36 sps:$4 sm:$0xff]   ;;  %v12723_v33 = vld [vmem:[#allocation2 + $0x24c] ss:$36 sps:$4 sm:$0xff]  }
  0x55   :  { %7389 = vmatprep.subr.bf16.mxu0 %v12691_v12  ;;  %7717 = vmatprep.subr.bf16.mxu1 %v12693_v13  ;;  %v12719_v30 = vld [vmem:[#allocation2 + $0x1f8] ss:$36 sps:$4 sm:$0xff]   ;;  %v12720_v31 = vld [vmem:[#allocation2 + $0x200] ss:$36 sps:$4 sm:$0xff]   ;;  %v12726_v35 = vld [vmem:[#allocation2 + $0x248] ss:$36 sps:$4 sm:$0xff]  }
  0x56   :  { %v12725_v34 = vld [vmem:[#allocation2 + $0x240] ss:$36 sps:$4 sm:$0xff]   ;;  %v14828_v37 = vmov 1983009808   ;;  %v12727_v39 = vld [vmem:[#allocation2 + $0x28c] ss:$36 sps:$4 sm:$0xff]  }
  0x57   :  { %v1413_v38 = vunpack.c.l.s4 %v14828_v37  ;;  %v12729_v40 = vld [vmem:[#allocation2 + $0x294] ss:$36 sps:$4 sm:$0xff]   ;;  %v12731_v41 = vld [vmem:[#allocation2 + $0x288] ss:$36 sps:$4 sm:$0xff]   ;;  %v14919_v42 = vshrl.u32 %v1362_v36, 7  ;;  %v74_v52 = vld [vmem:[%s15162_s0] sm:$0xff] }
  0x58   :  { %7390 = vmatpush1.bf16.msra.mxu0 %v12695_v14  ;;  %7718 = vmatpush1.bf16.msra.mxu1 %v12696_v15  ;;  %v12732_v44 = vld [vmem:[#allocation2 + $0x290] ss:$36 sps:$4 sm:$0xff]   ;;  %v12735_v46 = vld [vmem:[#allocation2 + $0x2dc] ss:$36 sps:$4 sm:$0xff]   ;;  %v12741_v51 = vld [vmem:[#allocation2 + $0x324] ss:$36 sps:$4 sm:$0xff]   ;;  %v1411_v7 = vcombine.high %v74_v52, %v74_v52 }
  0x59   :  { %7391 = vmatprep.subr.bf16.mxu0 %v12697_v16  ;;  %7719 = vmatprep.subr.bf16.mxu1 %v12699_v17  ;;  %v1414_v43 = vunpack.c.0.s8 %v1413_v38  ;;  %v12733_v45 = vld [vmem:[#allocation2 + $0x2d4] ss:$36 sps:$4 sm:$0xff]   ;;  %v12739_v50 = vld [vmem:[#allocation2 + $0x31c] ss:$36 sps:$4 sm:$0xff]   ;;  %v12745_v56 = vld [vmem:[#allocation2 + $0x364] ss:$36 sps:$4 sm:$0xff]  }
  0x5a   :  { %v12737_v47 = vld [vmem:[#allocation2 + $0x2d0] ss:$36 sps:$4 sm:$0xff]   ;;  %v12738_v48 = vld [vmem:[#allocation2 + $0x2d8] ss:$36 sps:$4 sm:$0xff]   ;;  %v12744_v55 = vld [vmem:[#allocation2 + $0x320] ss:$36 sps:$4 sm:$0xff]  }
  0x5b   :  { %v14922_v49 = vsub.s32 %v1414_v43, %v14919_v42  ;;  %v12743_v53 = vld [vmem:[#allocation2 + $0x318] ss:$36 sps:$4 sm:$0xff]   ;;  %v12747_v57 = vld [vmem:[#allocation2 + $0x36c] ss:$36 sps:$4 sm:$0xff]   ;;  %v12749_v59 = vld [vmem:[#allocation2 + $0x360] ss:$36 sps:$4 sm:$0xff]  }
  0x5c   :  { %7392 = vmatpush1.bf16.msra.mxu0 %v12701_v18  ;;  %7720 = vmatpush1.bf16.msra.mxu1 %v12702_v19  ;;  %v12750_v60 = vld [vmem:[#allocation2 + $0x368] ss:$36 sps:$4 sm:$0xff]   ;;  %v12753_v62 = vld [vmem:[#allocation2 + $0x3b4] ss:$36 sps:$4 sm:$0xff]   ;;  %v12759_v2 = vld [vmem:[#allocation2 + $0x3fc] ss:$36 sps:$4 sm:$0xff]  }
  0x5d   :  { %7393 = vmatprep.subr.bf16.mxu0 %v12703_v20  ;;  %7721 = vmatprep.subr.bf16.mxu1 %v12705_v21  ;;  %v14928_v54 = vrot.slane %v74_v52, %v14922_v49  ;;  %v12751_v61 = vld [vmem:[#allocation2 + $0x3ac] ss:$36 sps:$4 sm:$0xff]   ;;  %v12757_v1 = vld [vmem:[#allocation2 + $0x3f4] ss:$36 sps:$4 sm:$0xff]   ;;  %v12763_v5 = vld [vmem:[#allocation2 + $0x43c] ss:$36 sps:$4 sm:$0xff]   ;;  %v14937_v12 = vrot.slane %v1411_v7, %v14922_v49 }
  0x5e   :  { %v12755_v63 = vld [vmem:[#allocation2 + $0x3a8] ss:$36 sps:$4 sm:$0xff]   ;;  %v12756_v0 = vld [vmem:[#allocation2 + $0x3b0] ss:$36 sps:$4 sm:$0xff]   ;;  %v12762_v4 = vld [vmem:[#allocation2 + $0x3f8] ss:$36 sps:$4 sm:$0xff]  }
  0x5f   :  { %v14932_v58 = vcombine.high %v14928_v54, %v14928_v54  ;;  %v12761_v3 = vld [vmem:[#allocation2 + $0x3f0] ss:$36 sps:$4 sm:$0xff]   ;;  %v12765_v6 = vld [vmem:[#allocation2 + $0x444] ss:$36 sps:$4 sm:$0xff]   ;;  %v12767_v8 = vld [vmem:[#allocation2 + $0x438] ss:$36 sps:$4 sm:$0xff]   ;;  %v14941_v17 = vcombine.high %v14937_v12, %v14937_v12 }
  0x60   :  { %7394 = vmatpush1.bf16.msra.mxu0 %v12707_v22  ;;  %7722 = vmatpush1.bf16.msra.mxu1 %v12708_v23  ;;  %v12768_v9 = vld [vmem:[#allocation2 + $0x440] ss:$36 sps:$4 sm:$0xff]   ;;  %v12774_v11 = vld [vmem:[#allocation2 + $0x48c] ss:$36 sps:$4 sm:$0xff]   ;;  %v12780_v16 = vld [vmem:[#allocation2 + $0x4d4] ss:$36 sps:$4 sm:$0xff]  }
  0x61   :  { %7395 = vmatprep.subr.bf16.mxu0 %v12709_v24  ;;  %7723 = vmatprep.subr.bf16.mxu1 %v12711_v25  ;;  %v12771_v10 = vld [vmem:[#allocation2 + $0x484] ss:$36 sps:$4 sm:$0xff]   ;;  %v12777_v15 = vld [vmem:[#allocation2 + $0x4cc] ss:$36 sps:$4 sm:$0xff]   ;;  %v12783_v20 = vld [vmem:[#allocation2 + $0x514] ss:$36 sps:$4 sm:$0xff]  }
  0x62   :  { %7415 = vmatprep.mubr.bf16.mxu0 %v14932_v58  ;;  %7743 = vmatprep.mubr.bf16.mxu1 %v14932_v58  ;;  %v12769_v13 = vld [vmem:[#allocation2 + $0x480] ss:$36 sps:$4 sm:$0xff]   ;;  %v12772_v14 = vld [vmem:[#allocation2 + $0x488] ss:$36 sps:$4 sm:$0xff]   ;;  %v12778_v19 = vld [vmem:[#allocation2 + $0x4d0] ss:$36 sps:$4 sm:$0xff]  }
  0x63   :  { %v12775_v18 = vld [vmem:[#allocation2 + $0x4c8] ss:$36 sps:$4 sm:$0xff]   ;;  %v12786_v21 = vld [vmem:[#allocation2 + $0x51c] ss:$36 sps:$4 sm:$0xff]   ;;  %v12781_v22 = vld [vmem:[#allocation2 + $0x510] ss:$36 sps:$4 sm:$0xff]  }
  0x64   :  { %7396 = vmatpush1.bf16.msra.mxu0 %v12713_v26  ;;  %7724 = vmatpush1.bf16.msra.mxu1 %v12714_v27  ;;  %v12784_v23 = vld [vmem:[#allocation2 + $0x518] ss:$36 sps:$4 sm:$0xff]   ;;  %v12792_v25 = vld [vmem:[#allocation2 + $0x564] ss:$36 sps:$4 sm:$0xff]   ;;  %v12805_v38 = vld [vmem:[#allocation2 + $0x630] ss:$36 sps:$4 sm:$0xff]  }
  0x65   :  { %7397 = vmatprep.subr.bf16.mxu0 %v12715_v28  ;;  %7725 = vmatprep.subr.bf16.mxu1 %v12717_v29  ;;  %v12789_v24 = vld [vmem:[#allocation2 + $0x55c] ss:$36 sps:$4 sm:$0xff]   ;;  %v12795_v28 = vld [vmem:[#allocation2 + $0x5a4] ss:$36 sps:$4 sm:$0xff]   ;;  %v12798_v29 = vld [vmem:[#allocation2 + $0x5ac] ss:$36 sps:$4 sm:$0xff]  }
  0x66   :  { %v12787_v26 = vld [vmem:[#allocation2 + $0x558] ss:$36 sps:$4 sm:$0xff]   ;;  %v12790_v27 = vld [vmem:[#allocation2 + $0x560] ss:$36 sps:$4 sm:$0xff]   ;;  %v12823_v52 = vld [vmem:[#allocation2 + $0x708] ss:$36 sps:$4 sm:$0xff]  }
  0x67   :  { %v12807_v36 = vld [vmem:[#allocation2 + $0x634] ss:$36 sps:$4 sm:$0xff]   ;;  %v12810_v37 = vld [vmem:[#allocation2 + $0x63c] ss:$36 sps:$4 sm:$0xff]  }
  0x68   :  { %7398 = vmatpush1.bf16.msra.mxu0 %v12719_v30  ;;  %7726 = vmatpush1.bf16.msra.mxu1 %v12720_v31  ;;  %v12793_v30 = vld [vmem:[#allocation2 + $0x5a0] ss:$36 sps:$4 sm:$0xff]   ;;  %v12796_v31 = vld [vmem:[#allocation2 + $0x5a8] ss:$36 sps:$4 sm:$0xff]   ;;  %v12811_v43 = vld [vmem:[#allocation2 + $0x678] ss:$36 sps:$4 sm:$0xff]  }
  0x69   :  { %7399 = vmatprep.subr.bf16.mxu0 %v12721_v32  ;;  %7727 = vmatprep.subr.bf16.mxu1 %v12723_v33  ;;  %v12801_v32 = vld [vmem:[#allocation2 + $0x5ec] ss:$36 sps:$4 sm:$0xff]   ;;  %v12804_v33 = vld [vmem:[#allocation2 + $0x5f4] ss:$36 sps:$4 sm:$0xff]  }
  0x6a   :  { %v12850_v7 = vld [vmem:[#allocation2 + $0x830] ss:$36 sps:$4 sm:$0xff]  }
  0x6c   :  { %7400 = vmatpush1.bf16.msra.mxu0 %v12725_v34  ;;  %7728 = vmatpush1.bf16.msra.mxu1 %v12726_v35  ;;  %v12799_v34 = vld [vmem:[#allocation2 + $0x5e8] ss:$36 sps:$4 sm:$0xff]   ;;  %v12802_v35 = vld [vmem:[#allocation2 + $0x5f0] ss:$36 sps:$4 sm:$0xff]  }
  0x6d   :  { %7401 = vmatprep.subr.bf16.mxu0 %v12727_v39  ;;  %7729 = vmatprep.subr.bf16.mxu1 %v12729_v40  ;;  %v12808_v39 = vld [vmem:[#allocation2 + $0x638] ss:$36 sps:$4 sm:$0xff]  }
  0x6e   :  { %v12813_v40 = vld [vmem:[#allocation2 + $0x67c] ss:$36 sps:$4 sm:$0xff]  }
  0x70   :  { %7402 = vmatpush1.bf16.msra.mxu0 %v12731_v41  ;;  %7730 = vmatpush1.bf16.msra.mxu1 %v12732_v44  ;;  %v12816_v41 = vld [vmem:[#allocation2 + $0x684] ss:$36 sps:$4 sm:$0xff]  }
  0x71   :  { %7403 = vmatprep.subr.bf16.mxu0 %v12733_v45  ;;  %7731 = vmatprep.subr.bf16.mxu1 %v12735_v46  ;;  %v12814_v44 = vld [vmem:[#allocation2 + $0x680] ss:$36 sps:$4 sm:$0xff]   ;;  %v12822_v46 = vld [vmem:[#allocation2 + $0x6cc] ss:$36 sps:$4 sm:$0xff]  }
  0x72   :  { %v12819_v45 = vld [vmem:[#allocation2 + $0x6c4] ss:$36 sps:$4 sm:$0xff]  }
  0x74   :  { %7404 = vmatpush1.bf16.msra.mxu0 %v12737_v47  ;;  %7732 = vmatpush1.bf16.msra.mxu1 %v12738_v48  ;;  %v12817_v47 = vld [vmem:[#allocation2 + $0x6c0] ss:$36 sps:$4 sm:$0xff]   ;;  %v12820_v48 = vld [vmem:[#allocation2 + $0x6c8] ss:$36 sps:$4 sm:$0xff]  }
  0x75   :  { %7405 = vmatprep.subr.bf16.mxu0 %v12739_v50  ;;  %7733 = vmatprep.subr.bf16.mxu1 %v12741_v51  ;;  %v12825_v50 = vld [vmem:[#allocation2 + $0x70c] ss:$36 sps:$4 sm:$0xff]   ;;  %v12828_v51 = vld [vmem:[#allocation2 + $0x714] ss:$36 sps:$4 sm:$0xff]  }
  0x78   :  { %7406 = vmatpush1.bf16.msra.mxu0 %v12743_v53  ;;  %7734 = vmatpush1.bf16.msra.mxu1 %v12744_v55  ;;  %v12826_v53 = vld [vmem:[#allocation2 + $0x710] ss:$36 sps:$4 sm:$0xff]  }
  0x79   :  { %7407 = vmatprep.subr.bf16.mxu0 %v12745_v56  ;;  %7735 = vmatprep.subr.bf16.mxu1 %v12747_v57  ;;  %v12831_v55 = vld [vmem:[#allocation2 + $0x754] ss:$36 sps:$4 sm:$0xff]   ;;  %v12834_v56 = vld [vmem:[#allocation2 + $0x75c] ss:$36 sps:$4 sm:$0xff]  }
  0x7a   :  { %v12829_v57 = vld [vmem:[#allocation2 + $0x750] ss:$36 sps:$4 sm:$0xff]  }
  0x7c   :  { %7408 = vmatpush1.bf16.msra.mxu0 %v12749_v59  ;;  %7736 = vmatpush1.bf16.msra.mxu1 %v12750_v60  ;;  %v12832_v59 = vld [vmem:[#allocation2 + $0x758] ss:$36 sps:$4 sm:$0xff]  }
  0x7d   :  { %7409 = vmatprep.subr.bf16.mxu0 %v12751_v61  ;;  %7737 = vmatprep.subr.bf16.mxu1 %v12753_v62  ;;  %v12837_v60 = vld [vmem:[#allocation2 + $0x79c] ss:$36 sps:$4 sm:$0xff]   ;;  %v12840_v61 = vld [vmem:[#allocation2 + $0x7a4] ss:$36 sps:$4 sm:$0xff]  }
  0x7e   :  { %v12835_v62 = vld [vmem:[#allocation2 + $0x798] ss:$36 sps:$4 sm:$0xff]  }
  0x80   :  { %7410 = vmatpush1.bf16.msra.mxu0 %v12755_v63  ;;  %7738 = vmatpush1.bf16.msra.mxu1 %v12756_v0  ;;  %v12838_v63 = vld [vmem:[#allocation2 + $0x7a0] ss:$36 sps:$4 sm:$0xff]  }
  0x81   :  { %7411 = vmatprep.subr.bf16.mxu0 %v12757_v1  ;;  %7739 = vmatprep.subr.bf16.mxu1 %v12759_v2  ;;  %v12843_v0 = vld [vmem:[#allocation2 + $0x7e4] ss:$36 sps:$4 sm:$0xff]   ;;  %v12846_v1 = vld [vmem:[#allocation2 + $0x7ec] ss:$36 sps:$4 sm:$0xff]  }
  0x82   :  { %v12841_v2 = vld [vmem:[#allocation2 + $0x7e0] ss:$36 sps:$4 sm:$0xff]  }
  0x84   :  { %7412 = vmatpush1.bf16.msra.mxu0 %v12761_v3  ;;  %7740 = vmatpush1.bf16.msra.mxu1 %v12762_v4  ;;  %v12844_v3 = vld [vmem:[#allocation2 + $0x7e8] ss:$36 sps:$4 sm:$0xff]  }
  0x85   :  { %7413 = vmatprep.subr.bf16.mxu0 %v12763_v5  ;;  %7741 = vmatprep.subr.bf16.mxu1 %v12765_v6  ;;  %v12849_v4 = vld [vmem:[#allocation2 + $0x82c] ss:$36 sps:$4 sm:$0xff]   ;;  %v12852_v5 = vld [vmem:[#allocation2 + $0x834] ss:$36 sps:$4 sm:$0xff]  }
  0x86   :  { %v12847_v6 = vld [vmem:[#allocation2 + $0x828] ss:$36 sps:$4 sm:$0xff]  }
  0x88   :  { %7414 = vmatpush1.bf16.msra.mxu0 %v12767_v8  ;;  %7742 = vmatpush1.bf16.msra.mxu1 %v12768_v9  ;;  %v12855_v8 = vld [vmem:[#allocation2 + $0x874] ss:$36 sps:$4 sm:$0xff]   ;;  %v12858_v9 = vld [vmem:[#allocation2 + $0x87c] ss:$36 sps:$4 sm:$0xff]  }
  0x89   :  { %7424 = vmatprep.subr.bf16.mxu0 %v12771_v10  ;;  %7752 = vmatprep.subr.bf16.mxu1 %v12774_v11  ;;  %v12853_v10 = vld [vmem:[#allocation2 + $0x870] ss:$36 sps:$4 sm:$0xff]   ;;  %v12856_v11 = vld [vmem:[#allocation2 + $0x878] ss:$36 sps:$4 sm:$0xff]  }
  0x8b   :  { %7416 = vmatmul.mubr.bf16.vlgmr.msra.gmra.mrb[0].mxu0 %v14928_v54  ;;  %7744 = vmatmul.mubr.bf16.vlgmr.msra.gmra.mrb[0].mxu1 %v14928_v54 }
  0x8c   :  { %7425 = vmatpush1.bf16.msra.mxu0 %v12769_v13  ;;  %7753 = vmatpush1.bf16.msra.mxu1 %v12772_v14  ;;  %v12861_v13 = vld [vmem:[#allocation2 + $0x8bc] ss:$36 sps:$4 sm:$0xff]   ;;  %v12864_v14 = vld [vmem:[#allocation2 + $0x8c4] ss:$36 sps:$4 sm:$0xff]  }
  0x8d   :  { %7426 = vmatprep.subr.bf16.mxu0 %v12777_v15  ;;  %7754 = vmatprep.subr.bf16.mxu1 %v12780_v16  ;;  %v12859_v15 = vld [vmem:[#allocation2 + $0x8b8] ss:$36 sps:$4 sm:$0xff]   ;;  %v12862_v16 = vld [vmem:[#allocation2 + $0x8c0] ss:$36 sps:$4 sm:$0xff]  }
  0x8e   :  { %7456 = vmatprep.mubr.bf16.mxu0 %v14941_v17  ;;  %7784 = vmatprep.mubr.bf16.mxu1 %v14941_v17 }
  0x90   :  { %7427 = vmatpush1.bf16.msra.mxu0 %v12775_v18  ;;  %7755 = vmatpush1.bf16.msra.mxu1 %v12778_v19  ;;  %v12868_v18 = vld [vmem:[#allocation2 + $0x904] ss:$36 sps:$4 sm:$0xff]   ;;  %v12871_v19 = vld [vmem:[#allocation2 + $0x90c] ss:$36 sps:$4 sm:$0xff]  }
  0x91   :  { %7428 = vmatprep.subr.bf16.mxu0 %v12783_v20  ;;  %7756 = vmatprep.subr.bf16.mxu1 %v12786_v21  ;;  %v12866_v20 = vld [vmem:[#allocation2 + $0x900] ss:$36 sps:$4 sm:$0xff]   ;;  %v12869_v21 = vld [vmem:[#allocation2 + $0x908] ss:$36 sps:$4 sm:$0xff]  }
  0x94   :  { %7429 = vmatpush1.bf16.msra.mxu0 %v12781_v22  ;;  %7757 = vmatpush1.bf16.msra.mxu1 %v12784_v23  ;;  %v14950_v22 = vld [vmem:[%s15162_s0 + $0x8] sm:$0xff] }
  0x95   :  { %7430 = vmatprep.subr.bf16.mxu0 %v12789_v24  ;;  %7758 = vmatprep.subr.bf16.mxu1 %v12792_v25  ;;  %v12874_v23 = vld [vmem:[#allocation2 + $0x94c] ss:$36 sps:$4 sm:$0xff]   ;;  %v12877_v24 = vld [vmem:[#allocation2 + $0x954] ss:$36 sps:$4 sm:$0xff]   ;;  %v14954_v25 = vrot.slane %v14950_v22, %v14922_v49 }
  0x98   :  { %7431 = vmatpush1.bf16.msra.mxu0 %v12787_v26  ;;  %7759 = vmatpush1.bf16.msra.mxu1 %v12790_v27  ;;  %v14960_v26 = vcombine.high %v14954_v25, %v14954_v25  ;;  %v12872_v27 = vld [vmem:[#allocation2 + $0x948] ss:$36 sps:$4 sm:$0xff]  }
  0x99   :  { %7432 = vmatprep.subr.bf16.mxu0 %v12795_v28  ;;  %7760 = vmatprep.subr.bf16.mxu1 %v12798_v29  ;;  %v12875_v28 = vld [vmem:[#allocation2 + $0x950] ss:$36 sps:$4 sm:$0xff]  }
  0x9a   :  { %v12880_v29 = vld [vmem:[#allocation2 + $0x994] ss:$36 sps:$4 sm:$0xff]  }
  0x9c   :  { %7433 = vmatpush1.bf16.msra.mxu0 %v12793_v30  ;;  %7761 = vmatpush1.bf16.msra.mxu1 %v12796_v31  ;;  %v12883_v30 = vld [vmem:[#allocation2 + $0x99c] ss:$36 sps:$4 sm:$0xff]   ;;  %v12878_v31 = vld [vmem:[#allocation2 + $0x990] ss:$36 sps:$4 sm:$0xff]  }
  0x9d   :  { %7434 = vmatprep.subr.bf16.mxu0 %v12801_v32  ;;  %7762 = vmatprep.subr.bf16.mxu1 %v12804_v33  ;;  %v12881_v32 = vld [vmem:[#allocation2 + $0x998] ss:$36 sps:$4 sm:$0xff]  }
  0x9e   :  { %v12886_v33 = vld [vmem:[#allocation2 + $0x9dc] ss:$36 sps:$4 sm:$0xff]  }
  0xa0   :  { %7435 = vmatpush1.bf16.msra.mxu0 %v12799_v34  ;;  %7763 = vmatpush1.bf16.msra.mxu1 %v12802_v35  ;;  %v12889_v34 = vld [vmem:[#allocation2 + $0x9e4] ss:$36 sps:$4 sm:$0xff]   ;;  %v12884_v35 = vld [vmem:[#allocation2 + $0x9d8] ss:$36 sps:$4 sm:$0xff]  }
  0xa1   :  { %7436 = vmatprep.subr.bf16.mxu0 %v12807_v36  ;;  %7764 = vmatprep.subr.bf16.mxu1 %v12810_v37  ;;  %v12887_v36 = vld [vmem:[#allocation2 + $0x9e0] ss:$36 sps:$4 sm:$0xff]  }
  0xa2   :  { %v12892_v37 = vld [vmem:[#allocation2 + $0xa24] ss:$36 sps:$4 sm:$0xff]  }
  0xa4   :  { %7437 = vmatpush1.bf16.msra.mxu0 %v12805_v38  ;;  %7765 = vmatpush1.bf16.msra.mxu1 %v12808_v39  ;;  %v12895_v38 = vld [vmem:[#allocation2 + $0xa2c] ss:$36 sps:$4 sm:$0xff]   ;;  %v12890_v39 = vld [vmem:[#allocation2 + $0xa20] ss:$36 sps:$4 sm:$0xff]  }
  0xa5   :  { %7438 = vmatprep.subr.bf16.mxu0 %v12813_v40  ;;  %7766 = vmatprep.subr.bf16.mxu1 %v12816_v41  ;;  %v12893_v40 = vld [vmem:[#allocation2 + $0xa28] ss:$36 sps:$4 sm:$0xff]  }
  0xa6   :  { %v12898_v41 = vld [vmem:[#allocation2 + $0xa6c] ss:$36 sps:$4 sm:$0xff]  }
  0xa8   :  { %7439 = vmatpush1.bf16.msra.mxu0 %v12811_v43  ;;  %7767 = vmatpush1.bf16.msra.mxu1 %v12814_v44  ;;  %v12901_v43 = vld [vmem:[#allocation2 + $0xa74] ss:$36 sps:$4 sm:$0xff]   ;;  %v12896_v44 = vld [vmem:[#allocation2 + $0xa68] ss:$36 sps:$4 sm:$0xff]  }
  0xa9   :  { %7440 = vmatprep.subr.bf16.mxu0 %v12819_v45  ;;  %7768 = vmatprep.subr.bf16.mxu1 %v12822_v46  ;;  %v12899_v45 = vld [vmem:[#allocation2 + $0xa70] ss:$36 sps:$4 sm:$0xff]  }
  0xaa   :  { %v12904_v46 = vld [vmem:[#allocation2 + $0xab4] ss:$36 sps:$4 sm:$0xff]  }
  0xac   :  { %7441 = vmatpush1.bf16.msra.mxu0 %v12817_v47  ;;  %7769 = vmatpush1.bf16.msra.mxu1 %v12820_v48  ;;  %v12907_v47 = vld [vmem:[#allocation2 + $0xabc] ss:$36 sps:$4 sm:$0xff]   ;;  %v12902_v48 = vld [vmem:[#allocation2 + $0xab0] ss:$36 sps:$4 sm:$0xff]  }
  0xad   :  { %7442 = vmatprep.subr.bf16.mxu0 %v12825_v50  ;;  %7770 = vmatprep.subr.bf16.mxu1 %v12828_v51  ;;  %v12905_v50 = vld [vmem:[#allocation2 + $0xab8] ss:$36 sps:$4 sm:$0xff]  }
  0xae   :  { %v12910_v51 = vld [vmem:[#allocation2 + $0xafc] ss:$36 sps:$4 sm:$0xff]  }
  0xb0   :  { %7443 = vmatpush1.bf16.msra.mxu0 %v12823_v52  ;;  %7771 = vmatpush1.bf16.msra.mxu1 %v12826_v53  ;;  %v12913_v52 = vld [vmem:[#allocation2 + $0xb04] ss:$36 sps:$4 sm:$0xff]   ;;  %v12908_v53 = vld [vmem:[#allocation2 + $0xaf8] ss:$36 sps:$4 sm:$0xff]  }
  0xb1   :  { %7444 = vmatprep.subr.bf16.mxu0 %v12831_v55  ;;  %7772 = vmatprep.subr.bf16.mxu1 %v12834_v56  ;;  %v12911_v55 = vld [vmem:[#allocation2 + $0xb00] ss:$36 sps:$4 sm:$0xff]  }
  0xb2   :  { %v12916_v56 = vld [vmem:[#allocation2 + $0xb44] ss:$36 sps:$4 sm:$0xff]  }
  0xb4   :  { %7445 = vmatpush1.bf16.msra.mxu0 %v12829_v57  ;;  %7773 = vmatpush1.bf16.msra.mxu1 %v12832_v59  ;;  %v12919_v57 = vld [vmem:[#allocation2 + $0xb4c] ss:$36 sps:$4 sm:$0xff]   ;;  %v12914_v59 = vld [vmem:[#allocation2 + $0xb40] ss:$36 sps:$4 sm:$0xff]  }
  0xb5   :  { %7446 = vmatprep.subr.bf16.mxu0 %v12837_v60  ;;  %7774 = vmatprep.subr.bf16.mxu1 %v12840_v61  ;;  %v12917_v60 = vld [vmem:[#allocation2 + $0xb48] ss:$36 sps:$4 sm:$0xff]  }
  0xb6   :  { %v12922_v61 = vld [vmem:[#allocation2 + $0xb8c] ss:$36 sps:$4 sm:$0xff]  }
  0xb8   :  { %7447 = vmatpush1.bf16.msra.mxu0 %v12835_v62  ;;  %7775 = vmatpush1.bf16.msra.mxu1 %v12838_v63  ;;  %v12925_v62 = vld [vmem:[#allocation2 + $0xb94] ss:$36 sps:$4 sm:$0xff]   ;;  %v12920_v63 = vld [vmem:[#allocation2 + $0xb88] ss:$36 sps:$4 sm:$0xff]  }
  0xb9   :  { %7448 = vmatprep.subr.bf16.mxu0 %v12843_v0  ;;  %7776 = vmatprep.subr.bf16.mxu1 %v12846_v1  ;;  %v12923_v0 = vld [vmem:[#allocation2 + $0xb90] ss:$36 sps:$4 sm:$0xff]  }
  0xba   :  { %v12928_v1 = vld [vmem:[#allocation2 + $0xbd4] ss:$36 sps:$4 sm:$0xff]  }
  0xbc   :  { %7449 = vmatpush1.bf16.msra.mxu0 %v12841_v2  ;;  %7777 = vmatpush1.bf16.msra.mxu1 %v12844_v3  ;;  %v12931_v2 = vld [vmem:[#allocation2 + $0xbdc] ss:$36 sps:$4 sm:$0xff]   ;;  %v12926_v3 = vld [vmem:[#allocation2 + $0xbd0] ss:$36 sps:$4 sm:$0xff]  }
  0xbd   :  { %7450 = vmatprep.subr.bf16.mxu0 %v12849_v4  ;;  %7778 = vmatprep.subr.bf16.mxu1 %v12852_v5  ;;  %v12929_v4 = vld [vmem:[#allocation2 + $0xbd8] ss:$36 sps:$4 sm:$0xff]  }
  0xbe   :  { %v12934_v5 = vld [vmem:[#allocation2 + $0xc1c] ss:$36 sps:$4 sm:$0xff]  }
  0xc0   :  { %7451 = vmatpush1.bf16.msra.mxu0 %v12847_v6  ;;  %7779 = vmatpush1.bf16.msra.mxu1 %v12850_v7  ;;  %v12937_v6 = vld [vmem:[#allocation2 + $0xc24] ss:$36 sps:$4 sm:$0xff]   ;;  %v12932_v7 = vld [vmem:[#allocation2 + $0xc18] ss:$36 sps:$4 sm:$0xff]  }
  0xc1   :  { %7452 = vmatprep.subr.bf16.mxu0 %v12855_v8  ;;  %7780 = vmatprep.subr.bf16.mxu1 %v12858_v9  ;;  %v12935_v8 = vld [vmem:[#allocation2 + $0xc20] ss:$36 sps:$4 sm:$0xff]  }
  0xc2   :  { %v12940_v9 = vld [vmem:[#allocation2 + $0xc64] ss:$36 sps:$4 sm:$0xff]  }
  0xc4   :  { %7453 = vmatpush1.bf16.msra.mxu0 %v12853_v10  ;;  %7781 = vmatpush1.bf16.msra.mxu1 %v12856_v11  ;;  %v12943_v10 = vld [vmem:[#allocation2 + $0xc6c] ss:$36 sps:$4 sm:$0xff]   ;;  %v12938_v11 = vld [vmem:[#allocation2 + $0xc60] ss:$36 sps:$4 sm:$0xff]  }
  0xc5   :  { %7454 = vmatprep.subr.bf16.mxu0 %v12861_v13  ;;  %7782 = vmatprep.subr.bf16.mxu1 %v12864_v14  ;;  %v12941_v13 = vld [vmem:[#allocation2 + $0xc68] ss:$36 sps:$4 sm:$0xff]  }
  0xc6   :  { %v12946_v14 = vld [vmem:[#allocation2 + $0xcac] ss:$36 sps:$4 sm:$0xff]  }
  0xc8   :  { %7455 = vmatpush1.bf16.msra.mxu0 %v12859_v15  ;;  %7783 = vmatpush1.bf16.msra.mxu1 %v12862_v16  ;;  %v12949_v15 = vld [vmem:[#allocation2 + $0xcb4] ss:$36 sps:$4 sm:$0xff]   ;;  %v12944_v16 = vld [vmem:[#allocation2 + $0xca8] ss:$36 sps:$4 sm:$0xff]  }
  0xc9   :  { %7465 = vmatprep.subr.bf16.mxu0 %v12868_v18  ;;  %7793 = vmatprep.subr.bf16.mxu1 %v12871_v19  ;;  %v12947_v18 = vld [vmem:[#allocation2 + $0xcb0] ss:$36 sps:$4 sm:$0xff]  }
  0xca   :  { %v12952_v19 = vld [vmem:[#allocation2 + $0xcf4] ss:$36 sps:$4 sm:$0xff]  }
  0xcb   :  { %7457 = vmatmul.mubr.bf16.vlgmr.msra.gmra.mrb[0].mxu0 %v14937_v12  ;;  %7785 = vmatmul.mubr.bf16.vlgmr.msra.gmra.mrb[0].mxu1 %v14937_v12 }
  0xcc   :  { %7466 = vmatpush1.bf16.msra.mxu0 %v12866_v20  ;;  %7794 = vmatpush1.bf16.msra.mxu1 %v12869_v21  ;;  %v12955_v20 = vld [vmem:[#allocation2 + $0xcfc] ss:$36 sps:$4 sm:$0xff]   ;;  %v12950_v21 = vld [vmem:[#allocation2 + $0xcf0] ss:$36 sps:$4 sm:$0xff]  }
  0xcd   :  { %7467 = vmatprep.subr.bf16.mxu0 %v12874_v23  ;;  %7795 = vmatprep.subr.bf16.mxu1 %v12877_v24  ;;  %v12953_v23 = vld [vmem:[#allocation2 + $0xcf8] ss:$36 sps:$4 sm:$0xff]  }
  0xce   :  { %7497 = vmatprep.mubr.bf16.mxu0 %v14960_v26  ;;  %7825 = vmatprep.mubr.bf16.mxu1 %v14960_v26  ;;  %v12958_v24 = vld [vmem:[#allocation2 + $0xd3c] ss:$36 sps:$4 sm:$0xff]  }
  0xd0   :  { %7468 = vmatpush1.bf16.msra.mxu0 %v12872_v27  ;;  %7796 = vmatpush1.bf16.msra.mxu1 %v12875_v28  ;;  %v12961_v27 = vld [vmem:[#allocation2 + $0xd44] ss:$36 sps:$4 sm:$0xff]   ;;  %v1428_v28 = vcombine.high %v14950_v22, %v14950_v22 }
  0xd1   :  { %7469 = vmatprep.subr.bf16.mxu0 %v12880_v29  ;;  %7797 = vmatprep.subr.bf16.mxu1 %v12883_v30  ;;  %v12956_v29 = vld [vmem:[#allocation2 + $0xd38] ss:$36 sps:$4 sm:$0xff]   ;;  %v12959_v30 = vld [vmem:[#allocation2 + $0xd40] ss:$36 sps:$4 sm:$0xff]  }
  0xd4   :  { %7470 = vmatpush1.bf16.msra.mxu0 %v12878_v31  ;;  %7798 = vmatpush1.bf16.msra.mxu1 %v12881_v32  ;;  %v12964_v31 = vld [vmem:[#allocation2 + $0xd84] ss:$36 sps:$4 sm:$0xff]   ;;  %v12967_v32 = vld [vmem:[#allocation2 + $0xd8c] ss:$36 sps:$4 sm:$0xff]  }
  0xd5   :  { %7471 = vmatprep.subr.bf16.mxu0 %v12886_v33  ;;  %7799 = vmatprep.subr.bf16.mxu1 %v12889_v34  ;;  %v14967_v33 = vrot.slane %v1428_v28, %v14922_v49  ;;  %v12962_v34 = vld [vmem:[#allocation2 + $0xd80] ss:$36 sps:$4 sm:$0xff]   ;;  %v13037_v28 = vld [vmem:[#allocation2 + $0x10e8] ss:$36 sps:$4 sm:$0xff]  }
  0xd7   :  { %v14971_v22 = vcombine.high %v14967_v33, %v14967_v33 }
  0xd8   :  { %7472 = vmatpush1.bf16.msra.mxu0 %v12884_v35  ;;  %7800 = vmatpush1.bf16.msra.mxu1 %v12887_v36  ;;  %v12965_v35 = vld [vmem:[#allocation2 + $0xd88] ss:$36 sps:$4 sm:$0xff]  }
  0xd9   :  { %7473 = vmatprep.subr.bf16.mxu0 %v12892_v37  ;;  %7801 = vmatprep.subr.bf16.mxu1 %v12895_v38  ;;  %v12970_v36 = vld [vmem:[#allocation2 + $0xdcc] ss:$36 sps:$4 sm:$0xff]   ;;  %v12973_v37 = vld [vmem:[#allocation2 + $0xdd4] ss:$36 sps:$4 sm:$0xff]  }
  0xda   :  { %v12968_v38 = vld [vmem:[#allocation2 + $0xdc8] ss:$36 sps:$4 sm:$0xff]  }
  0xdc   :  { %7474 = vmatpush1.bf16.msra.mxu0 %v12890_v39  ;;  %7802 = vmatpush1.bf16.msra.mxu1 %v12893_v40  ;;  %v12971_v39 = vld [vmem:[#allocation2 + $0xdd0] ss:$36 sps:$4 sm:$0xff]  }
  0xdd   :  { %7475 = vmatprep.subr.bf16.mxu0 %v12898_v41  ;;  %7803 = vmatprep.subr.bf16.mxu1 %v12901_v43  ;;  %v12976_v40 = vld [vmem:[#allocation2 + $0xe14] ss:$36 sps:$4 sm:$0xff]   ;;  %v12979_v41 = vld [vmem:[#allocation2 + $0xe1c] ss:$36 sps:$4 sm:$0xff]  }
  0xde   :  { %v12974_v43 = vld [vmem:[#allocation2 + $0xe10] ss:$36 sps:$4 sm:$0xff]  }
  0xe0   :  { %7476 = vmatpush1.bf16.msra.mxu0 %v12896_v44  ;;  %7804 = vmatpush1.bf16.msra.mxu1 %v12899_v45  ;;  %v12977_v44 = vld [vmem:[#allocation2 + $0xe18] ss:$36 sps:$4 sm:$0xff]  }
  0xe1   :  { %7477 = vmatprep.subr.bf16.mxu0 %v12904_v46  ;;  %7805 = vmatprep.subr.bf16.mxu1 %v12907_v47  ;;  %v12982_v45 = vld [vmem:[#allocation2 + $0xe5c] ss:$36 sps:$4 sm:$0xff]   ;;  %v12985_v46 = vld [vmem:[#allocation2 + $0xe64] ss:$36 sps:$4 sm:$0xff]  }
  0xe2   :  { %v12980_v47 = vld [vmem:[#allocation2 + $0xe58] ss:$36 sps:$4 sm:$0xff]  }
  0xe4   :  { %7478 = vmatpush1.bf16.msra.mxu0 %v12902_v48  ;;  %7806 = vmatpush1.bf16.msra.mxu1 %v12905_v50  ;;  %v12983_v48 = vld [vmem:[#allocation2 + $0xe60] ss:$36 sps:$4 sm:$0xff]  }
  0xe5   :  { %7479 = vmatprep.subr.bf16.mxu0 %v12910_v51  ;;  %7807 = vmatprep.subr.bf16.mxu1 %v12913_v52  ;;  %v12988_v50 = vld [vmem:[#allocation2 + $0xea4] ss:$36 sps:$4 sm:$0xff]   ;;  %v12991_v51 = vld [vmem:[#allocation2 + $0xeac] ss:$36 sps:$4 sm:$0xff]  }
  0xe6   :  { %v12986_v52 = vld [vmem:[#allocation2 + $0xea0] ss:$36 sps:$4 sm:$0xff]  }
  0xe8   :  { %7480 = vmatpush1.bf16.msra.mxu0 %v12908_v53  ;;  %7808 = vmatpush1.bf16.msra.mxu1 %v12911_v55  ;;  %v12989_v53 = vld [vmem:[#allocation2 + $0xea8] ss:$36 sps:$4 sm:$0xff]  }
  0xe9   :  { %7481 = vmatprep.subr.bf16.mxu0 %v12916_v56  ;;  %7809 = vmatprep.subr.bf16.mxu1 %v12919_v57  ;;  %v12994_v55 = vld [vmem:[#allocation2 + $0xeec] ss:$36 sps:$4 sm:$0xff]   ;;  %v12997_v56 = vld [vmem:[#allocation2 + $0xef4] ss:$36 sps:$4 sm:$0xff]  }
  0xea   :  { %v12992_v57 = vld [vmem:[#allocation2 + $0xee8] ss:$36 sps:$4 sm:$0xff]  }
  0xec   :  { %7482 = vmatpush1.bf16.msra.mxu0 %v12914_v59  ;;  %7810 = vmatpush1.bf16.msra.mxu1 %v12917_v60  ;;  %v12995_v59 = vld [vmem:[#allocation2 + $0xef0] ss:$36 sps:$4 sm:$0xff]  }
  0xed   :  { %7483 = vmatprep.subr.bf16.mxu0 %v12922_v61  ;;  %7811 = vmatprep.subr.bf16.mxu1 %v12925_v62  ;;  %v13000_v60 = vld [vmem:[#allocation2 + $0xf34] ss:$36 sps:$4 sm:$0xff]   ;;  %v13003_v61 = vld [vmem:[#allocation2 + $0xf3c] ss:$36 sps:$4 sm:$0xff]  }
  0xee   :  { %v12998_v62 = vld [vmem:[#allocation2 + $0xf30] ss:$36 sps:$4 sm:$0xff]  }
  0xf0   :  { %7484 = vmatpush1.bf16.msra.mxu0 %v12920_v63  ;;  %7812 = vmatpush1.bf16.msra.mxu1 %v12923_v0  ;;  %v13001_v63 = vld [vmem:[#allocation2 + $0xf38] ss:$36 sps:$4 sm:$0xff]  }
  0xf1   :  { %7485 = vmatprep.subr.bf16.mxu0 %v12928_v1  ;;  %7813 = vmatprep.subr.bf16.mxu1 %v12931_v2  ;;  %v13006_v0 = vld [vmem:[#allocation2 + $0xf7c] ss:$36 sps:$4 sm:$0xff]   ;;  %v13009_v1 = vld [vmem:[#allocation2 + $0xf84] ss:$36 sps:$4 sm:$0xff]  }
  0xf2   :  { %v13004_v2 = vld [vmem:[#allocation2 + $0xf78] ss:$36 sps:$4 sm:$0xff]  }
  0xf4   :  { %7486 = vmatpush1.bf16.msra.mxu0 %v12926_v3  ;;  %7814 = vmatpush1.bf16.msra.mxu1 %v12929_v4  ;;  %v13007_v3 = vld [vmem:[#allocation2 + $0xf80] ss:$36 sps:$4 sm:$0xff]  }
  0xf5   :  { %7487 = vmatprep.subr.bf16.mxu0 %v12934_v5  ;;  %7815 = vmatprep.subr.bf16.mxu1 %v12937_v6  ;;  %v13012_v4 = vld [vmem:[#allocation2 + $0xfc4] ss:$36 sps:$4 sm:$0xff]   ;;  %v13015_v5 = vld [vmem:[#allocation2 + $0xfcc] ss:$36 sps:$4 sm:$0xff]  }
  0xf6   :  { %v13010_v6 = vld [vmem:[#allocation2 + $0xfc0] ss:$36 sps:$4 sm:$0xff]  }
  0xf8   :  { %7488 = vmatpush1.bf16.msra.mxu0 %v12932_v7  ;;  %7816 = vmatpush1.bf16.msra.mxu1 %v12935_v8  ;;  %v13013_v7 = vld [vmem:[#allocation2 + $0xfc8] ss:$36 sps:$4 sm:$0xff]  }
  0xf9   :  { %7489 = vmatprep.subr.bf16.mxu0 %v12940_v9  ;;  %7817 = vmatprep.subr.bf16.mxu1 %v12943_v10  ;;  %v13018_v8 = vld [vmem:[#allocation2 + $0x100c] ss:$36 sps:$4 sm:$0xff]   ;;  %v13021_v9 = vld [vmem:[#allocation2 + $0x1014] ss:$36 sps:$4 sm:$0xff]  }
  0xfa   :  { %v13016_v10 = vld [vmem:[#allocation2 + $0x1008] ss:$36 sps:$4 sm:$0xff]  }
  0xfc   :  { %7490 = vmatpush1.bf16.msra.mxu0 %v12938_v11  ;;  %7818 = vmatpush1.bf16.msra.mxu1 %v12941_v13  ;;  %v13019_v11 = vld [vmem:[#allocation2 + $0x1010] ss:$36 sps:$4 sm:$0xff]  }
  0xfd   :  { %7491 = vmatprep.subr.bf16.mxu0 %v12946_v14  ;;  %7819 = vmatprep.subr.bf16.mxu1 %v12949_v15  ;;  %v13024_v13 = vld [vmem:[#allocation2 + $0x1054] ss:$36 sps:$4 sm:$0xff]   ;;  %v13027_v14 = vld [vmem:[#allocation2 + $0x105c] ss:$36 sps:$4 sm:$0xff]  }
  0xfe   :  { %v13022_v15 = vld [vmem:[#allocation2 + $0x1050] ss:$36 sps:$4 sm:$0xff]  }
 0x100   :  { %7492 = vmatpush1.bf16.msra.mxu0 %v12944_v16  ;;  %7820 = vmatpush1.bf16.msra.mxu1 %v12947_v18  ;;  %v13025_v16 = vld [vmem:[#allocation2 + $0x1058] ss:$36 sps:$4 sm:$0xff]  }
 0x101   :  { %7493 = vmatprep.subr.bf16.mxu0 %v12952_v19  ;;  %7821 = vmatprep.subr.bf16.mxu1 %v12955_v20  ;;  %v13030_v18 = vld [vmem:[#allocation2 + $0x109c] ss:$36 sps:$4 sm:$0xff]   ;;  %v13033_v19 = vld [vmem:[#allocation2 + $0x10a4] ss:$36 sps:$4 sm:$0xff]  }
 0x102   :  { %v13028_v20 = vld [vmem:[#allocation2 + $0x1098] ss:$36 sps:$4 sm:$0xff]  }
 0x104   :  { %7494 = vmatpush1.bf16.msra.mxu0 %v12950_v21  ;;  %7822 = vmatpush1.bf16.msra.mxu1 %v12953_v23  ;;  %v13031_v21 = vld [vmem:[#allocation2 + $0x10a0] ss:$36 sps:$4 sm:$0xff]  }
 0x105   :  { %7495 = vmatprep.subr.bf16.mxu0 %v12958_v24  ;;  %7823 = vmatprep.subr.bf16.mxu1 %v12961_v27  ;;  %v13036_v23 = vld [vmem:[#allocation2 + $0x10e4] ss:$36 sps:$4 sm:$0xff]   ;;  %v13039_v24 = vld [vmem:[#allocation2 + $0x10ec] ss:$36 sps:$4 sm:$0xff]  }
 0x106   :  { %v13034_v27 = vld [vmem:[#allocation2 + $0x10e0] ss:$36 sps:$4 sm:$0xff]  }
 0x108   :  { %7496 = vmatpush1.bf16.msra.mxu0 %v12956_v29  ;;  %7824 = vmatpush1.bf16.msra.mxu1 %v12959_v30  ;;  %v13042_v29 = vld [vmem:[#allocation2 + $0x112c] ss:$36 sps:$4 sm:$0xff]   ;;  %v13045_v30 = vld [vmem:[#allocation2 + $0x1134] ss:$36 sps:$4 sm:$0xff]  }
 0x109   :  { %7506 = vmatprep.subr.bf16.mxu0 %v12964_v31  ;;  %7834 = vmatprep.subr.bf16.mxu1 %v12967_v32  ;;  %v13040_v31 = vld [vmem:[#allocation2 + $0x1128] ss:$36 sps:$4 sm:$0xff]   ;;  %v13043_v32 = vld [vmem:[#allocation2 + $0x1130] ss:$36 sps:$4 sm:$0xff]  }
 0x10b   :  { %7498 = vmatmul.mubr.bf16.vlgmr.msra.gmra.mrb[0].mxu0 %v14954_v25  ;;  %7826 = vmatmul.mubr.bf16.vlgmr.msra.gmra.mrb[0].mxu1 %v14954_v25 }
 0x10c   :  { %7507 = vmatpush1.bf16.msra.mxu0 %v12962_v34  ;;  %7835 = vmatpush1.bf16.msra.mxu1 %v12965_v35  ;;  %v13048_v34 = vld [vmem:[#allocation2 + $0x1174] ss:$36 sps:$4 sm:$0xff]   ;;  %v13051_v35 = vld [vmem:[#allocation2 + $0x117c] ss:$36 sps:$4 sm:$0xff]  }
 0x10d   :  { %7508 = vmatprep.subr.bf16.mxu0 %v12970_v36  ;;  %7836 = vmatprep.subr.bf16.mxu1 %v12973_v37  ;;  %v13046_v36 = vld [vmem:[#allocation2 + $0x1170] ss:$36 sps:$4 sm:$0xff]   ;;  %v13049_v37 = vld [vmem:[#allocation2 + $0x1178] ss:$36 sps:$4 sm:$0xff]  }
 0x10e   :  { %7538 = vmatprep.mubr.bf16.mxu0 %v14971_v22  ;;  %7866 = vmatprep.mubr.bf16.mxu1 %v14971_v22 }
 0x110   :  { %7509 = vmatpush1.bf16.msra.mxu0 %v12968_v38  ;;  %7837 = vmatpush1.bf16.msra.mxu1 %v12971_v39  ;;  %v13054_v38 = vld [vmem:[#allocation2 + $0x11bc] ss:$36 sps:$4 sm:$0xff]   ;;  %v13057_v39 = vld [vmem:[#allocation2 + $0x11c4] ss:$36 sps:$4 sm:$0xff]  }
 0x111   :  { %7510 = vmatprep.subr.bf16.mxu0 %v12976_v40  ;;  %7838 = vmatprep.subr.bf16.mxu1 %v12979_v41  ;;  %v13052_v40 = vld [vmem:[#allocation2 + $0x11b8] ss:$36 sps:$4 sm:$0xff]   ;;  %v14980_v41 = vld [vmem:[%s15162_s0 + $0x10] sm:$0xff] }
 0x114   :  { %7511 = vmatpush1.bf16.msra.mxu0 %v12974_v43  ;;  %7839 = vmatpush1.bf16.msra.mxu1 %v12977_v44  ;;  %v13055_v43 = vld [vmem:[#allocation2 + $0x11c0] ss:$36 sps:$4 sm:$0xff]  }
 0x115   :  { %7512 = vmatprep.subr.bf16.mxu0 %v12982_v45  ;;  %7840 = vmatprep.subr.bf16.mxu1 %v12985_v46  ;;  %v13061_v44 = vld [vmem:[#allocation2 + $0x1204] ss:$36 sps:$4 sm:$0xff]   ;;  %v13064_v45 = vld [vmem:[#allocation2 + $0x120c] ss:$36 sps:$4 sm:$0xff]   ;;  %v14984_v46 = vrot.slane %v14980_v41, %v14922_v49 }
 0x118   :  { %7513 = vmatpush1.bf16.msra.mxu0 %v12980_v47  ;;  %7841 = vmatpush1.bf16.msra.mxu1 %v12983_v48  ;;  %v13059_v47 = vld [vmem:[#allocation2 + $0x1200] ss:$36 sps:$4 sm:$0xff]   ;;  %v13062_v48 = vld [vmem:[#allocation2 + $0x1208] ss:$36 sps:$4 sm:$0xff]  }
 0x119   :  { %7514 = vmatprep.subr.bf16.mxu0 %v12988_v50  ;;  %7842 = vmatprep.subr.bf16.mxu1 %v12991_v51  ;;  %v13067_v50 = vld [vmem:[#allocation2 + $0x124c] ss:$36 sps:$4 sm:$0xff]   ;;  %v13070_v51 = vld [vmem:[#allocation2 + $0x1254] ss:$36 sps:$4 sm:$0xff]  }
 0x11c   :  { %7515 = vmatpush1.bf16.msra.mxu0 %v12986_v52  ;;  %7843 = vmatpush1.bf16.msra.mxu1 %v12989_v53  ;;  %v14988_v52 = vcombine.high %v14984_v46, %v14984_v46  ;;  %v13065_v53 = vld [vmem:[#allocation2 + $0x1248] ss:$36 sps:$4 sm:$0xff]  }
 0x11d   :  { %7516 = vmatprep.subr.bf16.mxu0 %v12994_v55  ;;  %7844 = vmatprep.subr.bf16.mxu1 %v12997_v56  ;;  %v13068_v55 = vld [vmem:[#allocation2 + $0x1250] ss:$36 sps:$4 sm:$0xff]  }
 0x11e   :  { %v13073_v56 = vld [vmem:[#allocation2 + $0x1294] ss:$36 sps:$4 sm:$0xff]  }
 0x120   :  { %7517 = vmatpush1.bf16.msra.mxu0 %v12992_v57  ;;  %7845 = vmatpush1.bf16.msra.mxu1 %v12995_v59  ;;  %v13076_v57 = vld [vmem:[#allocation2 + $0x129c] ss:$36 sps:$4 sm:$0xff]   ;;  %v13071_v59 = vld [vmem:[#allocation2 + $0x1290] ss:$36 sps:$4 sm:$0xff]  }
 0x121   :  { %7518 = vmatprep.subr.bf16.mxu0 %v13000_v60  ;;  %7846 = vmatprep.subr.bf16.mxu1 %v13003_v61  ;;  %v13074_v60 = vld [vmem:[#allocation2 + $0x1298] ss:$36 sps:$4 sm:$0xff]  }
 0x122   :  { %v13079_v61 = vld [vmem:[#allocation2 + $0x12dc] ss:$36 sps:$4 sm:$0xff]  }
 0x124   :  { %7519 = vmatpush1.bf16.msra.mxu0 %v12998_v62  ;;  %7847 = vmatpush1.bf16.msra.mxu1 %v13001_v63  ;;  %v13082_v62 = vld [vmem:[#allocation2 + $0x12e4] ss:$36 sps:$4 sm:$0xff]   ;;  %v13077_v63 = vld [vmem:[#allocation2 + $0x12d8] ss:$36 sps:$4 sm:$0xff]  }
 0x125   :  { %7520 = vmatprep.subr.bf16.mxu0 %v13006_v0  ;;  %7848 = vmatprep.subr.bf16.mxu1 %v13009_v1  ;;  %v13080_v0 = vld [vmem:[#allocation2 + $0x12e0] ss:$36 sps:$4 sm:$0xff]  }
 0x126   :  { %v13085_v1 = vld [vmem:[#allocation2 + $0x1324] ss:$36 sps:$4 sm:$0xff]  }
 0x128   :  { %7521 = vmatpush1.bf16.msra.mxu0 %v13004_v2  ;;  %7849 = vmatpush1.bf16.msra.mxu1 %v13007_v3  ;;  %v13088_v2 = vld [vmem:[#allocation2 + $0x132c] ss:$36 sps:$4 sm:$0xff]   ;;  %v13083_v3 = vld [vmem:[#allocation2 + $0x1320] ss:$36 sps:$4 sm:$0xff]  }
 0x129   :  { %7522 = vmatprep.subr.bf16.mxu0 %v13012_v4  ;;  %7850 = vmatprep.subr.bf16.mxu1 %v13015_v5  ;;  %v13086_v4 = vld [vmem:[#allocation2 + $0x1328] ss:$36 sps:$4 sm:$0xff]  }
 0x12a   :  { %v13091_v5 = vld [vmem:[#allocation2 + $0x136c] ss:$36 sps:$4 sm:$0xff]  }
 0x12c   :  { %7523 = vmatpush1.bf16.msra.mxu0 %v13010_v6  ;;  %7851 = vmatpush1.bf16.msra.mxu1 %v13013_v7  ;;  %v13094_v6 = vld [vmem:[#allocation2 + $0x1374] ss:$36 sps:$4 sm:$0xff]   ;;  %v13089_v7 = vld [vmem:[#allocation2 + $0x1368] ss:$36 sps:$4 sm:$0xff]  }
 0x12d   :  { %7524 = vmatprep.subr.bf16.mxu0 %v13018_v8  ;;  %7852 = vmatprep.subr.bf16.mxu1 %v13021_v9  ;;  %v13092_v8 = vld [vmem:[#allocation2 + $0x1370] ss:$36 sps:$4 sm:$0xff]  }
 0x12e   :  { %v13097_v9 = vld [vmem:[#allocation2 + $0x13b4] ss:$36 sps:$4 sm:$0xff]  }
 0x130   :  { %7525 = vmatpush1.bf16.msra.mxu0 %v13016_v10  ;;  %7853 = vmatpush1.bf16.msra.mxu1 %v13019_v11  ;;  %v13100_v10 = vld [vmem:[#allocation2 + $0x13bc] ss:$36 sps:$4 sm:$0xff]   ;;  %v13095_v11 = vld [vmem:[#allocation2 + $0x13b0] ss:$36 sps:$4 sm:$0xff]  }
 0x131   :  { %7526 = vmatprep.subr.bf16.mxu0 %v13024_v13  ;;  %7854 = vmatprep.subr.bf16.mxu1 %v13027_v14  ;;  %v13098_v13 = vld [vmem:[#allocation2 + $0x13b8] ss:$36 sps:$4 sm:$0xff]  }
 0x132   :  { %v13103_v14 = vld [vmem:[#allocation2 + $0x13fc] ss:$36 sps:$4 sm:$0xff]  }
 0x134   :  { %7527 = vmatpush1.bf16.msra.mxu0 %v13022_v15  ;;  %7855 = vmatpush1.bf16.msra.mxu1 %v13025_v16  ;;  %v13106_v15 = vld [vmem:[#allocation2 + $0x1404] ss:$36 sps:$4 sm:$0xff]   ;;  %v13101_v16 = vld [vmem:[#allocation2 + $0x13f8] ss:$36 sps:$4 sm:$0xff]  }
 0x135   :  { %7528 = vmatprep.subr.bf16.mxu0 %v13030_v18  ;;  %7856 = vmatprep.subr.bf16.mxu1 %v13033_v19  ;;  %v13104_v18 = vld [vmem:[#allocation2 + $0x1400] ss:$36 sps:$4 sm:$0xff]  }
 0x136   :  { %v13109_v19 = vld [vmem:[#allocation2 + $0x1444] ss:$36 sps:$4 sm:$0xff]  }
 0x138   :  { %7529 = vmatpush1.bf16.msra.mxu0 %v13028_v20  ;;  %7857 = vmatpush1.bf16.msra.mxu1 %v13031_v21  ;;  %v13112_v20 = vld [vmem:[#allocation2 + $0x144c] ss:$36 sps:$4 sm:$0xff]   ;;  %v13107_v21 = vld [vmem:[#allocation2 + $0x1440] ss:$36 sps:$4 sm:$0xff]  }
 0x139   :  { %7530 = vmatprep.subr.bf16.mxu0 %v13036_v23  ;;  %7858 = vmatprep.subr.bf16.mxu1 %v13039_v24  ;;  %v13110_v23 = vld [vmem:[#allocation2 + $0x1448] ss:$36 sps:$4 sm:$0xff]  }
 0x13a   :  { %v13115_v24 = vld [vmem:[#allocation2 + $0x148c] ss:$36 sps:$4 sm:$0xff]  }
 0x13c   :  { %7531 = vmatpush1.bf16.msra.mxu0 %v13034_v27  ;;  %7859 = vmatpush1.bf16.msra.mxu1 %v13037_v28  ;;  %v13118_v27 = vld [vmem:[#allocation2 + $0x1494] ss:$36 sps:$4 sm:$0xff]   ;;  %v13113_v28 = vld [vmem:[#allocation2 + $0x1488] ss:$36 sps:$4 sm:$0xff]  }
 0x13d   :  { %7532 = vmatprep.subr.bf16.mxu0 %v13042_v29  ;;  %7860 = vmatprep.subr.bf16.mxu1 %v13045_v30  ;;  %v13116_v29 = vld [vmem:[#allocation2 + $0x1490] ss:$36 sps:$4 sm:$0xff]  }
 0x13e   :  { %v13121_v30 = vld [vmem:[#allocation2 + $0x14d4] ss:$36 sps:$4 sm:$0xff]  }
 0x140   :  { %7533 = vmatpush1.bf16.msra.mxu0 %v13040_v31  ;;  %7861 = vmatpush1.bf16.msra.mxu1 %v13043_v32  ;;  %v13124_v31 = vld [vmem:[#allocation2 + $0x14dc] ss:$36 sps:$4 sm:$0xff]   ;;  %v13119_v32 = vld [vmem:[#allocation2 + $0x14d0] ss:$36 sps:$4 sm:$0xff]  }
 0x141   :  { %7534 = vmatprep.subr.bf16.mxu0 %v13048_v34  ;;  %7862 = vmatprep.subr.bf16.mxu1 %v13051_v35  ;;  %v13122_v34 = vld [vmem:[#allocation2 + $0x14d8] ss:$36 sps:$4 sm:$0xff]  }
 0x142   :  { %v13127_v35 = vld [vmem:[#allocation2 + $0x151c] ss:$36 sps:$4 sm:$0xff]  }
 0x144   :  { %7535 = vmatpush1.bf16.msra.mxu0 %v13046_v36  ;;  %7863 = vmatpush1.bf16.msra.mxu1 %v13049_v37  ;;  %v13130_v36 = vld [vmem:[#allocation2 + $0x1524] ss:$36 sps:$4 sm:$0xff]   ;;  %v13125_v37 = vld [vmem:[#allocation2 + $0x1518] ss:$36 sps:$4 sm:$0xff]  }
 0x145   :  { %7536 = vmatprep.subr.bf16.mxu0 %v13054_v38  ;;  %7864 = vmatprep.subr.bf16.mxu1 %v13057_v39  ;;  %v13128_v38 = vld [vmem:[#allocation2 + $0x1520] ss:$36 sps:$4 sm:$0xff]  }
 0x146   :  { %v13133_v39 = vld [vmem:[#allocation2 + $0x1564] ss:$36 sps:$4 sm:$0xff]  }
 0x148   :  { %7537 = vmatpush1.bf16.msra.mxu0 %v13052_v40  ;;  %7865 = vmatpush1.bf16.msra.mxu1 %v13055_v43  ;;  %v13136_v40 = vld [vmem:[#allocation2 + $0x156c] ss:$36 sps:$4 sm:$0xff]   ;;  %v13131_v43 = vld [vmem:[#allocation2 + $0x1560] ss:$36 sps:$4 sm:$0xff]  }
 0x149   :  { %7547 = vmatprep.subr.bf16.mxu0 %v13061_v44  ;;  %7875 = vmatprep.subr.bf16.mxu1 %v13064_v45  ;;  %v13134_v44 = vld [vmem:[#allocation2 + $0x1568] ss:$36 sps:$4 sm:$0xff]  }
 0x14a   :  { %v13139_v45 = vld [vmem:[#allocation2 + $0x15ac] ss:$36 sps:$4 sm:$0xff]  }
 0x14b   :  { %7539 = vmatmul.mubr.bf16.vlgmr.msra.gmra.mrb[0].mxu0 %v14967_v33  ;;  %7867 = vmatmul.mubr.bf16.vlgmr.msra.gmra.mrb[0].mxu1 %v14967_v33 }
 0x14c   :  { %7548 = vmatpush1.bf16.msra.mxu0 %v13059_v47  ;;  %7876 = vmatpush1.bf16.msra.mxu1 %v13062_v48  ;;  %v13142_v47 = vld [vmem:[#allocation2 + $0x15b4] ss:$36 sps:$4 sm:$0xff]   ;;  %v13137_v48 = vld [vmem:[#allocation2 + $0x15a8] ss:$36 sps:$4 sm:$0xff]  }
 0x14d   :  { %7549 = vmatprep.subr.bf16.mxu0 %v13067_v50  ;;  %7877 = vmatprep.subr.bf16.mxu1 %v13070_v51  ;;  %v13140_v50 = vld [vmem:[#allocation2 + $0x15b0] ss:$36 sps:$4 sm:$0xff]  }
 0x14e   :  { %7579 = vmatprep.mubr.bf16.mxu0 %v14988_v52  ;;  %7907 = vmatprep.mubr.bf16.mxu1 %v14988_v52  ;;  %v13145_v51 = vld [vmem:[#allocation2 + $0x15f4] ss:$36 sps:$4 sm:$0xff]  }
 0x150   :  { %7550 = vmatpush1.bf16.msra.mxu0 %v13065_v53  ;;  %7878 = vmatpush1.bf16.msra.mxu1 %v13068_v55  ;;  %v13148_v53 = vld [vmem:[#allocation2 + $0x15fc] ss:$36 sps:$4 sm:$0xff]   ;;  %v13143_v55 = vld [vmem:[#allocation2 + $0x15f0] ss:$36 sps:$4 sm:$0xff]  }
 0x151   :  { %7551 = vmatprep.subr.bf16.mxu0 %v13073_v56  ;;  %7879 = vmatprep.subr.bf16.mxu1 %v13076_v57  ;;  %v13146_v56 = vld [vmem:[#allocation2 + $0x15f8] ss:$36 sps:$4 sm:$0xff]  }
 0x152   :  { %v13151_v57 = vld [vmem:[#allocation2 + $0x163c] ss:$36 sps:$4 sm:$0xff]  }
 0x154   :  { %7552 = vmatpush1.bf16.msra.mxu0 %v13071_v59  ;;  %7880 = vmatpush1.bf16.msra.mxu1 %v13074_v60  ;;  %v13154_v59 = vld [vmem:[#allocation2 + $0x1644] ss:$36 sps:$4 sm:$0xff]   ;;  %v1445_v60 = vcombine.high %v14980_v41, %v14980_v41 }
 0x155   :  { %7553 = vmatprep.subr.bf16.mxu0 %v13079_v61  ;;  %7881 = vmatprep.subr.bf16.mxu1 %v13082_v62  ;;  %v13149_v61 = vld [vmem:[#allocation2 + $0x1638] ss:$36 sps:$4 sm:$0xff]   ;;  %v13152_v62 = vld [vmem:[#allocation2 + $0x1640] ss:$36 sps:$4 sm:$0xff]  }
 0x158   :  { %7554 = vmatpush1.bf16.msra.mxu0 %v13077_v63  ;;  %7882 = vmatpush1.bf16.msra.mxu1 %v13080_v0  ;;  %v13157_v63 = vld [vmem:[#allocation2 + $0x1684] ss:$36 sps:$4 sm:$0xff]   ;;  %v13160_v0 = vld [vmem:[#allocation2 + $0x168c] ss:$36 sps:$4 sm:$0xff]  }
 0x159   :  { %7555 = vmatprep.subr.bf16.mxu0 %v13085_v1  ;;  %7883 = vmatprep.subr.bf16.mxu1 %v13088_v2  ;;  %v14997_v1 = vrot.slane %v1445_v60, %v14922_v49  ;;  %v13155_v2 = vld [vmem:[#allocation2 + $0x1680] ss:$36 sps:$4 sm:$0xff]  }
 0x15a   :  { %v13224_v60 = vld [vmem:[#allocation2 + $0x19a0] ss:$36 sps:$4 sm:$0xff]  }
 0x15b   :  { %v15001_v41 = vcombine.high %v14997_v1, %v14997_v1 }
 0x15c   :  { %7556 = vmatpush1.bf16.msra.mxu0 %v13083_v3  ;;  %7884 = vmatpush1.bf16.msra.mxu1 %v13086_v4  ;;  %v13158_v3 = vld [vmem:[#allocation2 + $0x1688] ss:$36 sps:$4 sm:$0xff]  }
 0x15d   :  { %7557 = vmatprep.subr.bf16.mxu0 %v13091_v5  ;;  %7885 = vmatprep.subr.bf16.mxu1 %v13094_v6  ;;  %v13163_v4 = vld [vmem:[#allocation2 + $0x16cc] ss:$36 sps:$4 sm:$0xff]   ;;  %v13166_v5 = vld [vmem:[#allocation2 + $0x16d4] ss:$36 sps:$4 sm:$0xff]  }
 0x15e   :  { %v13161_v6 = vld [vmem:[#allocation2 + $0x16c8] ss:$36 sps:$4 sm:$0xff]  }
 0x160   :  { %7558 = vmatpush1.bf16.msra.mxu0 %v13089_v7  ;;  %7886 = vmatpush1.bf16.msra.mxu1 %v13092_v8  ;;  %v13164_v7 = vld [vmem:[#allocation2 + $0x16d0] ss:$36 sps:$4 sm:$0xff]  }
 0x161   :  { %7559 = vmatprep.subr.bf16.mxu0 %v13097_v9  ;;  %7887 = vmatprep.subr.bf16.mxu1 %v13100_v10  ;;  %v13169_v8 = vld [vmem:[#allocation2 + $0x1714] ss:$36 sps:$4 sm:$0xff]   ;;  %v13172_v9 = vld [vmem:[#allocation2 + $0x171c] ss:$36 sps:$4 sm:$0xff]  }
 0x162   :  { %v13167_v10 = vld [vmem:[#allocation2 + $0x1710] ss:$36 sps:$4 sm:$0xff]  }
 0x164   :  { %7560 = vmatpush1.bf16.msra.mxu0 %v13095_v11  ;;  %7888 = vmatpush1.bf16.msra.mxu1 %v13098_v13  ;;  %v13170_v11 = vld [vmem:[#allocation2 + $0x1718] ss:$36 sps:$4 sm:$0xff]  }
 0x165   :  { %7561 = vmatprep.subr.bf16.mxu0 %v13103_v14  ;;  %7889 = vmatprep.subr.bf16.mxu1 %v13106_v15  ;;  %v13175_v13 = vld [vmem:[#allocation2 + $0x175c] ss:$36 sps:$4 sm:$0xff]   ;;  %v13178_v14 = vld [vmem:[#allocation2 + $0x1764] ss:$36 sps:$4 sm:$0xff]  }
 0x166   :  { %v13173_v15 = vld [vmem:[#allocation2 + $0x1758] ss:$36 sps:$4 sm:$0xff]  }
 0x168   :  { %7562 = vmatpush1.bf16.msra.mxu0 %v13101_v16  ;;  %7890 = vmatpush1.bf16.msra.mxu1 %v13104_v18  ;;  %v13176_v16 = vld [vmem:[#allocation2 + $0x1760] ss:$36 sps:$4 sm:$0xff]  }
 0x169   :  { %7563 = vmatprep.subr.bf16.mxu0 %v13109_v19  ;;  %7891 = vmatprep.subr.bf16.mxu1 %v13112_v20  ;;  %v13181_v18 = vld [vmem:[#allocation2 + $0x17a4] ss:$36 sps:$4 sm:$0xff]   ;;  %v13184_v19 = vld [vmem:[#allocation2 + $0x17ac] ss:$36 sps:$4 sm:$0xff]  }
 0x16a   :  { %v13179_v20 = vld [vmem:[#allocation2 + $0x17a0] ss:$36 sps:$4 sm:$0xff]  }
 0x16c   :  { %7564 = vmatpush1.bf16.msra.mxu0 %v13107_v21  ;;  %7892 = vmatpush1.bf16.msra.mxu1 %v13110_v23  ;;  %v13182_v21 = vld [vmem:[#allocation2 + $0x17a8] ss:$36 sps:$4 sm:$0xff]  }
 0x16d   :  { %7565 = vmatprep.subr.bf16.mxu0 %v13115_v24  ;;  %7893 = vmatprep.subr.bf16.mxu1 %v13118_v27  ;;  %v13187_v23 = vld [vmem:[#allocation2 + $0x17ec] ss:$36 sps:$4 sm:$0xff]   ;;  %v13190_v24 = vld [vmem:[#allocation2 + $0x17f4] ss:$36 sps:$4 sm:$0xff]  }
 0x16e   :  { %v13185_v27 = vld [vmem:[#allocation2 + $0x17e8] ss:$36 sps:$4 sm:$0xff]  }
 0x170   :  { %7566 = vmatpush1.bf16.msra.mxu0 %v13113_v28  ;;  %7894 = vmatpush1.bf16.msra.mxu1 %v13116_v29  ;;  %v13188_v28 = vld [vmem:[#allocation2 + $0x17f0] ss:$36 sps:$4 sm:$0xff]  }
 0x171   :  { %7567 = vmatprep.subr.bf16.mxu0 %v13121_v30  ;;  %7895 = vmatprep.subr.bf16.mxu1 %v13124_v31  ;;  %v13193_v29 = vld [vmem:[#allocation2 + $0x1834] ss:$36 sps:$4 sm:$0xff]   ;;  %v13196_v30 = vld [vmem:[#allocation2 + $0x183c] ss:$36 sps:$4 sm:$0xff]  }
 0x172   :  { %v13191_v31 = vld [vmem:[#allocation2 + $0x1830] ss:$36 sps:$4 sm:$0xff]  }
 0x174   :  { %7568 = vmatpush1.bf16.msra.mxu0 %v13119_v32  ;;  %7896 = vmatpush1.bf16.msra.mxu1 %v13122_v34  ;;  %v13194_v32 = vld [vmem:[#allocation2 + $0x1838] ss:$36 sps:$4 sm:$0xff]  }
 0x175   :  { %7569 = vmatprep.subr.bf16.mxu0 %v13127_v35  ;;  %7897 = vmatprep.subr.bf16.mxu1 %v13130_v36  ;;  %v13199_v34 = vld [vmem:[#allocation2 + $0x187c] ss:$36 sps:$4 sm:$0xff]   ;;  %v13202_v35 = vld [vmem:[#allocation2 + $0x1884] ss:$36 sps:$4 sm:$0xff]  }
 0x176   :  { %v13197_v36 = vld [vmem:[#allocation2 + $0x1878] ss:$36 sps:$4 sm:$0xff]  }
 0x178   :  { %7570 = vmatpush1.bf16.msra.mxu0 %v13125_v37  ;;  %7898 = vmatpush1.bf16.msra.mxu1 %v13128_v38  ;;  %v13200_v37 = vld [vmem:[#allocation2 + $0x1880] ss:$36 sps:$4 sm:$0xff]  }
 0x179   :  { %7571 = vmatprep.subr.bf16.mxu0 %v13133_v39  ;;  %7899 = vmatprep.subr.bf16.mxu1 %v13136_v40  ;;  %v13205_v38 = vld [vmem:[#allocation2 + $0x18c4] ss:$36 sps:$4 sm:$0xff]   ;;  %v13208_v39 = vld [vmem:[#allocation2 + $0x18cc] ss:$36 sps:$4 sm:$0xff]  }
 0x17a   :  { %v13203_v40 = vld [vmem:[#allocation2 + $0x18c0] ss:$36 sps:$4 sm:$0xff]  }
 0x17c   :  { %7572 = vmatpush1.bf16.msra.mxu0 %v13131_v43  ;;  %7900 = vmatpush1.bf16.msra.mxu1 %v13134_v44  ;;  %v13206_v43 = vld [vmem:[#allocation2 + $0x18c8] ss:$36 sps:$4 sm:$0xff]  }
 0x17d   :  { %7573 = vmatprep.subr.bf16.mxu0 %v13139_v45  ;;  %7901 = vmatprep.subr.bf16.mxu1 %v13142_v47  ;;  %v13211_v44 = vld [vmem:[#allocation2 + $0x190c] ss:$36 sps:$4 sm:$0xff]   ;;  %v13214_v45 = vld [vmem:[#allocation2 + $0x1914] ss:$36 sps:$4 sm:$0xff]  }
 0x17e   :  { %v13209_v47 = vld [vmem:[#allocation2 + $0x1908] ss:$36 sps:$4 sm:$0xff]  }
 0x180   :  { %7574 = vmatpush1.bf16.msra.mxu0 %v13137_v48  ;;  %7902 = vmatpush1.bf16.msra.mxu1 %v13140_v50  ;;  %v13212_v48 = vld [vmem:[#allocation2 + $0x1910] ss:$36 sps:$4 sm:$0xff]  }
 0x181   :  { %7575 = vmatprep.subr.bf16.mxu0 %v13145_v51  ;;  %7903 = vmatprep.subr.bf16.mxu1 %v13148_v53  ;;  %v13217_v50 = vld [vmem:[#allocation2 + $0x1954] ss:$36 sps:$4 sm:$0xff]   ;;  %v13220_v51 = vld [vmem:[#allocation2 + $0x195c] ss:$36 sps:$4 sm:$0xff]  }
 0x182   :  { %v13215_v53 = vld [vmem:[#allocation2 + $0x1950] ss:$36 sps:$4 sm:$0xff]  }
 0x184   :  { %7576 = vmatpush1.bf16.msra.mxu0 %v13143_v55  ;;  %7904 = vmatpush1.bf16.msra.mxu1 %v13146_v56  ;;  %v13218_v55 = vld [vmem:[#allocation2 + $0x1958] ss:$36 sps:$4 sm:$0xff]  }
 0x185   :  { %7577 = vmatprep.subr.bf16.mxu0 %v13151_v57  ;;  %7905 = vmatprep.subr.bf16.mxu1 %v13154_v59  ;;  %v13223_v56 = vld [vmem:[#allocation2 + $0x199c] ss:$36 sps:$4 sm:$0xff]   ;;  %v13226_v57 = vld [vmem:[#allocation2 + $0x19a4] ss:$36 sps:$4 sm:$0xff]  }
 0x186   :  { %v13221_v59 = vld [vmem:[#allocation2 + $0x1998] ss:$36 sps:$4 sm:$0xff]  }
 0x188   :  { %7578 = vmatpush1.bf16.msra.mxu0 %v13149_v61  ;;  %7906 = vmatpush1.bf16.msra.mxu1 %v13152_v62  ;;  %v13229_v61 = vld [vmem:[#allocation2 + $0x19e4] ss:$36 sps:$4 sm:$0xff]   ;;  %v13232_v62 = vld [vmem:[#allocation2 + $0x19ec] ss:$36 sps:$4 sm:$0xff]  }
 0x189   :  { %7588 = vmatprep.subr.bf16.mxu0 %v13157_v63  ;;  %7916 = vmatprep.subr.bf16.mxu1 %v13160_v0  ;;  %v13227_v63 = vld [vmem:[#allocation2 + $0x19e0] ss:$36 sps:$4 sm:$0xff]   ;;  %v13230_v0 = vld [vmem:[#allocation2 + $0x19e8] ss:$36 sps:$4 sm:$0xff]  }
 0x18b   :  { %7580 = vmatmul.mubr.bf16.vlgmr.msra.gmra.mrb[0].mxu0 %v14984_v46  ;;  %7908 = vmatmul.mubr.bf16.vlgmr.msra.gmra.mrb[0].mxu1 %v14984_v46 }
 0x18c   :  { %7589 = vmatpush1.bf16.msra.mxu0 %v13155_v2  ;;  %7917 = vmatpush1.bf16.msra.mxu1 %v13158_v3  ;;  %v13235_v2 = vld [vmem:[#allocation2 + $0x1a2c] ss:$36 sps:$4 sm:$0xff]   ;;  %v13238_v3 = vld [vmem:[#allocation2 + $0x1a34] ss:$36 sps:$4 sm:$0xff]  }
 0x18d   :  { %7590 = vmatprep.subr.bf16.mxu0 %v13163_v4  ;;  %7918 = vmatprep.subr.bf16.mxu1 %v13166_v5  ;;  %v13233_v4 = vld [vmem:[#allocation2 + $0x1a28] ss:$36 sps:$4 sm:$0xff]   ;;  %v13236_v5 = vld [vmem:[#allocation2 + $0x1a30] ss:$36 sps:$4 sm:$0xff]  }
 0x18e   :  { %7620 = vmatprep.mubr.bf16.mxu0 %v15001_v41  ;;  %7948 = vmatprep.mubr.bf16.mxu1 %v15001_v41 }
 0x190   :  { %7591 = vmatpush1.bf16.msra.mxu0 %v13161_v6  ;;  %7919 = vmatpush1.bf16.msra.mxu1 %v13164_v7  ;;  %v13241_v6 = vld [vmem:[#allocation2 + $0x1a74] ss:$36 sps:$4 sm:$0xff]   ;;  %v13244_v7 = vld [vmem:[#allocation2 + $0x1a7c] ss:$36 sps:$4 sm:$0xff]  }
 0x191   :  { %7592 = vmatprep.subr.bf16.mxu0 %v13169_v8  ;;  %7920 = vmatprep.subr.bf16.mxu1 %v13172_v9  ;;  %v13239_v8 = vld [vmem:[#allocation2 + $0x1a70] ss:$36 sps:$4 sm:$0xff]   ;;  %v13242_v9 = vld [vmem:[#allocation2 + $0x1a78] ss:$36 sps:$4 sm:$0xff]  }
 0x194   :  { %7593 = vmatpush1.bf16.msra.mxu0 %v13167_v10  ;;  %7921 = vmatpush1.bf16.msra.mxu1 %v13170_v11  ;;  %v13247_v10 = vld [vmem:[#allocation2 + $0x1abc] ss:$36 sps:$4 sm:$0xff]   ;;  %v13250_v11 = vld [vmem:[#allocation2 + $0x1ac4] ss:$36 sps:$4 sm:$0xff]  }
 0x195   :  { %7594 = vmatprep.subr.bf16.mxu0 %v13175_v13  ;;  %7922 = vmatprep.subr.bf16.mxu1 %v13178_v14  ;;  %v15010_v13 = vld [vmem:[%s15162_s0 + $0x18] sm:$0xff] }
 0x196   :  { %v13245_v14 = vld [vmem:[#allocation2 + $0x1ab8] ss:$36 sps:$4 sm:$0xff]  }
 0x198   :  { %7595 = vmatpush1.bf16.msra.mxu0 %v13173_v15  ;;  %7923 = vmatpush1.bf16.msra.mxu1 %v13176_v16  ;;  %v13248_v15 = vld [vmem:[#allocation2 + $0x1ac0] ss:$36 sps:$4 sm:$0xff]  }
 0x199   :  { %7596 = vmatprep.subr.bf16.mxu0 %v13181_v18  ;;  %7924 = vmatprep.subr.bf16.mxu1 %v13184_v19  ;;  %v13254_v16 = vld [vmem:[#allocation2 + $0x1b04] ss:$36 sps:$4 sm:$0xff]   ;;  %v13257_v18 = vld [vmem:[#allocation2 + $0x1b0c] ss:$36 sps:$4 sm:$0xff]  }
 0x19a   :  { %v13252_v19 = vld [vmem:[#allocation2 + $0x1b00] ss:$36 sps:$4 sm:$0xff]  }
 0x19c   :  { %7597 = vmatpush1.bf16.msra.mxu0 %v13179_v20  ;;  %7925 = vmatpush1.bf16.msra.mxu1 %v13182_v21  ;;  %v13255_v20 = vld [vmem:[#allocation2 + $0x1b08] ss:$36 sps:$4 sm:$0xff]   ;;  %v15014_v21 = vrot.slane %v15010_v13, %v14922_v49 }
 0x19d   :  { %7598 = vmatprep.subr.bf16.mxu0 %v13187_v23  ;;  %7926 = vmatprep.subr.bf16.mxu1 %v13190_v24  ;;  %v13260_v23 = vld [vmem:[#allocation2 + $0x1b4c] ss:$36 sps:$4 sm:$0xff]   ;;  %v13263_v24 = vld [vmem:[#allocation2 + $0x1b54] ss:$36 sps:$4 sm:$0xff]  }
 0x1a0   :  { %7599 = vmatpush1.bf16.msra.mxu0 %v13185_v27  ;;  %7927 = vmatpush1.bf16.msra.mxu1 %v13188_v28  ;;  %v15018_v27 = vcombine.high %v15014_v21, %v15014_v21  ;;  %v13258_v28 = vld [vmem:[#allocation2 + $0x1b48] ss:$36 sps:$4 sm:$0xff]  }
 0x1a1   :  { %7600 = vmatprep.subr.bf16.mxu0 %v13193_v29  ;;  %7928 = vmatprep.subr.bf16.mxu1 %v13196_v30  ;;  %v13261_v29 = vld [vmem:[#allocation2 + $0x1b50] ss:$36 sps:$4 sm:$0xff]  }
 0x1a2   :  { %v13266_v30 = vld [vmem:[#allocation2 + $0x1b94] ss:$36 sps:$4 sm:$0xff]  }
 0x1a4   :  { %7601 = vmatpush1.bf16.msra.mxu0 %v13191_v31  ;;  %7929 = vmatpush1.bf16.msra.mxu1 %v13194_v32  ;;  %v13269_v31 = vld [vmem:[#allocation2 + $0x1b9c] ss:$36 sps:$4 sm:$0xff]   ;;  %v13264_v32 = vld [vmem:[#allocation2 + $0x1b90] ss:$36 sps:$4 sm:$0xff]  }
 0x1a5   :  { %7602 = vmatprep.subr.bf16.mxu0 %v13199_v34  ;;  %7930 = vmatprep.subr.bf16.mxu1 %v13202_v35  ;;  %v13267_v34 = vld [vmem:[#allocation2 + $0x1b98] ss:$36 sps:$4 sm:$0xff]  }
 0x1a6   :  { %v13272_v35 = vld [vmem:[#allocation2 + $0x1bdc] ss:$36 sps:$4 sm:$0xff]  }
 0x1a8   :  { %7603 = vmatpush1.bf16.msra.mxu0 %v13197_v36  ;;  %7931 = vmatpush1.bf16.msra.mxu1 %v13200_v37  ;;  %v13275_v36 = vld [vmem:[#allocation2 + $0x1be4] ss:$36 sps:$4 sm:$0xff]   ;;  %v13270_v37 = vld [vmem:[#allocation2 + $0x1bd8] ss:$36 sps:$4 sm:$0xff]  }
 0x1a9   :  { %7604 = vmatprep.subr.bf16.mxu0 %v13205_v38  ;;  %7932 = vmatprep.subr.bf16.mxu1 %v13208_v39  ;;  %v13273_v38 = vld [vmem:[#allocation2 + $0x1be0] ss:$36 sps:$4 sm:$0xff]  }
 0x1aa   :  { %v13278_v39 = vld [vmem:[#allocation2 + $0x1c24] ss:$36 sps:$4 sm:$0xff]  }
 0x1ac   :  { %7605 = vmatpush1.bf16.msra.mxu0 %v13203_v40  ;;  %7933 = vmatpush1.bf16.msra.mxu1 %v13206_v43  ;;  %v13281_v40 = vld [vmem:[#allocation2 + $0x1c2c] ss:$36 sps:$4 sm:$0xff]   ;;  %v13276_v43 = vld [vmem:[#allocation2 + $0x1c20] ss:$36 sps:$4 sm:$0xff]  }
 0x1ad   :  { %7606 = vmatprep.subr.bf16.mxu0 %v13211_v44  ;;  %7934 = vmatprep.subr.bf16.mxu1 %v13214_v45  ;;  %v13279_v44 = vld [vmem:[#allocation2 + $0x1c28] ss:$36 sps:$4 sm:$0xff]  }
 0x1ae   :  { %v13284_v45 = vld [vmem:[#allocation2 + $0x1c6c] ss:$36 sps:$4 sm:$0xff]  }
 0x1b0   :  { %7607 = vmatpush1.bf16.msra.mxu0 %v13209_v47  ;;  %7935 = vmatpush1.bf16.msra.mxu1 %v13212_v48  ;;  %v13287_v47 = vld [vmem:[#allocation2 + $0x1c74] ss:$36 sps:$4 sm:$0xff]   ;;  %v13282_v48 = vld [vmem:[#allocation2 + $0x1c68] ss:$36 sps:$4 sm:$0xff]  }
 0x1b1   :  { %7608 = vmatprep.subr.bf16.mxu0 %v13217_v50  ;;  %7936 = vmatprep.subr.bf16.mxu1 %v13220_v51  ;;  %v13285_v50 = vld [vmem:[#allocation2 + $0x1c70] ss:$36 sps:$4 sm:$0xff]  }
 0x1b2   :  { %v13290_v51 = vld [vmem:[#allocation2 + $0x1cb4] ss:$36 sps:$4 sm:$0xff]  }
 0x1b4   :  { %7609 = vmatpush1.bf16.msra.mxu0 %v13215_v53  ;;  %7937 = vmatpush1.bf16.msra.mxu1 %v13218_v55  ;;  %v13293_v53 = vld [vmem:[#allocation2 + $0x1cbc] ss:$36 sps:$4 sm:$0xff]   ;;  %v13288_v55 = vld [vmem:[#allocation2 + $0x1cb0] ss:$36 sps:$4 sm:$0xff]  }
 0x1b5   :  { %7610 = vmatprep.subr.bf16.mxu0 %v13223_v56  ;;  %7938 = vmatprep.subr.bf16.mxu1 %v13226_v57  ;;  %v13291_v56 = vld [vmem:[#allocation2 + $0x1cb8] ss:$36 sps:$4 sm:$0xff]  }
 0x1b6   :  { %v13296_v57 = vld [vmem:[#allocation2 + $0x1cfc] ss:$36 sps:$4 sm:$0xff]  }
 0x1b8   :  { %7611 = vmatpush1.bf16.msra.mxu0 %v13221_v59  ;;  %7939 = vmatpush1.bf16.msra.mxu1 %v13224_v60  ;;  %v13299_v59 = vld [vmem:[#allocation2 + $0x1d04] ss:$36 sps:$4 sm:$0xff]   ;;  %v13294_v60 = vld [vmem:[#allocation2 + $0x1cf8] ss:$36 sps:$4 sm:$0xff]  }
 0x1b9   :  { %7612 = vmatprep.subr.bf16.mxu0 %v13229_v61  ;;  %7940 = vmatprep.subr.bf16.mxu1 %v13232_v62  ;;  %v13297_v61 = vld [vmem:[#allocation2 + $0x1d00] ss:$36 sps:$4 sm:$0xff]  }
 0x1ba   :  { %v13302_v62 = vld [vmem:[#allocation2 + $0x1d44] ss:$36 sps:$4 sm:$0xff]  }
 0x1bc   :  { %7613 = vmatpush1.bf16.msra.mxu0 %v13227_v63  ;;  %7941 = vmatpush1.bf16.msra.mxu1 %v13230_v0  ;;  %v13305_v63 = vld [vmem:[#allocation2 + $0x1d4c] ss:$36 sps:$4 sm:$0xff]   ;;  %v13300_v0 = vld [vmem:[#allocation2 + $0x1d40] ss:$36 sps:$4 sm:$0xff]  }
 0x1bd   :  { %7614 = vmatprep.subr.bf16.mxu0 %v13235_v2  ;;  %7942 = vmatprep.subr.bf16.mxu1 %v13238_v3  ;;  %v13303_v2 = vld [vmem:[#allocation2 + $0x1d48] ss:$36 sps:$4 sm:$0xff]  }
 0x1be   :  { %v13308_v3 = vld [vmem:[#allocation2 + $0x1d8c] ss:$36 sps:$4 sm:$0xff]  }
 0x1c0   :  { %7615 = vmatpush1.bf16.msra.mxu0 %v13233_v4  ;;  %7943 = vmatpush1.bf16.msra.mxu1 %v13236_v5  ;;  %v13311_v4 = vld [vmem:[#allocation2 + $0x1d94] ss:$36 sps:$4 sm:$0xff]   ;;  %v13306_v5 = vld [vmem:[#allocation2 + $0x1d88] ss:$36 sps:$4 sm:$0xff]  }
 0x1c1   :  { %7616 = vmatprep.subr.bf16.mxu0 %v13241_v6  ;;  %7944 = vmatprep.subr.bf16.mxu1 %v13244_v7  ;;  %v13309_v6 = vld [vmem:[#allocation2 + $0x1d90] ss:$36 sps:$4 sm:$0xff]  }
 0x1c2   :  { %v13314_v7 = vld [vmem:[#allocation2 + $0x1dd4] ss:$36 sps:$4 sm:$0xff]  }
 0x1c4   :  { %7617 = vmatpush1.bf16.msra.mxu0 %v13239_v8  ;;  %7945 = vmatpush1.bf16.msra.mxu1 %v13242_v9  ;;  %v13317_v8 = vld [vmem:[#allocation2 + $0x1ddc] ss:$36 sps:$4 sm:$0xff]   ;;  %v13312_v9 = vld [vmem:[#allocation2 + $0x1dd0] ss:$36 sps:$4 sm:$0xff]  }
 0x1c5   :  { %7618 = vmatprep.subr.bf16.mxu0 %v13247_v10  ;;  %7946 = vmatprep.subr.bf16.mxu1 %v13250_v11  ;;  %v13315_v10 = vld [vmem:[#allocation2 + $0x1dd8] ss:$36 sps:$4 sm:$0xff]  }
 0x1c6   :  { %v13320_v11 = vld [vmem:[#allocation2 + $0x1e1c] ss:$36 sps:$4 sm:$0xff]  }
 0x1c8   :  { %7619 = vmatpush1.bf16.msra.mxu0 %v13245_v14  ;;  %7947 = vmatpush1.bf16.msra.mxu1 %v13248_v15  ;;  %v13323_v14 = vld [vmem:[#allocation2 + $0x1e24] ss:$36 sps:$4 sm:$0xff]   ;;  %v13318_v15 = vld [vmem:[#allocation2 + $0x1e18] ss:$36 sps:$4 sm:$0xff]  }
 0x1c9   :  { %7629 = vmatprep.subr.bf16.mxu0 %v13254_v16  ;;  %7957 = vmatprep.subr.bf16.mxu1 %v13257_v18  ;;  %v13321_v16 = vld [vmem:[#allocation2 + $0x1e20] ss:$36 sps:$4 sm:$0xff]  }
 0x1ca   :  { %v13326_v18 = vld [vmem:[#allocation2 + $0x1e64] ss:$36 sps:$4 sm:$0xff]  }
 0x1cb   :  { %7621 = vmatmul.mubr.bf16.vlgmr.msra.gmra.mrb[0].mxu0 %v14997_v1  ;;  %7949 = vmatmul.mubr.bf16.vlgmr.msra.gmra.mrb[0].mxu1 %v14997_v1 }
 0x1cc   :  { %7630 = vmatpush1.bf16.msra.mxu0 %v13252_v19  ;;  %7958 = vmatpush1.bf16.msra.mxu1 %v13255_v20  ;;  %v13329_v19 = vld [vmem:[#allocation2 + $0x1e6c] ss:$36 sps:$4 sm:$0xff]   ;;  %v13324_v20 = vld [vmem:[#allocation2 + $0x1e60] ss:$36 sps:$4 sm:$0xff]  }
 0x1cd   :  { %7631 = vmatprep.subr.bf16.mxu0 %v13260_v23  ;;  %7959 = vmatprep.subr.bf16.mxu1 %v13263_v24  ;;  %v13327_v23 = vld [vmem:[#allocation2 + $0x1e68] ss:$36 sps:$4 sm:$0xff]  }
 0x1ce   :  { %7661 = vmatprep.mubr.bf16.mxu0 %v15018_v27  ;;  %7989 = vmatprep.mubr.bf16.mxu1 %v15018_v27  ;;  %v13332_v24 = vld [vmem:[#allocation2 + $0x1eac] ss:$36 sps:$4 sm:$0xff]  }
 0x1d0   :  { %7632 = vmatpush1.bf16.msra.mxu0 %v13258_v28  ;;  %7960 = vmatpush1.bf16.msra.mxu1 %v13261_v29  ;;  %v13335_v28 = vld [vmem:[#allocation2 + $0x1eb4] ss:$36 sps:$4 sm:$0xff]   ;;  %v13330_v29 = vld [vmem:[#allocation2 + $0x1ea8] ss:$36 sps:$4 sm:$0xff]  }
 0x1d1   :  { %7633 = vmatprep.subr.bf16.mxu0 %v13266_v30  ;;  %7961 = vmatprep.subr.bf16.mxu1 %v13269_v31  ;;  %v13333_v30 = vld [vmem:[#allocation2 + $0x1eb0] ss:$36 sps:$4 sm:$0xff]  }
 0x1d2   :  { %v13338_v31 = vld [vmem:[#allocation2 + $0x1ef4] ss:$36 sps:$4 sm:$0xff]  }
 0x1d4   :  { %7634 = vmatpush1.bf16.msra.mxu0 %v13264_v32  ;;  %7962 = vmatpush1.bf16.msra.mxu1 %v13267_v34  ;;  %v13341_v32 = vld [vmem:[#allocation2 + $0x1efc] ss:$36 sps:$4 sm:$0xff]   ;;  %v13336_v34 = vld [vmem:[#allocation2 + $0x1ef0] ss:$36 sps:$4 sm:$0xff]  }
 0x1d5   :  { %7635 = vmatprep.subr.bf16.mxu0 %v13272_v35  ;;  %7963 = vmatprep.subr.bf16.mxu1 %v13275_v36  ;;  %v13339_v35 = vld [vmem:[#allocation2 + $0x1ef8] ss:$36 sps:$4 sm:$0xff]  }
 0x1d6   :  { %v13344_v36 = vld [vmem:[#allocation2 + $0x1f3c] ss:$36 sps:$4 sm:$0xff]  }
 0x1d8   :  { %7636 = vmatpush1.bf16.msra.mxu0 %v13270_v37  ;;  %7964 = vmatpush1.bf16.msra.mxu1 %v13273_v38  ;;  %v13347_v37 = vld [vmem:[#allocation2 + $0x1f44] ss:$36 sps:$4 sm:$0xff]   ;;  %v1462_v38 = vcombine.high %v15010_v13, %v15010_v13 }
 0x1d9   :  { %7637 = vmatprep.subr.bf16.mxu0 %v13278_v39  ;;  %7965 = vmatprep.subr.bf16.mxu1 %v13281_v40  ;;  %v13342_v39 = vld [vmem:[#allocation2 + $0x1f38] ss:$36 sps:$4 sm:$0xff]   ;;  %v13345_v40 = vld [vmem:[#allocation2 + $0x1f40] ss:$36 sps:$4 sm:$0xff]  }
 0x1dc   :  { %7638 = vmatpush1.bf16.msra.mxu0 %v13276_v43  ;;  %7966 = vmatpush1.bf16.msra.mxu1 %v13279_v44  ;;  %v13350_v43 = vld [vmem:[#allocation2 + $0x1f84] ss:$36 sps:$4 sm:$0xff]   ;;  %v13353_v44 = vld [vmem:[#allocation2 + $0x1f8c] ss:$36 sps:$4 sm:$0xff]  }
 0x1dd   :  { %7639 = vmatprep.subr.bf16.mxu0 %v13284_v45  ;;  %7967 = vmatprep.subr.bf16.mxu1 %v13287_v47  ;;  %v15027_v45 = vrot.slane %v1462_v38, %v14922_v49  ;;  %v13348_v47 = vld [vmem:[#allocation2 + $0x1f80] ss:$36 sps:$4 sm:$0xff]   ;;  %v13354_v49 = vld [vmem:[#allocation2 + $0x1fc8] ss:$36 sps:$4 sm:$0xff]  }
 0x1de   :  { %v13416_v38 = vld [vmem:[#allocation2 + $0x229c] ss:$36 sps:$4 sm:$0xff]  }
 0x1df   :  { %v15031_v13 = vcombine.high %v15027_v45, %v15027_v45 }
 0x1e0   :  { %7640 = vmatpush1.bf16.msra.mxu0 %v13282_v48  ;;  %7968 = vmatpush1.bf16.msra.mxu1 %v13285_v50  ;;  %v13351_v48 = vld [vmem:[#allocation2 + $0x1f88] ss:$36 sps:$4 sm:$0xff]  }
 0x1e1   :  { %7641 = vmatprep.subr.bf16.mxu0 %v13290_v51  ;;  %7969 = vmatprep.subr.bf16.mxu1 %v13293_v53  ;;  %v13356_v50 = vld [vmem:[#allocation2 + $0x1fcc] ss:$36 sps:$4 sm:$0xff]   ;;  %v13359_v51 = vld [vmem:[#allocation2 + $0x1fd4] ss:$36 sps:$4 sm:$0xff]  }
 0x1e2   :  { %v13357_v53 = vld [vmem:[#allocation2 + $0x1fd0] ss:$36 sps:$4 sm:$0xff]  }
 0x1e4   :  { %7642 = vmatpush1.bf16.msra.mxu0 %v13288_v55  ;;  %7970 = vmatpush1.bf16.msra.mxu1 %v13291_v56  ;;  %v13362_v55 = vld [vmem:[#allocation2 + $0x2014] ss:$36 sps:$4 sm:$0xff]   ;;  %v13365_v56 = vld [vmem:[#allocation2 + $0x201c] ss:$36 sps:$4 sm:$0xff]  }
 0x1e5   :  { %7643 = vmatprep.subr.bf16.mxu0 %v13296_v57  ;;  %7971 = vmatprep.subr.bf16.mxu1 %v13299_v59  ;;  %v13360_v57 = vld [vmem:[#allocation2 + $0x2010] ss:$36 sps:$4 sm:$0xff]   ;;  %v13363_v59 = vld [vmem:[#allocation2 + $0x2018] ss:$36 sps:$4 sm:$0xff]  }
 0x1e8   :  { %7644 = vmatpush1.bf16.msra.mxu0 %v13294_v60  ;;  %7972 = vmatpush1.bf16.msra.mxu1 %v13297_v61  ;;  %v13368_v60 = vld [vmem:[#allocation2 + $0x205c] ss:$36 sps:$4 sm:$0xff]   ;;  %v13371_v61 = vld [vmem:[#allocation2 + $0x2064] ss:$36 sps:$4 sm:$0xff]  }
 0x1e9   :  { %7645 = vmatprep.subr.bf16.mxu0 %v13302_v62  ;;  %7973 = vmatprep.subr.bf16.mxu1 %v13305_v63  ;;  %v13366_v62 = vld [vmem:[#allocation2 + $0x2058] ss:$36 sps:$4 sm:$0xff]   ;;  %v13369_v63 = vld [vmem:[#allocation2 + $0x2060] ss:$36 sps:$4 sm:$0xff]  }
 0x1ec   :  { %7646 = vmatpush1.bf16.msra.mxu0 %v13300_v0  ;;  %7974 = vmatpush1.bf16.msra.mxu1 %v13303_v2  ;;  %v13374_v0 = vld [vmem:[#allocation2 + $0x20a4] ss:$36 sps:$4 sm:$0xff]   ;;  %v13377_v2 = vld [vmem:[#allocation2 + $0x20ac] ss:$36 sps:$4 sm:$0xff]  }
 0x1ed   :  { %7647 = vmatprep.subr.bf16.mxu0 %v13308_v3  ;;  %7975 = vmatprep.subr.bf16.mxu1 %v13311_v4  ;;  %v13372_v3 = vld [vmem:[#allocation2 + $0x20a0] ss:$36 sps:$4 sm:$0xff]   ;;  %v13375_v4 = vld [vmem:[#allocation2 + $0x20a8] ss:$36 sps:$4 sm:$0xff]  }
 0x1f0   :  { %7648 = vmatpush1.bf16.msra.mxu0 %v13306_v5  ;;  %7976 = vmatpush1.bf16.msra.mxu1 %v13309_v6  ;;  %v13380_v5 = vld [vmem:[#allocation2 + $0x20ec] ss:$36 sps:$4 sm:$0xff]   ;;  %v13383_v6 = vld [vmem:[#allocation2 + $0x20f4] ss:$36 sps:$4 sm:$0xff]  }
 0x1f1   :  { %7649 = vmatprep.subr.bf16.mxu0 %v13314_v7  ;;  %7977 = vmatprep.subr.bf16.mxu1 %v13317_v8  ;;  %v13378_v7 = vld [vmem:[#allocation2 + $0x20e8] ss:$36 sps:$4 sm:$0xff]   ;;  %v13381_v8 = vld [vmem:[#allocation2 + $0x20f0] ss:$36 sps:$4 sm:$0xff]  }
 0x1f4   :  { %7650 = vmatpush1.bf16.msra.mxu0 %v13312_v9  ;;  %7978 = vmatpush1.bf16.msra.mxu1 %v13315_v10  ;;  %v13386_v9 = vld [vmem:[#allocation2 + $0x2134] ss:$36 sps:$4 sm:$0xff]   ;;  %v13389_v10 = vld [vmem:[#allocation2 + $0x213c] ss:$36 sps:$4 sm:$0xff]  }
 0x1f5   :  { %7651 = vmatprep.subr.bf16.mxu0 %v13320_v11  ;;  %7979 = vmatprep.subr.bf16.mxu1 %v13323_v14  ;;  %v13384_v11 = vld [vmem:[#allocation2 + $0x2130] ss:$36 sps:$4 sm:$0xff]   ;;  %v13387_v14 = vld [vmem:[#allocation2 + $0x2138] ss:$36 sps:$4 sm:$0xff]  }
 0x1f8   :  { %7652 = vmatpush1.bf16.msra.mxu0 %v13318_v15  ;;  %7980 = vmatpush1.bf16.msra.mxu1 %v13321_v16  ;;  %v13392_v15 = vld [vmem:[#allocation2 + $0x217c] ss:$36 sps:$4 sm:$0xff]   ;;  %v13395_v16 = vld [vmem:[#allocation2 + $0x2184] ss:$36 sps:$4 sm:$0xff]  }
 0x1f9   :  { %7653 = vmatprep.subr.bf16.mxu0 %v13326_v18  ;;  %7981 = vmatprep.subr.bf16.mxu1 %v13329_v19  ;;  %v13390_v18 = vld [vmem:[#allocation2 + $0x2178] ss:$36 sps:$4 sm:$0xff]   ;;  %v13393_v19 = vld [vmem:[#allocation2 + $0x2180] ss:$36 sps:$4 sm:$0xff]  }
 0x1fc   :  { %7654 = vmatpush1.bf16.msra.mxu0 %v13324_v20  ;;  %7982 = vmatpush1.bf16.msra.mxu1 %v13327_v23  ;;  %v13398_v20 = vld [vmem:[#allocation2 + $0x21c4] ss:$36 sps:$4 sm:$0xff]   ;;  %v13401_v23 = vld [vmem:[#allocation2 + $0x21cc] ss:$36 sps:$4 sm:$0xff]  }
 0x1fd   :  { %7655 = vmatprep.subr.bf16.mxu0 %v13332_v24  ;;  %7983 = vmatprep.subr.bf16.mxu1 %v13335_v28  ;;  %v13396_v24 = vld [vmem:[#allocation2 + $0x21c0] ss:$36 sps:$4 sm:$0xff]   ;;  %v13399_v28 = vld [vmem:[#allocation2 + $0x21c8] ss:$36 sps:$4 sm:$0xff]  }
 0x200   :  { %7656 = vmatpush1.bf16.msra.mxu0 %v13330_v29  ;;  %7984 = vmatpush1.bf16.msra.mxu1 %v13333_v30  ;;  %v13404_v29 = vld [vmem:[#allocation2 + $0x220c] ss:$36 sps:$4 sm:$0xff]   ;;  %v13407_v30 = vld [vmem:[#allocation2 + $0x2214] ss:$36 sps:$4 sm:$0xff]  }
 0x201   :  { %7657 = vmatprep.subr.bf16.mxu0 %v13338_v31  ;;  %7985 = vmatprep.subr.bf16.mxu1 %v13341_v32  ;;  %v13402_v31 = vld [vmem:[#allocation2 + $0x2208] ss:$36 sps:$4 sm:$0xff]   ;;  %v13405_v32 = vld [vmem:[#allocation2 + $0x2210] ss:$36 sps:$4 sm:$0xff]  }
 0x204   :  { %7658 = vmatpush1.bf16.msra.mxu0 %v13336_v34  ;;  %7986 = vmatpush1.bf16.msra.mxu1 %v13339_v35  ;;  %v13410_v34 = vld [vmem:[#allocation2 + $0x2254] ss:$36 sps:$4 sm:$0xff]   ;;  %v13413_v35 = vld [vmem:[#allocation2 + $0x225c] ss:$36 sps:$4 sm:$0xff]  }
 0x205   :  { %7659 = vmatprep.subr.bf16.mxu0 %v13344_v36  ;;  %7987 = vmatprep.subr.bf16.mxu1 %v13347_v37  ;;  %v13408_v36 = vld [vmem:[#allocation2 + $0x2250] ss:$36 sps:$4 sm:$0xff]   ;;  %v13411_v37 = vld [vmem:[#allocation2 + $0x2258] ss:$36 sps:$4 sm:$0xff]  }
 0x208   :  { %7660 = vmatpush1.bf16.msra.mxu0 %v13342_v39  ;;  %7988 = vmatpush1.bf16.msra.mxu1 %v13345_v40  ;;  %v13419_v39 = vld [vmem:[#allocation2 + $0x22a4] ss:$36 sps:$4 sm:$0xff]   ;;  %v13414_v40 = vld [vmem:[#allocation2 + $0x2298] ss:$36 sps:$4 sm:$0xff]  }
 0x209   :  { %7670 = vmatprep.subr.bf16.mxu0 %v13350_v43  ;;  %7998 = vmatprep.subr.bf16.mxu1 %v13353_v44  ;;  %v13417_v43 = vld [vmem:[#allocation2 + $0x22a0] ss:$36 sps:$4 sm:$0xff]  }
 0x20a   :  { %v13422_v44 = vld [vmem:[#allocation2 + $0x22e4] ss:$36 sps:$4 sm:$0xff]  }
 0x20b   :  { %7662 = vmatmul.mubr.bf16.vlgmr.msra.gmra.mrb[0].mxu0 %v15014_v21  ;;  %7990 = vmatmul.mubr.bf16.vlgmr.msra.gmra.mrb[0].mxu1 %v15014_v21 }
 0x20c   :  { %7671 = vmatpush1.bf16.msra.mxu0 %v13348_v47  ;;  %7999 = vmatpush1.bf16.msra.mxu1 %v13351_v48  ;;  %v13425_v47 = vld [vmem:[#allocation2 + $0x22ec] ss:$36 sps:$4 sm:$0xff]   ;;  %v13420_v48 = vld [vmem:[#allocation2 + $0x22e0] ss:$36 sps:$4 sm:$0xff]  }
 0x20d   :  { %7672 = vmatprep.subr.bf16.mxu0 %v13356_v50  ;;  %8000 = vmatprep.subr.bf16.mxu1 %v13359_v51  ;;  %v13423_v50 = vld [vmem:[#allocation2 + $0x22e8] ss:$36 sps:$4 sm:$0xff]  }
 0x20e   :  { %7702 = vmatprep.mubr.bf16.mxu0 %v15031_v13  ;;  %8030 = vmatprep.mubr.bf16.mxu1 %v15031_v13  ;;  %v13428_v51 = vld [vmem:[#allocation2 + $0x232c] ss:$36 sps:$4 sm:$0xff]  }
 0x210   :  { %7673 = vmatpush1.bf16.msra.mxu0 %v13354_v49  ;;  %8001 = vmatpush1.bf16.msra.mxu1 %v13357_v53  ;;  %v13431_v49 = vld [vmem:[#allocation2 + $0x2334] ss:$36 sps:$4 sm:$0xff]   ;;  %v13426_v53 = vld [vmem:[#allocation2 + $0x2328] ss:$36 sps:$4 sm:$0xff]  }
 0x211   :  { %7674 = vmatprep.subr.bf16.mxu0 %v13362_v55  ;;  %8002 = vmatprep.subr.bf16.mxu1 %v13365_v56  ;;  %v13429_v55 = vld [vmem:[#allocation2 + $0x2330] ss:$36 sps:$4 sm:$0xff]  }
 0x212   :  { %v13434_v56 = vld [vmem:[#allocation2 + $0x2374] ss:$36 sps:$4 sm:$0xff]  }
 0x214   :  { %7675 = vmatpush1.bf16.msra.mxu0 %v13360_v57  ;;  %8003 = vmatpush1.bf16.msra.mxu1 %v13363_v59  ;;  %v13437_v57 = vld [vmem:[#allocation2 + $0x237c] ss:$36 sps:$4 sm:$0xff]   ;;  %v13432_v59 = vld [vmem:[#allocation2 + $0x2370] ss:$36 sps:$4 sm:$0xff]  }
 0x215   :  { %7676 = vmatprep.subr.bf16.mxu0 %v13368_v60  ;;  %8004 = vmatprep.subr.bf16.mxu1 %v13371_v61  ;;  %v13435_v60 = vld [vmem:[#allocation2 + $0x2378] ss:$36 sps:$4 sm:$0xff]  }
 0x216   :  { %v13440_v61 = vld [vmem:[#allocation2 + $0x23bc] ss:$36 sps:$4 sm:$0xff]  }
 0x218   :  { %7677 = vmatpush1.bf16.msra.mxu0 %v13366_v62  ;;  %8005 = vmatpush1.bf16.msra.mxu1 %v13369_v63  ;;  %v13443_v62 = vld [vmem:[#allocation2 + $0x23c4] ss:$36 sps:$4 sm:$0xff]   ;;  %v13438_v63 = vld [vmem:[#allocation2 + $0x23b8] ss:$36 sps:$4 sm:$0xff]  }
 0x219   :  { %7678 = vmatprep.subr.bf16.mxu0 %v13374_v0  ;;  %8006 = vmatprep.subr.bf16.mxu1 %v13377_v2  ;;  %v13441_v0 = vld [vmem:[#allocation2 + $0x23c0] ss:$36 sps:$4 sm:$0xff]   ;;  %v13447_v2 = vld [vmem:[#allocation2 + $0x14] ss:$36 sps:$4 sm:$0xff]  }
 0x21c   :  { %7679 = vmatpush1.bf16.msra.mxu0 %v13372_v3  ;;  %8007 = vmatpush1.bf16.msra.mxu1 %v13375_v4  ;;  %v13450_v3 = vld [vmem:[#allocation2 + $0x1c] ss:$36 sps:$4 sm:$0xff]   ;;  %v13445_v4 = vld [vmem:[#allocation2 + $0x10] ss:$36 sps:$4 sm:$0xff]  }
 0x21d   :  { %7680 = vmatprep.subr.bf16.mxu0 %v13380_v5  ;;  %8008 = vmatprep.subr.bf16.mxu1 %v13383_v6  ;;  %v13448_v5 = vld [vmem:[#allocation2 + $0x18] ss:$36 sps:$4 sm:$0xff]  }
 0x21e   :  { %v13453_v6 = vld [vmem:[#allocation2 + $0x5c] ss:$36 sps:$4 sm:$0xff]  }
 0x220   :  { %7681 = vmatpush1.bf16.msra.mxu0 %v13378_v7  ;;  %8009 = vmatpush1.bf16.msra.mxu1 %v13381_v8  ;;  %v13456_v7 = vld [vmem:[#allocation2 + $0x64] ss:$36 sps:$4 sm:$0xff]   ;;  %v13451_v8 = vld [vmem:[#allocation2 + $0x58] ss:$36 sps:$4 sm:$0xff]  }
 0x221   :  { %7682 = vmatprep.subr.bf16.mxu0 %v13386_v9  ;;  %8010 = vmatprep.subr.bf16.mxu1 %v13389_v10  ;;  %v13454_v9 = vld [vmem:[#allocation2 + $0x60] ss:$36 sps:$4 sm:$0xff]  }
 0x222   :  { %v13459_v10 = vld [vmem:[#allocation2 + $0xa4] ss:$36 sps:$4 sm:$0xff]  }
 0x224   :  { %7683 = vmatpush1.bf16.msra.mxu0 %v13384_v11  ;;  %8011 = vmatpush1.bf16.msra.mxu1 %v13387_v14  ;;  %v13462_v11 = vld [vmem:[#allocation2 + $0xac] ss:$36 sps:$4 sm:$0xff]   ;;  %v13457_v14 = vld [vmem:[#allocation2 + $0xa0] ss:$36 sps:$4 sm:$0xff]  }
 0x225   :  { %7684 = vmatprep.subr.bf16.mxu0 %v13392_v15  ;;  %8012 = vmatprep.subr.bf16.mxu1 %v13395_v16  ;;  %v13460_v15 = vld [vmem:[#allocation2 + $0xa8] ss:$36 sps:$4 sm:$0xff]  }
 0x226   :  { %v13465_v16 = vld [vmem:[#allocation2 + $0xec] ss:$36 sps:$4 sm:$0xff]  }
 0x228   :  { %7685 = vmatpush1.bf16.msra.mxu0 %v13390_v18  ;;  %8013 = vmatpush1.bf16.msra.mxu1 %v13393_v19  ;;  %v13468_v18 = vld [vmem:[#allocation2 + $0xf4] ss:$36 sps:$4 sm:$0xff]   ;;  %v13463_v19 = vld [vmem:[#allocation2 + $0xe8] ss:$36 sps:$4 sm:$0xff]  }
 0x229   :  { %7686 = vmatprep.subr.bf16.mxu0 %v13398_v20  ;;  %8014 = vmatprep.subr.bf16.mxu1 %v13401_v23  ;;  %v13466_v20 = vld [vmem:[#allocation2 + $0xf0] ss:$36 sps:$4 sm:$0xff]  }
 0x22a   :  { %v13471_v23 = vld [vmem:[#allocation2 + $0x134] ss:$36 sps:$4 sm:$0xff]  }
 0x22c   :  { %7687 = vmatpush1.bf16.msra.mxu0 %v13396_v24  ;;  %8015 = vmatpush1.bf16.msra.mxu1 %v13399_v28  ;;  %v13474_v24 = vld [vmem:[#allocation2 + $0x13c] ss:$36 sps:$4 sm:$0xff]   ;;  %v13469_v28 = vld [vmem:[#allocation2 + $0x130] ss:$36 sps:$4 sm:$0xff]  }
 0x22d   :  { %7688 = vmatprep.subr.bf16.mxu0 %v13404_v29  ;;  %8016 = vmatprep.subr.bf16.mxu1 %v13407_v30  ;;  %v13472_v29 = vld [vmem:[#allocation2 + $0x138] ss:$36 sps:$4 sm:$0xff]  }
 0x22e   :  { %v13477_v30 = vld [vmem:[#allocation2 + $0x17c] ss:$36 sps:$4 sm:$0xff]  }
 0x230   :  { %7689 = vmatpush1.bf16.msra.mxu0 %v13402_v31  ;;  %8017 = vmatpush1.bf16.msra.mxu1 %v13405_v32  ;;  %v13480_v31 = vld [vmem:[#allocation2 + $0x184] ss:$36 sps:$4 sm:$0xff]   ;;  %v13475_v32 = vld [vmem:[#allocation2 + $0x178] ss:$36 sps:$4 sm:$0xff]  }
 0x231   :  { %7690 = vmatprep.subr.bf16.mxu0 %v13410_v34  ;;  %8018 = vmatprep.subr.bf16.mxu1 %v13413_v35  ;;  %v13478_v34 = vld [vmem:[#allocation2 + $0x180] ss:$36 sps:$4 sm:$0xff]  }
 0x232   :  { %v13483_v35 = vld [vmem:[#allocation2 + $0x1c4] ss:$36 sps:$4 sm:$0xff]  }
 0x234   :  { %7691 = vmatpush1.bf16.msra.mxu0 %v13408_v36  ;;  %8019 = vmatpush1.bf16.msra.mxu1 %v13411_v37  ;;  %v13486_v36 = vld [vmem:[#allocation2 + $0x1cc] ss:$36 sps:$4 sm:$0xff]   ;;  %v13481_v37 = vld [vmem:[#allocation2 + $0x1c0] ss:$36 sps:$4 sm:$0xff]  }
 0x235   :  { %7692 = vmatprep.subr.bf16.mxu0 %v13416_v38  ;;  %8020 = vmatprep.subr.bf16.mxu1 %v13419_v39  ;;  %v13484_v38 = vld [vmem:[#allocation2 + $0x1c8] ss:$36 sps:$4 sm:$0xff]  }
 0x236   :  { %v13489_v39 = vld [vmem:[#allocation2 + $0x20c] ss:$36 sps:$4 sm:$0xff]  }
 0x238   :  { %7693 = vmatpush1.bf16.msra.mxu0 %v13414_v40  ;;  %8021 = vmatpush1.bf16.msra.mxu1 %v13417_v43  ;;  %v13492_v40 = vld [vmem:[#allocation2 + $0x214] ss:$36 sps:$4 sm:$0xff]   ;;  %v13487_v43 = vld [vmem:[#allocation2 + $0x208] ss:$36 sps:$4 sm:$0xff]  }
 0x239   :  { %7694 = vmatprep.subr.bf16.mxu0 %v13422_v44  ;;  %8022 = vmatprep.subr.bf16.mxu1 %v13425_v47  ;;  %v13490_v44 = vld [vmem:[#allocation2 + $0x210] ss:$36 sps:$4 sm:$0xff]  }
 0x23a   :  { %v13495_v47 = vld [vmem:[#allocation2 + $0x254] ss:$36 sps:$4 sm:$0xff]  }
 0x23c   :  { %7695 = vmatpush1.bf16.msra.mxu0 %v13420_v48  ;;  %8023 = vmatpush1.bf16.msra.mxu1 %v13423_v50  ;;  %v13498_v48 = vld [vmem:[#allocation2 + $0x25c] ss:$36 sps:$4 sm:$0xff]   ;;  %v13493_v50 = vld [vmem:[#allocation2 + $0x250] ss:$36 sps:$4 sm:$0xff]  }
 0x23d   :  { %7696 = vmatprep.subr.bf16.mxu0 %v13428_v51  ;;  %8024 = vmatprep.subr.bf16.mxu1 %v13431_v49  ;;  %v13496_v51 = vld [vmem:[#allocation2 + $0x258] ss:$36 sps:$4 sm:$0xff]  }
 0x23e   :  { %v13501_v49 = vld [vmem:[#allocation2 + $0x29c] ss:$36 sps:$4 sm:$0xff]  }
 0x240   :  { %7697 = vmatpush1.bf16.msra.mxu0 %v13426_v53  ;;  %8025 = vmatpush1.bf16.msra.mxu1 %v13429_v55  ;;  %v13504_v53 = vld [vmem:[#allocation2 + $0x2a4] ss:$36 sps:$4 sm:$0xff]   ;;  %v13499_v55 = vld [vmem:[#allocation2 + $0x298] ss:$36 sps:$4 sm:$0xff]  }
 0x241   :  { %7698 = vmatprep.subr.bf16.mxu0 %v13434_v56  ;;  %8026 = vmatprep.subr.bf16.mxu1 %v13437_v57  ;;  %v13502_v56 = vld [vmem:[#allocation2 + $0x2a0] ss:$36 sps:$4 sm:$0xff]  }
 0x242   :  { %v13507_v57 = vld [vmem:[#allocation2 + $0x2e4] ss:$36 sps:$4 sm:$0xff]  }
 0x244   :  { %7699 = vmatpush1.bf16.msra.mxu0 %v13432_v59  ;;  %8027 = vmatpush1.bf16.msra.mxu1 %v13435_v60  ;;  %v13510_v59 = vld [vmem:[#allocation2 + $0x2ec] ss:$36 sps:$4 sm:$0xff]   ;;  %v13505_v60 = vld [vmem:[#allocation2 + $0x2e0] ss:$36 sps:$4 sm:$0xff]  }
 0x245   :  { %7700 = vmatprep.subr.bf16.mxu0 %v13440_v61  ;;  %8028 = vmatprep.subr.bf16.mxu1 %v13443_v62  ;;  %v13508_v61 = vld [vmem:[#allocation2 + $0x2e8] ss:$36 sps:$4 sm:$0xff]  }
 0x246   :  { %v13513_v62 = vld [vmem:[#allocation2 + $0x32c] ss:$36 sps:$4 sm:$0xff]  }
 0x248   :  { %7701 = vmatpush1.bf16.msra.mxu0 %v13438_v63  ;;  %8029 = vmatpush1.bf16.msra.mxu1 %v13441_v0  ;;  %v13516_v63 = vld [vmem:[#allocation2 + $0x334] ss:$36 sps:$4 sm:$0xff]   ;;  %v13511_v0 = vld [vmem:[#allocation2 + $0x328] ss:$36 sps:$4 sm:$0xff]  }
 0x249   :  { %8039 = vmatprep.subr.bf16.mxu0 %v13447_v2  ;;  %8367 = vmatprep.subr.bf16.mxu1 %v13450_v3  ;;  %v13514_v2 = vld [vmem:[#allocation2 + $0x330] ss:$36 sps:$4 sm:$0xff]  }
 0x24a   :  { %v13519_v3 = vld [vmem:[#allocation2 + $0x374] ss:$36 sps:$4 sm:$0xff]  }
 0x24b   :  { %7703 = vmatmul.mubr.bf16.vlgmr.msra.gmra.mrb[0].mxu0 %v15027_v45  ;;  %8031 = vmatmul.mubr.bf16.vlgmr.msra.gmra.mrb[0].mxu1 %v15027_v45 }
 0x24c   :  { %8040 = vmatpush1.bf16.msra.mxu0 %v13445_v4  ;;  %8368 = vmatpush1.bf16.msra.mxu1 %v13448_v5  ;;  %v13522_v4 = vld [vmem:[#allocation2 + $0x37c] ss:$36 sps:$4 sm:$0xff]   ;;  %v13517_v5 = vld [vmem:[#allocation2 + $0x370] ss:$36 sps:$4 sm:$0xff]  }
 0x24d   :  { %8041 = vmatprep.subr.bf16.mxu0 %v13453_v6  ;;  %8369 = vmatprep.subr.bf16.mxu1 %v13456_v7  ;;  %v13520_v6 = vld [vmem:[#allocation2 + $0x378] ss:$36 sps:$4 sm:$0xff]  }
 0x24e   :  { %8071 = vmatprep.mubr.bf16.mxu0 %v14932_v58  ;;  %8399 = vmatprep.mubr.bf16.mxu1 %v14932_v58  ;;  %v13525_v7 = vld [vmem:[#allocation2 + $0x3bc] ss:$36 sps:$4 sm:$0xff]  }
 0x250   :  { %8042 = vmatpush1.bf16.msra.mxu0 %v13451_v8  ;;  %8370 = vmatpush1.bf16.msra.mxu1 %v13454_v9  ;;  %v13528_v8 = vld [vmem:[#allocation2 + $0x3c4] ss:$36 sps:$4 sm:$0xff]   ;;  %v13523_v9 = vld [vmem:[#allocation2 + $0x3b8] ss:$36 sps:$4 sm:$0xff]  }
 0x251   :  { %8043 = vmatprep.subr.bf16.mxu0 %v13459_v10  ;;  %8371 = vmatprep.subr.bf16.mxu1 %v13462_v11  ;;  %v13526_v10 = vld [vmem:[#allocation2 + $0x3c0] ss:$36 sps:$4 sm:$0xff]  }
 0x252   :  { %v13531_v11 = vld [vmem:[#allocation2 + $0x404] ss:$36 sps:$4 sm:$0xff]  }
 0x254   :  { %8044 = vmatpush1.bf16.msra.mxu0 %v13457_v14  ;;  %8372 = vmatpush1.bf16.msra.mxu1 %v13460_v15  ;;  %v13534_v14 = vld [vmem:[#allocation2 + $0x40c] ss:$36 sps:$4 sm:$0xff]   ;;  %v13529_v15 = vld [vmem:[#allocation2 + $0x400] ss:$36 sps:$4 sm:$0xff]  }
 0x255   :  { %8045 = vmatprep.subr.bf16.mxu0 %v13465_v16  ;;  %8373 = vmatprep.subr.bf16.mxu1 %v13468_v18  ;;  %v13532_v16 = vld [vmem:[#allocation2 + $0x408] ss:$36 sps:$4 sm:$0xff]  }
 0x256   :  { %v13537_v18 = vld [vmem:[#allocation2 + $0x44c] ss:$36 sps:$4 sm:$0xff]  }
 0x258   :  { %8046 = vmatpush1.bf16.msra.mxu0 %v13463_v19  ;;  %8374 = vmatpush1.bf16.msra.mxu1 %v13466_v20  ;;  %v13540_v19 = vld [vmem:[#allocation2 + $0x454] ss:$36 sps:$4 sm:$0xff]   ;;  %v13535_v20 = vld [vmem:[#allocation2 + $0x448] ss:$36 sps:$4 sm:$0xff]  }
 0x259   :  { %8047 = vmatprep.subr.bf16.mxu0 %v13471_v23  ;;  %8375 = vmatprep.subr.bf16.mxu1 %v13474_v24  ;;  %v13538_v23 = vld [vmem:[#allocation2 + $0x450] ss:$36 sps:$4 sm:$0xff]  }
 0x25a   :  { %v13543_v24 = vld [vmem:[#allocation2 + $0x494] ss:$36 sps:$4 sm:$0xff]  }
 0x25c   :  { %8048 = vmatpush1.bf16.msra.mxu0 %v13469_v28  ;;  %8376 = vmatpush1.bf16.msra.mxu1 %v13472_v29  ;;  %v13546_v28 = vld [vmem:[#allocation2 + $0x49c] ss:$36 sps:$4 sm:$0xff]   ;;  %v13541_v29 = vld [vmem:[#allocation2 + $0x490] ss:$36 sps:$4 sm:$0xff]  }
 0x25d   :  { %8049 = vmatprep.subr.bf16.mxu0 %v13477_v30  ;;  %8377 = vmatprep.subr.bf16.mxu1 %v13480_v31  ;;  %v13544_v30 = vld [vmem:[#allocation2 + $0x498] ss:$36 sps:$4 sm:$0xff]  }
 0x25e   :  { %v13549_v31 = vld [vmem:[#allocation2 + $0x4dc] ss:$36 sps:$4 sm:$0xff]  }
 0x260   :  { %8050 = vmatpush1.bf16.msra.mxu0 %v13475_v32  ;;  %8378 = vmatpush1.bf16.msra.mxu1 %v13478_v34  ;;  %v13552_v32 = vld [vmem:[#allocation2 + $0x4e4] ss:$36 sps:$4 sm:$0xff]   ;;  %v13547_v34 = vld [vmem:[#allocation2 + $0x4d8] ss:$36 sps:$4 sm:$0xff]  }
 0x261   :  { %8051 = vmatprep.subr.bf16.mxu0 %v13483_v35  ;;  %8379 = vmatprep.subr.bf16.mxu1 %v13486_v36  ;;  %v13550_v35 = vld [vmem:[#allocation2 + $0x4e0] ss:$36 sps:$4 sm:$0xff]  }
 0x262   :  { %v13555_v36 = vld [vmem:[#allocation2 + $0x524] ss:$36 sps:$4 sm:$0xff]  }
 0x264   :  { %8052 = vmatpush1.bf16.msra.mxu0 %v13481_v37  ;;  %8380 = vmatpush1.bf16.msra.mxu1 %v13484_v38  ;;  %v13558_v37 = vld [vmem:[#allocation2 + $0x52c] ss:$36 sps:$4 sm:$0xff]   ;;  %v13553_v38 = vld [vmem:[#allocation2 + $0x520] ss:$36 sps:$4 sm:$0xff]  }
 0x265   :  { %8053 = vmatprep.subr.bf16.mxu0 %v13489_v39  ;;  %8381 = vmatprep.subr.bf16.mxu1 %v13492_v40  ;;  %v13556_v39 = vld [vmem:[#allocation2 + $0x528] ss:$36 sps:$4 sm:$0xff]  }
 0x266   :  { %v13561_v40 = vld [vmem:[#allocation2 + $0x56c] ss:$36 sps:$4 sm:$0xff]  }
 0x268   :  { %8054 = vmatpush1.bf16.msra.mxu0 %v13487_v43  ;;  %8382 = vmatpush1.bf16.msra.mxu1 %v13490_v44  ;;  %v13564_v43 = vld [vmem:[#allocation2 + $0x574] ss:$36 sps:$4 sm:$0xff]   ;;  %v13559_v44 = vld [vmem:[#allocation2 + $0x568] ss:$36 sps:$4 sm:$0xff]  }
 0x269   :  { %8055 = vmatprep.subr.bf16.mxu0 %v13495_v47  ;;  %8383 = vmatprep.subr.bf16.mxu1 %v13498_v48  ;;  %v13562_v47 = vld [vmem:[#allocation2 + $0x570] ss:$36 sps:$4 sm:$0xff]  }
 0x26a   :  { %v13567_v48 = vld [vmem:[#allocation2 + $0x5b4] ss:$36 sps:$4 sm:$0xff]  }
 0x26c   :  { %8056 = vmatpush1.bf16.msra.mxu0 %v13493_v50  ;;  %8384 = vmatpush1.bf16.msra.mxu1 %v13496_v51  ;;  %v13570_v50 = vld [vmem:[#allocation2 + $0x5bc] ss:$36 sps:$4 sm:$0xff]   ;;  %v13565_v51 = vld [vmem:[#allocation2 + $0x5b0] ss:$36 sps:$4 sm:$0xff]  }
 0x26d   :  { %8057 = vmatprep.subr.bf16.mxu0 %v13501_v49  ;;  %8385 = vmatprep.subr.bf16.mxu1 %v13504_v53  ;;  %v13568_v49 = vld [vmem:[#allocation2 + $0x5b8] ss:$36 sps:$4 sm:$0xff]  }
 0x26e   :  { %v13573_v53 = vld [vmem:[#allocation2 + $0x5fc] ss:$36 sps:$4 sm:$0xff]  }
 0x270   :  { %8058 = vmatpush1.bf16.msra.mxu0 %v13499_v55  ;;  %8386 = vmatpush1.bf16.msra.mxu1 %v13502_v56  ;;  %v13576_v55 = vld [vmem:[#allocation2 + $0x604] ss:$36 sps:$4 sm:$0xff]   ;;  %v13571_v56 = vld [vmem:[#allocation2 + $0x5f8] ss:$36 sps:$4 sm:$0xff]  }
 0x271   :  { %8059 = vmatprep.subr.bf16.mxu0 %v13507_v57  ;;  %8387 = vmatprep.subr.bf16.mxu1 %v13510_v59  ;;  %v13574_v57 = vld [vmem:[#allocation2 + $0x600] ss:$36 sps:$4 sm:$0xff]  }
 0x272   :  { %v13579_v59 = vld [vmem:[#allocation2 + $0x644] ss:$36 sps:$4 sm:$0xff]  }
 0x274   :  { %8060 = vmatpush1.bf16.msra.mxu0 %v13505_v60  ;;  %8388 = vmatpush1.bf16.msra.mxu1 %v13508_v61  ;;  %v13582_v60 = vld [vmem:[#allocation2 + $0x64c] ss:$36 sps:$4 sm:$0xff]   ;;  %v13577_v61 = vld [vmem:[#allocation2 + $0x640] ss:$36 sps:$4 sm:$0xff]  }
 0x275   :  { %8061 = vmatprep.subr.bf16.mxu0 %v13513_v62  ;;  %8389 = vmatprep.subr.bf16.mxu1 %v13516_v63  ;;  %v13580_v62 = vld [vmem:[#allocation2 + $0x648] ss:$36 sps:$4 sm:$0xff]  }
 0x276   :  { %v13585_v63 = vld [vmem:[#allocation2 + $0x68c] ss:$36 sps:$4 sm:$0xff]  }
 0x278   :  { %8062 = vmatpush1.bf16.msra.mxu0 %v13511_v0  ;;  %8390 = vmatpush1.bf16.msra.mxu1 %v13514_v2  ;;  %v13588_v0 = vld [vmem:[#allocation2 + $0x694] ss:$36 sps:$4 sm:$0xff]   ;;  %v13583_v2 = vld [vmem:[#allocation2 + $0x688] ss:$36 sps:$4 sm:$0xff]  }
 0x279   :  { %8063 = vmatprep.subr.bf16.mxu0 %v13519_v3  ;;  %8391 = vmatprep.subr.bf16.mxu1 %v13522_v4  ;;  %v13586_v3 = vld [vmem:[#allocation2 + $0x690] ss:$36 sps:$4 sm:$0xff]  }
 0x27a   :  { %v13591_v4 = vld [vmem:[#allocation2 + $0x6d4] ss:$36 sps:$4 sm:$0xff]  }
 0x27c   :  { %8064 = vmatpush1.bf16.msra.mxu0 %v13517_v5  ;;  %8392 = vmatpush1.bf16.msra.mxu1 %v13520_v6  ;;  %v13594_v5 = vld [vmem:[#allocation2 + $0x6dc] ss:$36 sps:$4 sm:$0xff]   ;;  %v13589_v6 = vld [vmem:[#allocation2 + $0x6d0] ss:$36 sps:$4 sm:$0xff]  }
 0x27d   :  { %8065 = vmatprep.subr.bf16.mxu0 %v13525_v7  ;;  %8393 = vmatprep.subr.bf16.mxu1 %v13528_v8  ;;  %v13592_v7 = vld [vmem:[#allocation2 + $0x6d8] ss:$36 sps:$4 sm:$0xff]  }
 0x27e   :  { %v13597_v8 = vld [vmem:[#allocation2 + $0x71c] ss:$36 sps:$4 sm:$0xff]  }
 0x280   :  { %8066 = vmatpush1.bf16.msra.mxu0 %v13523_v9  ;;  %8394 = vmatpush1.bf16.msra.mxu1 %v13526_v10  ;;  %v13600_v9 = vld [vmem:[#allocation2 + $0x724] ss:$36 sps:$4 sm:$0xff]   ;;  %v13595_v10 = vld [vmem:[#allocation2 + $0x718] ss:$36 sps:$4 sm:$0xff]  }
 0x281   :  { %8067 = vmatprep.subr.bf16.mxu0 %v13531_v11  ;;  %8395 = vmatprep.subr.bf16.mxu1 %v13534_v14  ;;  %v13598_v11 = vld [vmem:[#allocation2 + $0x720] ss:$36 sps:$4 sm:$0xff]  }
 0x282   :  { %v13603_v14 = vld [vmem:[#allocation2 + $0x764] ss:$36 sps:$4 sm:$0xff]  }
 0x284   :  { %8068 = vmatpush1.bf16.msra.mxu0 %v13529_v15  ;;  %8396 = vmatpush1.bf16.msra.mxu1 %v13532_v16  ;;  %v13606_v15 = vld [vmem:[#allocation2 + $0x76c] ss:$36 sps:$4 sm:$0xff]   ;;  %v13601_v16 = vld [vmem:[#allocation2 + $0x760] ss:$36 sps:$4 sm:$0xff]  }
 0x285   :  { %8069 = vmatprep.subr.bf16.mxu0 %v13537_v18  ;;  %8397 = vmatprep.subr.bf16.mxu1 %v13540_v19  ;;  %v13604_v18 = vld [vmem:[#allocation2 + $0x768] ss:$36 sps:$4 sm:$0xff]  }
 0x286   :  { %v13609_v19 = vld [vmem:[#allocation2 + $0x7ac] ss:$36 sps:$4 sm:$0xff]  }
 0x288   :  { %8070 = vmatpush1.bf16.msra.mxu0 %v13535_v20  ;;  %8398 = vmatpush1.bf16.msra.mxu1 %v13538_v23  ;;  %v13612_v20 = vld [vmem:[#allocation2 + $0x7b4] ss:$36 sps:$4 sm:$0xff]   ;;  %v13607_v23 = vld [vmem:[#allocation2 + $0x7a8] ss:$36 sps:$4 sm:$0xff]  }
 0x289   :  { %8080 = vmatprep.subr.bf16.mxu0 %v13543_v24  ;;  %8408 = vmatprep.subr.bf16.mxu1 %v13546_v28  ;;  %v13610_v24 = vld [vmem:[#allocation2 + $0x7b0] ss:$36 sps:$4 sm:$0xff]  }
 0x28a   :  { %v13615_v28 = vld [vmem:[#allocation2 + $0x7f4] ss:$36 sps:$4 sm:$0xff]  }
 0x28b   :  { %8072 = vmatmul.mubr.bf16.vlgmr.msra.gmra.mrb[4].mxu0 %v14928_v54  ;;  %8400 = vmatmul.mubr.bf16.vlgmr.msra.gmra.mrb[4].mxu1 %v14928_v54 }
 0x28c   :  { %8081 = vmatpush1.bf16.msra.mxu0 %v13541_v29  ;;  %8409 = vmatpush1.bf16.msra.mxu1 %v13544_v30  ;;  %v13618_v29 = vld [vmem:[#allocation2 + $0x7fc] ss:$36 sps:$4 sm:$0xff]   ;;  %v13613_v30 = vld [vmem:[#allocation2 + $0x7f0] ss:$36 sps:$4 sm:$0xff]  }
 0x28d   :  { %8082 = vmatprep.subr.bf16.mxu0 %v13549_v31  ;;  %8410 = vmatprep.subr.bf16.mxu1 %v13552_v32  ;;  %v13616_v31 = vld [vmem:[#allocation2 + $0x7f8] ss:$36 sps:$4 sm:$0xff]  }
 0x28e   :  { %8112 = vmatprep.mubr.bf16.mxu0 %v14941_v17  ;;  %8440 = vmatprep.mubr.bf16.mxu1 %v14941_v17  ;;  %v13621_v32 = vld [vmem:[#allocation2 + $0x83c] ss:$36 sps:$4 sm:$0xff]  }
 0x290   :  { %8083 = vmatpush1.bf16.msra.mxu0 %v13547_v34  ;;  %8411 = vmatpush1.bf16.msra.mxu1 %v13550_v35  ;;  %v13624_v34 = vld [vmem:[#allocation2 + $0x844] ss:$36 sps:$4 sm:$0xff]   ;;  %v13619_v35 = vld [vmem:[#allocation2 + $0x838] ss:$36 sps:$4 sm:$0xff]  }
 0x291   :  { %8084 = vmatprep.subr.bf16.mxu0 %v13555_v36  ;;  %8412 = vmatprep.subr.bf16.mxu1 %v13558_v37  ;;  %v13622_v36 = vld [vmem:[#allocation2 + $0x840] ss:$36 sps:$4 sm:$0xff]  }
 0x292   :  { %v13627_v37 = vld [vmem:[#allocation2 + $0x884] ss:$36 sps:$4 sm:$0xff]  }
 0x294   :  { %8085 = vmatpush1.bf16.msra.mxu0 %v13553_v38  ;;  %8413 = vmatpush1.bf16.msra.mxu1 %v13556_v39  ;;  %v13630_v38 = vld [vmem:[#allocation2 + $0x88c] ss:$36 sps:$4 sm:$0xff]   ;;  %v13625_v39 = vld [vmem:[#allocation2 + $0x880] ss:$36 sps:$4 sm:$0xff]  }
 0x295   :  { %8086 = vmatprep.subr.bf16.mxu0 %v13561_v40  ;;  %8414 = vmatprep.subr.bf16.mxu1 %v13564_v43  ;;  %v13628_v40 = vld [vmem:[#allocation2 + $0x888] ss:$36 sps:$4 sm:$0xff]  }
 0x296   :  { %v13633_v43 = vld [vmem:[#allocation2 + $0x8cc] ss:$36 sps:$4 sm:$0xff]  }
 0x298   :  { %8087 = vmatpush1.bf16.msra.mxu0 %v13559_v44  ;;  %8415 = vmatpush1.bf16.msra.mxu1 %v13562_v47  ;;  %v13636_v44 = vld [vmem:[#allocation2 + $0x8d4] ss:$36 sps:$4 sm:$0xff]   ;;  %v13631_v47 = vld [vmem:[#allocation2 + $0x8c8] ss:$36 sps:$4 sm:$0xff]  }
 0x299   :  { %8088 = vmatprep.subr.bf16.mxu0 %v13567_v48  ;;  %8416 = vmatprep.subr.bf16.mxu1 %v13570_v50  ;;  %v13634_v48 = vld [vmem:[#allocation2 + $0x8d0] ss:$36 sps:$4 sm:$0xff]  }
 0x29a   :  { %v13639_v50 = vld [vmem:[#allocation2 + $0x914] ss:$36 sps:$4 sm:$0xff]  }
 0x29c   :  { %8089 = vmatpush1.bf16.msra.mxu0 %v13565_v51  ;;  %8417 = vmatpush1.bf16.msra.mxu1 %v13568_v49  ;;  %v13642_v51 = vld [vmem:[#allocation2 + $0x91c] ss:$36 sps:$4 sm:$0xff]   ;;  %v13637_v49 = vld [vmem:[#allocation2 + $0x910] ss:$36 sps:$4 sm:$0xff]  }
 0x29d   :  { %8090 = vmatprep.subr.bf16.mxu0 %v13573_v53  ;;  %8418 = vmatprep.subr.bf16.mxu1 %v13576_v55  ;;  %v13640_v53 = vld [vmem:[#allocation2 + $0x918] ss:$36 sps:$4 sm:$0xff]  }
 0x29e   :  { %v13645_v55 = vld [vmem:[#allocation2 + $0x95c] ss:$36 sps:$4 sm:$0xff]  }
 0x2a0   :  { %8091 = vmatpush1.bf16.msra.mxu0 %v13571_v56  ;;  %8419 = vmatpush1.bf16.msra.mxu1 %v13574_v57  ;;  %v13648_v56 = vld [vmem:[#allocation2 + $0x964] ss:$36 sps:$4 sm:$0xff]   ;;  %v13643_v57 = vld [vmem:[#allocation2 + $0x958] ss:$36 sps:$4 sm:$0xff]  }
 0x2a1   :  { %8092 = vmatprep.subr.bf16.mxu0 %v13579_v59  ;;  %8420 = vmatprep.subr.bf16.mxu1 %v13582_v60  ;;  %v13646_v59 = vld [vmem:[#allocation2 + $0x960] ss:$36 sps:$4 sm:$0xff]  }
 0x2a2   :  { %v13651_v60 = vld [vmem:[#allocation2 + $0x9a4] ss:$36 sps:$4 sm:$0xff]  }
 0x2a4   :  { %8093 = vmatpush1.bf16.msra.mxu0 %v13577_v61  ;;  %8421 = vmatpush1.bf16.msra.mxu1 %v13580_v62  ;;  %v13654_v61 = vld [vmem:[#allocation2 + $0x9ac] ss:$36 sps:$4 sm:$0xff]   ;;  %v13649_v62 = vld [vmem:[#allocation2 + $0x9a0] ss:$36 sps:$4 sm:$0xff]  }
 0x2a5   :  { %8094 = vmatprep.subr.bf16.mxu0 %v13585_v63  ;;  %8422 = vmatprep.subr.bf16.mxu1 %v13588_v0  ;;  %v13652_v63 = vld [vmem:[#allocation2 + $0x9a8] ss:$36 sps:$4 sm:$0xff]  }
 0x2a6   :  { %v13657_v0 = vld [vmem:[#allocation2 + $0x9ec] ss:$36 sps:$4 sm:$0xff]  }
 0x2a8   :  { %8095 = vmatpush1.bf16.msra.mxu0 %v13583_v2  ;;  %8423 = vmatpush1.bf16.msra.mxu1 %v13586_v3  ;;  %v13660_v2 = vld [vmem:[#allocation2 + $0x9f4] ss:$36 sps:$4 sm:$0xff]   ;;  %v13655_v3 = vld [vmem:[#allocation2 + $0x9e8] ss:$36 sps:$4 sm:$0xff]  }
 0x2a9   :  { %8096 = vmatprep.subr.bf16.mxu0 %v13591_v4  ;;  %8424 = vmatprep.subr.bf16.mxu1 %v13594_v5  ;;  %v13658_v4 = vld [vmem:[#allocation2 + $0x9f0] ss:$36 sps:$4 sm:$0xff]  }
 0x2aa   :  { %v13663_v5 = vld [vmem:[#allocation2 + $0xa34] ss:$36 sps:$4 sm:$0xff]  }
 0x2ac   :  { %8097 = vmatpush1.bf16.msra.mxu0 %v13589_v6  ;;  %8425 = vmatpush1.bf16.msra.mxu1 %v13592_v7  ;;  %v13666_v6 = vld [vmem:[#allocation2 + $0xa3c] ss:$36 sps:$4 sm:$0xff]   ;;  %v13661_v7 = vld [vmem:[#allocation2 + $0xa30] ss:$36 sps:$4 sm:$0xff]  }
 0x2ad   :  { %8098 = vmatprep.subr.bf16.mxu0 %v13597_v8  ;;  %8426 = vmatprep.subr.bf16.mxu1 %v13600_v9  ;;  %v13664_v8 = vld [vmem:[#allocation2 + $0xa38] ss:$36 sps:$4 sm:$0xff]  }
 0x2ae   :  { %v13669_v9 = vld [vmem:[#allocation2 + $0xa7c] ss:$36 sps:$4 sm:$0xff]  }
 0x2b0   :  { %8099 = vmatpush1.bf16.msra.mxu0 %v13595_v10  ;;  %8427 = vmatpush1.bf16.msra.mxu1 %v13598_v11  ;;  %v13672_v10 = vld [vmem:[#allocation2 + $0xa84] ss:$36 sps:$4 sm:$0xff]   ;;  %v13667_v11 = vld [vmem:[#allocation2 + $0xa78] ss:$36 sps:$4 sm:$0xff]  }
 0x2b1   :  { %8100 = vmatprep.subr.bf16.mxu0 %v13603_v14  ;;  %8428 = vmatprep.subr.bf16.mxu1 %v13606_v15  ;;  %v13670_v14 = vld [vmem:[#allocation2 + $0xa80] ss:$36 sps:$4 sm:$0xff]  }
 0x2b2   :  { %v13675_v15 = vld [vmem:[#allocation2 + $0xac4] ss:$36 sps:$4 sm:$0xff]  }
 0x2b4   :  { %8101 = vmatpush1.bf16.msra.mxu0 %v13601_v16  ;;  %8429 = vmatpush1.bf16.msra.mxu1 %v13604_v18  ;;  %v13678_v16 = vld [vmem:[#allocation2 + $0xacc] ss:$36 sps:$4 sm:$0xff]   ;;  %v13673_v18 = vld [vmem:[#allocation2 + $0xac0] ss:$36 sps:$4 sm:$0xff]  }
 0x2b5   :  { %8102 = vmatprep.subr.bf16.mxu0 %v13609_v19  ;;  %8430 = vmatprep.subr.bf16.mxu1 %v13612_v20  ;;  %v13676_v19 = vld [vmem:[#allocation2 + $0xac8] ss:$36 sps:$4 sm:$0xff]  }
 0x2b6   :  { %v13681_v20 = vld [vmem:[#allocation2 + $0xb0c] ss:$36 sps:$4 sm:$0xff]  }
 0x2b8   :  { %8103 = vmatpush1.bf16.msra.mxu0 %v13607_v23  ;;  %8431 = vmatpush1.bf16.msra.mxu1 %v13610_v24  ;;  %v13684_v23 = vld [vmem:[#allocation2 + $0xb14] ss:$36 sps:$4 sm:$0xff]   ;;  %v13679_v24 = vld [vmem:[#allocation2 + $0xb08] ss:$36 sps:$4 sm:$0xff]  }
 0x2b9   :  { %8104 = vmatprep.subr.bf16.mxu0 %v13615_v28  ;;  %8432 = vmatprep.subr.bf16.mxu1 %v13618_v29  ;;  %v13682_v28 = vld [vmem:[#allocation2 + $0xb10] ss:$36 sps:$4 sm:$0xff]  }
 0x2ba   :  { %v13687_v29 = vld [vmem:[#allocation2 + $0xb54] ss:$36 sps:$4 sm:$0xff]  }
 0x2bc   :  { %8105 = vmatpush1.bf16.msra.mxu0 %v13613_v30  ;;  %8433 = vmatpush1.bf16.msra.mxu1 %v13616_v31  ;;  %v13690_v30 = vld [vmem:[#allocation2 + $0xb5c] ss:$36 sps:$4 sm:$0xff]   ;;  %v13685_v31 = vld [vmem:[#allocation2 + $0xb50] ss:$36 sps:$4 sm:$0xff]  }
 0x2bd   :  { %8106 = vmatprep.subr.bf16.mxu0 %v13621_v32  ;;  %8434 = vmatprep.subr.bf16.mxu1 %v13624_v34  ;;  %v13688_v32 = vld [vmem:[#allocation2 + $0xb58] ss:$36 sps:$4 sm:$0xff]  }
 0x2be   :  { %v13693_v34 = vld [vmem:[#allocation2 + $0xb9c] ss:$36 sps:$4 sm:$0xff]  }
 0x2c0   :  { %8107 = vmatpush1.bf16.msra.mxu0 %v13619_v35  ;;  %8435 = vmatpush1.bf16.msra.mxu1 %v13622_v36  ;;  %v13696_v35 = vld [vmem:[#allocation2 + $0xba4] ss:$36 sps:$4 sm:$0xff]   ;;  %v13691_v36 = vld [vmem:[#allocation2 + $0xb98] ss:$36 sps:$4 sm:$0xff]  }
 0x2c1   :  { %8108 = vmatprep.subr.bf16.mxu0 %v13627_v37  ;;  %8436 = vmatprep.subr.bf16.mxu1 %v13630_v38  ;;  %v13694_v37 = vld [vmem:[#allocation2 + $0xba0] ss:$36 sps:$4 sm:$0xff]  }
 0x2c2   :  { %v13699_v38 = vld [vmem:[#allocation2 + $0xbe4] ss:$36 sps:$4 sm:$0xff]  }
 0x2c4   :  { %8109 = vmatpush1.bf16.msra.mxu0 %v13625_v39  ;;  %8437 = vmatpush1.bf16.msra.mxu1 %v13628_v40  ;;  %v13702_v39 = vld [vmem:[#allocation2 + $0xbec] ss:$36 sps:$4 sm:$0xff]   ;;  %v13697_v40 = vld [vmem:[#allocation2 + $0xbe0] ss:$36 sps:$4 sm:$0xff]  }
 0x2c5   :  { %8110 = vmatprep.subr.bf16.mxu0 %v13633_v43  ;;  %8438 = vmatprep.subr.bf16.mxu1 %v13636_v44  ;;  %v13700_v43 = vld [vmem:[#allocation2 + $0xbe8] ss:$36 sps:$4 sm:$0xff]  }
 0x2c6   :  { %v13705_v44 = vld [vmem:[#allocation2 + $0xc2c] ss:$36 sps:$4 sm:$0xff]  }
 0x2c8   :  { %8111 = vmatpush1.bf16.msra.mxu0 %v13631_v47  ;;  %8439 = vmatpush1.bf16.msra.mxu1 %v13634_v48  ;;  %v13708_v47 = vld [vmem:[#allocation2 + $0xc34] ss:$36 sps:$4 sm:$0xff]   ;;  %v13703_v48 = vld [vmem:[#allocation2 + $0xc28] ss:$36 sps:$4 sm:$0xff]  }
 0x2c9   :  { %8121 = vmatprep.subr.bf16.mxu0 %v13639_v50  ;;  %8449 = vmatprep.subr.bf16.mxu1 %v13642_v51  ;;  %v13706_v50 = vld [vmem:[#allocation2 + $0xc30] ss:$36 sps:$4 sm:$0xff]  }
 0x2ca   :  { %v13711_v51 = vld [vmem:[#allocation2 + $0xc74] ss:$36 sps:$4 sm:$0xff]  }
 0x2cb   :  { %8113 = vmatmul.mubr.bf16.vlgmr.msra.gmra.mrb[4].mxu0 %v14937_v12  ;;  %8441 = vmatmul.mubr.bf16.vlgmr.msra.gmra.mrb[4].mxu1 %v14937_v12 }
 0x2cc   :  { %8122 = vmatpush1.bf16.msra.mxu0 %v13637_v49  ;;  %8450 = vmatpush1.bf16.msra.mxu1 %v13640_v53  ;;  %v13714_v49 = vld [vmem:[#allocation2 + $0xc7c] ss:$36 sps:$4 sm:$0xff]   ;;  %v13709_v53 = vld [vmem:[#allocation2 + $0xc70] ss:$36 sps:$4 sm:$0xff]  }
 0x2cd   :  { %8123 = vmatprep.subr.bf16.mxu0 %v13645_v55  ;;  %8451 = vmatprep.subr.bf16.mxu1 %v13648_v56  ;;  %v13712_v55 = vld [vmem:[#allocation2 + $0xc78] ss:$36 sps:$4 sm:$0xff]  }
 0x2ce   :  { %8153 = vmatprep.mubr.bf16.mxu0 %v14960_v26  ;;  %8481 = vmatprep.mubr.bf16.mxu1 %v14960_v26  ;;  %v13717_v56 = vld [vmem:[#allocation2 + $0xcbc] ss:$36 sps:$4 sm:$0xff]  }
 0x2d0   :  { %8124 = vmatpush1.bf16.msra.mxu0 %v13643_v57  ;;  %8452 = vmatpush1.bf16.msra.mxu1 %v13646_v59  ;;  %v13720_v57 = vld [vmem:[#allocation2 + $0xcc4] ss:$36 sps:$4 sm:$0xff]   ;;  %v13715_v59 = vld [vmem:[#allocation2 + $0xcb8] ss:$36 sps:$4 sm:$0xff]  }
 0x2d1   :  { %8125 = vmatprep.subr.bf16.mxu0 %v13651_v60  ;;  %8453 = vmatprep.subr.bf16.mxu1 %v13654_v61  ;;  %v13718_v60 = vld [vmem:[#allocation2 + $0xcc0] ss:$36 sps:$4 sm:$0xff]  }
 0x2d2   :  { %v13723_v61 = vld [vmem:[#allocation2 + $0xd04] ss:$36 sps:$4 sm:$0xff]  }
 0x2d4   :  { %8126 = vmatpush1.bf16.msra.mxu0 %v13649_v62  ;;  %8454 = vmatpush1.bf16.msra.mxu1 %v13652_v63  ;;  %v13726_v62 = vld [vmem:[#allocation2 + $0xd0c] ss:$36 sps:$4 sm:$0xff]   ;;  %v13721_v63 = vld [vmem:[#allocation2 + $0xd00] ss:$36 sps:$4 sm:$0xff]  }
 0x2d5   :  { %8127 = vmatprep.subr.bf16.mxu0 %v13657_v0  ;;  %8455 = vmatprep.subr.bf16.mxu1 %v13660_v2  ;;  %v13724_v0 = vld [vmem:[#allocation2 + $0xd08] ss:$36 sps:$4 sm:$0xff]  }
 0x2d6   :  { %v13729_v2 = vld [vmem:[#allocation2 + $0xd4c] ss:$36 sps:$4 sm:$0xff]  }
 0x2d8   :  { %8128 = vmatpush1.bf16.msra.mxu0 %v13655_v3  ;;  %8456 = vmatpush1.bf16.msra.mxu1 %v13658_v4  ;;  %v13732_v3 = vld [vmem:[#allocation2 + $0xd54] ss:$36 sps:$4 sm:$0xff]   ;;  %v13727_v4 = vld [vmem:[#allocation2 + $0xd48] ss:$36 sps:$4 sm:$0xff]  }
 0x2d9   :  { %8129 = vmatprep.subr.bf16.mxu0 %v13663_v5  ;;  %8457 = vmatprep.subr.bf16.mxu1 %v13666_v6  ;;  %v13730_v5 = vld [vmem:[#allocation2 + $0xd50] ss:$36 sps:$4 sm:$0xff]  }
 0x2da   :  { %v13735_v6 = vld [vmem:[#allocation2 + $0xd94] ss:$36 sps:$4 sm:$0xff]  }
 0x2dc   :  { %8130 = vmatpush1.bf16.msra.mxu0 %v13661_v7  ;;  %8458 = vmatpush1.bf16.msra.mxu1 %v13664_v8  ;;  %v13738_v7 = vld [vmem:[#allocation2 + $0xd9c] ss:$36 sps:$4 sm:$0xff]   ;;  %v13733_v8 = vld [vmem:[#allocation2 + $0xd90] ss:$36 sps:$4 sm:$0xff]  }
 0x2dd   :  { %8131 = vmatprep.subr.bf16.mxu0 %v13669_v9  ;;  %8459 = vmatprep.subr.bf16.mxu1 %v13672_v10  ;;  %v13736_v9 = vld [vmem:[#allocation2 + $0xd98] ss:$36 sps:$4 sm:$0xff]  }
 0x2de   :  { %v13741_v10 = vld [vmem:[#allocation2 + $0xddc] ss:$36 sps:$4 sm:$0xff]  }
 0x2e0   :  { %8132 = vmatpush1.bf16.msra.mxu0 %v13667_v11  ;;  %8460 = vmatpush1.bf16.msra.mxu1 %v13670_v14  ;;  %v13744_v11 = vld [vmem:[#allocation2 + $0xde4] ss:$36 sps:$4 sm:$0xff]   ;;  %v13739_v14 = vld [vmem:[#allocation2 + $0xdd8] ss:$36 sps:$4 sm:$0xff]  }
 0x2e1   :  { %8133 = vmatprep.subr.bf16.mxu0 %v13675_v15  ;;  %8461 = vmatprep.subr.bf16.mxu1 %v13678_v16  ;;  %v13742_v15 = vld [vmem:[#allocation2 + $0xde0] ss:$36 sps:$4 sm:$0xff]  }
 0x2e2   :  { %v13747_v16 = vld [vmem:[#allocation2 + $0xe24] ss:$36 sps:$4 sm:$0xff]  }
 0x2e4   :  { %8134 = vmatpush1.bf16.msra.mxu0 %v13673_v18  ;;  %8462 = vmatpush1.bf16.msra.mxu1 %v13676_v19  ;;  %v13750_v18 = vld [vmem:[#allocation2 + $0xe2c] ss:$36 sps:$4 sm:$0xff]   ;;  %v13745_v19 = vld [vmem:[#allocation2 + $0xe20] ss:$36 sps:$4 sm:$0xff]  }
 0x2e5   :  { %8135 = vmatprep.subr.bf16.mxu0 %v13681_v20  ;;  %8463 = vmatprep.subr.bf16.mxu1 %v13684_v23  ;;  %v13748_v20 = vld [vmem:[#allocation2 + $0xe28] ss:$36 sps:$4 sm:$0xff]  }
 0x2e6   :  { %v13753_v23 = vld [vmem:[#allocation2 + $0xe6c] ss:$36 sps:$4 sm:$0xff]  }
 0x2e8   :  { %8136 = vmatpush1.bf16.msra.mxu0 %v13679_v24  ;;  %8464 = vmatpush1.bf16.msra.mxu1 %v13682_v28  ;;  %v13756_v24 = vld [vmem:[#allocation2 + $0xe74] ss:$36 sps:$4 sm:$0xff]   ;;  %v13751_v28 = vld [vmem:[#allocation2 + $0xe68] ss:$36 sps:$4 sm:$0xff]  }
 0x2e9   :  { %8137 = vmatprep.subr.bf16.mxu0 %v13687_v29  ;;  %8465 = vmatprep.subr.bf16.mxu1 %v13690_v30  ;;  %v13754_v29 = vld [vmem:[#allocation2 + $0xe70] ss:$36 sps:$4 sm:$0xff]  }
 0x2ea   :  { %v13759_v30 = vld [vmem:[#allocation2 + $0xeb4] ss:$36 sps:$4 sm:$0xff]  }
 0x2ec   :  { %8138 = vmatpush1.bf16.msra.mxu0 %v13685_v31  ;;  %8466 = vmatpush1.bf16.msra.mxu1 %v13688_v32  ;;  %v13762_v31 = vld [vmem:[#allocation2 + $0xebc] ss:$36 sps:$4 sm:$0xff]   ;;  %v13757_v32 = vld [vmem:[#allocation2 + $0xeb0] ss:$36 sps:$4 sm:$0xff]  }
 0x2ed   :  { %8139 = vmatprep.subr.bf16.mxu0 %v13693_v34  ;;  %8467 = vmatprep.subr.bf16.mxu1 %v13696_v35  ;;  %v13760_v34 = vld [vmem:[#allocation2 + $0xeb8] ss:$36 sps:$4 sm:$0xff]  }
 0x2ee   :  { %v13765_v35 = vld [vmem:[#allocation2 + $0xefc] ss:$36 sps:$4 sm:$0xff]  }
 0x2f0   :  { %8140 = vmatpush1.bf16.msra.mxu0 %v13691_v36  ;;  %8468 = vmatpush1.bf16.msra.mxu1 %v13694_v37  ;;  %v13768_v36 = vld [vmem:[#allocation2 + $0xf04] ss:$36 sps:$4 sm:$0xff]   ;;  %v13763_v37 = vld [vmem:[#allocation2 + $0xef8] ss:$36 sps:$4 sm:$0xff]  }
 0x2f1   :  { %8141 = vmatprep.subr.bf16.mxu0 %v13699_v38  ;;  %8469 = vmatprep.subr.bf16.mxu1 %v13702_v39  ;;  %v13766_v38 = vld [vmem:[#allocation2 + $0xf00] ss:$36 sps:$4 sm:$0xff]  }
 0x2f2   :  { %v13771_v39 = vld [vmem:[#allocation2 + $0xf44] ss:$36 sps:$4 sm:$0xff]  }
 0x2f4   :  { %8142 = vmatpush1.bf16.msra.mxu0 %v13697_v40  ;;  %8470 = vmatpush1.bf16.msra.mxu1 %v13700_v43  ;;  %v13774_v40 = vld [vmem:[#allocation2 + $0xf4c] ss:$36 sps:$4 sm:$0xff]  }
 0x2f5   :  { %8143 = vmatprep.subr.bf16.mxu0 %v13705_v44  ;;  %8471 = vmatprep.subr.bf16.mxu1 %v13708_v47 }
 0x2f8   :  { %8144 = vmatpush1.bf16.msra.mxu0 %v13703_v48  ;;  %8472 = vmatpush1.bf16.msra.mxu1 %v13706_v50 }
 0x2f9   :  { %8145 = vmatprep.subr.bf16.mxu0 %v13711_v51  ;;  %8473 = vmatprep.subr.bf16.mxu1 %v13714_v49  ;;  %v13769_v49 = vld [vmem:[#allocation2 + $0xf40] ss:$36 sps:$4 sm:$0xff]  }
 0x2fc   :  { %8146 = vmatpush1.bf16.msra.mxu0 %v13709_v53  ;;  %8474 = vmatpush1.bf16.msra.mxu1 %v13712_v55  ;;  %v13772_v53 = vld [vmem:[#allocation2 + $0xf48] ss:$36 sps:$4 sm:$0xff]  }
 0x2fd   :  { %8147 = vmatprep.subr.bf16.mxu0 %v13717_v56  ;;  %8475 = vmatprep.subr.bf16.mxu1 %v13720_v57  ;;  %v13777_v57 = vld [vmem:[#allocation2 + $0xf8c] ss:$36 sps:$4 sm:$0xff]  }
 0x300   :  { %8148 = vmatpush1.bf16.msra.mxu0 %v13715_v59  ;;  %8476 = vmatpush1.bf16.msra.mxu1 %v13718_v60  ;;  %v13780_v59 = vld [vmem:[#allocation2 + $0xf94] ss:$36 sps:$4 sm:$0xff]   ;;  %v13775_v60 = vld [vmem:[#allocation2 + $0xf88] ss:$36 sps:$4 sm:$0xff]  }
 0x301   :  { %8149 = vmatprep.subr.bf16.mxu0 %v13723_v61  ;;  %8477 = vmatprep.subr.bf16.mxu1 %v13726_v62  ;;  %v13778_v61 = vld [vmem:[#allocation2 + $0xf90] ss:$36 sps:$4 sm:$0xff]  }
 0x302   :  { %v13783_v62 = vld [vmem:[#allocation2 + $0xfd4] ss:$36 sps:$4 sm:$0xff]  }
 0x304   :  { %8150 = vmatpush1.bf16.msra.mxu0 %v13721_v63  ;;  %8478 = vmatpush1.bf16.msra.mxu1 %v13724_v0  ;;  %v13786_v63 = vld [vmem:[#allocation2 + $0xfdc] ss:$36 sps:$4 sm:$0xff]   ;;  %v13781_v0 = vld [vmem:[#allocation2 + $0xfd0] ss:$36 sps:$4 sm:$0xff]  }
 0x305   :  { %8151 = vmatprep.subr.bf16.mxu0 %v13729_v2  ;;  %8479 = vmatprep.subr.bf16.mxu1 %v13732_v3  ;;  %v13784_v2 = vld [vmem:[#allocation2 + $0xfd8] ss:$36 sps:$4 sm:$0xff]  }
 0x306   :  { %v13789_v3 = vld [vmem:[#allocation2 + $0x101c] ss:$36 sps:$4 sm:$0xff]  }
 0x308   :  { %8152 = vmatpush1.bf16.msra.mxu0 %v13727_v4  ;;  %8480 = vmatpush1.bf16.msra.mxu1 %v13730_v5  ;;  %v13792_v4 = vld [vmem:[#allocation2 + $0x1024] ss:$36 sps:$4 sm:$0xff]   ;;  %v13787_v5 = vld [vmem:[#allocation2 + $0x1018] ss:$36 sps:$4 sm:$0xff]  }
 0x309   :  { %8162 = vmatprep.subr.bf16.mxu0 %v13735_v6  ;;  %8490 = vmatprep.subr.bf16.mxu1 %v13738_v7  ;;  %v13790_v6 = vld [vmem:[#allocation2 + $0x1020] ss:$36 sps:$4 sm:$0xff]  }
 0x30a   :  { %v13795_v7 = vld [vmem:[#allocation2 + $0x1064] ss:$36 sps:$4 sm:$0xff]  }
 0x30b   :  { %8154 = vmatmul.mubr.bf16.vlgmr.msra.gmra.mrb[4].mxu0 %v14954_v25  ;;  %8482 = vmatmul.mubr.bf16.vlgmr.msra.gmra.mrb[4].mxu1 %v14954_v25 }
 0x30c   :  { %8163 = vmatpush1.bf16.msra.mxu0 %v13733_v8  ;;  %8491 = vmatpush1.bf16.msra.mxu1 %v13736_v9  ;;  %v13798_v8 = vld [vmem:[#allocation2 + $0x106c] ss:$36 sps:$4 sm:$0xff]   ;;  %v13793_v9 = vld [vmem:[#allocation2 + $0x1060] ss:$36 sps:$4 sm:$0xff]  }
 0x30d   :  { %8164 = vmatprep.subr.bf16.mxu0 %v13741_v10  ;;  %8492 = vmatprep.subr.bf16.mxu1 %v13744_v11  ;;  %v13796_v10 = vld [vmem:[#allocation2 + $0x1068] ss:$36 sps:$4 sm:$0xff]  }
 0x30e   :  { %8194 = vmatprep.mubr.bf16.mxu0 %v14971_v22  ;;  %8522 = vmatprep.mubr.bf16.mxu1 %v14971_v22  ;;  %v13801_v11 = vld [vmem:[#allocation2 + $0x10ac] ss:$36 sps:$4 sm:$0xff]  }
 0x310   :  { %8165 = vmatpush1.bf16.msra.mxu0 %v13739_v14  ;;  %8493 = vmatpush1.bf16.msra.mxu1 %v13742_v15  ;;  %v13804_v14 = vld [vmem:[#allocation2 + $0x10b4] ss:$36 sps:$4 sm:$0xff]   ;;  %v13799_v15 = vld [vmem:[#allocation2 + $0x10a8] ss:$36 sps:$4 sm:$0xff]  }
 0x311   :  { %8166 = vmatprep.subr.bf16.mxu0 %v13747_v16  ;;  %8494 = vmatprep.subr.bf16.mxu1 %v13750_v18  ;;  %v13802_v16 = vld [vmem:[#allocation2 + $0x10b0] ss:$36 sps:$4 sm:$0xff]  }
 0x312   :  { %v13807_v18 = vld [vmem:[#allocation2 + $0x10f4] ss:$36 sps:$4 sm:$0xff]  }
 0x314   :  { %8167 = vmatpush1.bf16.msra.mxu0 %v13745_v19  ;;  %8495 = vmatpush1.bf16.msra.mxu1 %v13748_v20  ;;  %v13810_v19 = vld [vmem:[#allocation2 + $0x10fc] ss:$36 sps:$4 sm:$0xff]   ;;  %v13805_v20 = vld [vmem:[#allocation2 + $0x10f0] ss:$36 sps:$4 sm:$0xff]  }
 0x315   :  { %8168 = vmatprep.subr.bf16.mxu0 %v13753_v23  ;;  %8496 = vmatprep.subr.bf16.mxu1 %v13756_v24  ;;  %v13808_v23 = vld [vmem:[#allocation2 + $0x10f8] ss:$36 sps:$4 sm:$0xff]  }
 0x316   :  { %v13813_v24 = vld [vmem:[#allocation2 + $0x113c] ss:$36 sps:$4 sm:$0xff]  }
 0x318   :  { %8169 = vmatpush1.bf16.msra.mxu0 %v13751_v28  ;;  %8497 = vmatpush1.bf16.msra.mxu1 %v13754_v29  ;;  %v13816_v28 = vld [vmem:[#allocation2 + $0x1144] ss:$36 sps:$4 sm:$0xff]   ;;  %v13811_v29 = vld [vmem:[#allocation2 + $0x1138] ss:$36 sps:$4 sm:$0xff]  }
 0x319   :  { %8170 = vmatprep.subr.bf16.mxu0 %v13759_v30  ;;  %8498 = vmatprep.subr.bf16.mxu1 %v13762_v31  ;;  %v13814_v30 = vld [vmem:[#allocation2 + $0x1140] ss:$36 sps:$4 sm:$0xff]  }
 0x31a   :  { %v13819_v31 = vld [vmem:[#allocation2 + $0x1184] ss:$36 sps:$4 sm:$0xff]  }
 0x31c   :  { %8171 = vmatpush1.bf16.msra.mxu0 %v13757_v32  ;;  %8499 = vmatpush1.bf16.msra.mxu1 %v13760_v34  ;;  %v13822_v32 = vld [vmem:[#allocation2 + $0x118c] ss:$36 sps:$4 sm:$0xff]   ;;  %v13817_v34 = vld [vmem:[#allocation2 + $0x1180] ss:$36 sps:$4 sm:$0xff]  }
 0x31d   :  { %8172 = vmatprep.subr.bf16.mxu0 %v13765_v35  ;;  %8500 = vmatprep.subr.bf16.mxu1 %v13768_v36  ;;  %v13820_v35 = vld [vmem:[#allocation2 + $0x1188] ss:$36 sps:$4 sm:$0xff]  }
 0x31e   :  { %v15053_v43 = vpop.f32.mrb[0].mxu0  ;;  %v15055_v44 = vpop.f32.mrb[0].mxu1  ;;  %v13825_v36 = vld [vmem:[#allocation2 + $0x11cc] ss:$36 sps:$4 sm:$0xff]  }
 0x31f   :  { %v15057_v47 = vpop.f32.mrb[1].mxu0  ;;  %v15059_v48 = vpop.f32.mrb[1].mxu1 }
 0x320   :  { %v7708_v50 = vpop.f32.mrb[2].mxu0  ;;  %v8036_v51 = vpop.f32.mrb[2].mxu1  ;;  %8173 = vmatpush1.bf16.msra.mxu0 %v13763_v37  ;;  %8501 = vmatpush1.bf16.msra.mxu1 %v13766_v38  ;;  %v13828_v37 = vld [vmem:[#allocation2 + $0x11d4] ss:$36 sps:$4 sm:$0xff]   ;;  %v13823_v38 = vld [vmem:[#allocation2 + $0x11c8] ss:$36 sps:$4 sm:$0xff]  }
 0x321   :  { %v7709_v55 = vpop.f32.mrb[3].mxu0  ;;  %v8037_v56 = vpop.f32.mrb[3].mxu1  ;;  %8174 = vmatprep.subr.bf16.mxu0 %v13771_v39  ;;  %8502 = vmatprep.subr.bf16.mxu1 %v13774_v40  ;;  %v13826_v39 = vld [vmem:[#allocation2 + $0x11d0] ss:$36 sps:$4 sm:$0xff]   ;;  %v13834_v50 = vld [vmem:[#allocation2 + $0x121c] ss:$36 sps:$4 sm:$0xff]  }
 0x322   :  { %v13831_v40 = vld [vmem:[#allocation2 + $0x1214] ss:$36 sps:$4 sm:$0xff]   ;;  %v13840_v55 = vld [vmem:[#allocation2 + $0x1264] ss:$36 sps:$4 sm:$0xff]  }
 0x323   :  { %v13829_v51 = vld [vmem:[#allocation2 + $0x1210] ss:$36 sps:$4 sm:$0xff]   ;;  %v13835_v56 = vld [vmem:[#allocation2 + $0x1258] ss:$36 sps:$4 sm:$0xff]  }
 0x324   :  { %8175 = vmatpush1.bf16.msra.mxu0 %v13769_v49  ;;  %8503 = vmatpush1.bf16.msra.mxu1 %v13772_v53  ;;  %v13832_v49 = vld [vmem:[#allocation2 + $0x1218] ss:$36 sps:$4 sm:$0xff]  }
 0x325   :  { %8176 = vmatprep.subr.bf16.mxu0 %v13777_v57  ;;  %8504 = vmatprep.subr.bf16.mxu1 %v13780_v59  ;;  %v13837_v53 = vld [vmem:[#allocation2 + $0x125c] ss:$36 sps:$4 sm:$0xff]   ;;  %v13843_v59 = vld [vmem:[#allocation2 + $0x12a4] ss:$36 sps:$4 sm:$0xff]  }
 0x326   :  { %v13838_v57 = vld [vmem:[#allocation2 + $0x1260] ss:$36 sps:$4 sm:$0xff]  }
 0x328   :  { %8177 = vmatpush1.bf16.msra.mxu0 %v13775_v60  ;;  %8505 = vmatpush1.bf16.msra.mxu1 %v13778_v61  ;;  %v13846_v60 = vld [vmem:[#allocation2 + $0x12ac] ss:$36 sps:$4 sm:$0xff]   ;;  %v13841_v61 = vld [vmem:[#allocation2 + $0x12a0] ss:$36 sps:$4 sm:$0xff]  }
 0x329   :  { %8178 = vmatprep.subr.bf16.mxu0 %v13783_v62  ;;  %8506 = vmatprep.subr.bf16.mxu1 %v13786_v63  ;;  %v13844_v62 = vld [vmem:[#allocation2 + $0x12a8] ss:$36 sps:$4 sm:$0xff]  }
 0x32a   :  { %v13849_v63 = vld [vmem:[#allocation2 + $0x12ec] ss:$36 sps:$4 sm:$0xff]  }
 0x32c   :  { %8179 = vmatpush1.bf16.msra.mxu0 %v13781_v0  ;;  %8507 = vmatpush1.bf16.msra.mxu1 %v13784_v2  ;;  %v13852_v0 = vld [vmem:[#allocation2 + $0x12f4] ss:$36 sps:$4 sm:$0xff]   ;;  %v13847_v2 = vld [vmem:[#allocation2 + $0x12e8] ss:$36 sps:$4 sm:$0xff]  }
 0x32d   :  { %8180 = vmatprep.subr.bf16.mxu0 %v13789_v3  ;;  %8508 = vmatprep.subr.bf16.mxu1 %v13792_v4  ;;  %v13850_v3 = vld [vmem:[#allocation2 + $0x12f0] ss:$36 sps:$4 sm:$0xff]  }
 0x32e   :  { %v13855_v4 = vld [vmem:[#allocation2 + $0x1334] ss:$36 sps:$4 sm:$0xff]  }
 0x330   :  { %8181 = vmatpush1.bf16.msra.mxu0 %v13787_v5  ;;  %8509 = vmatpush1.bf16.msra.mxu1 %v13790_v6  ;;  %v13858_v5 = vld [vmem:[#allocation2 + $0x133c] ss:$36 sps:$4 sm:$0xff]   ;;  %v13853_v6 = vld [vmem:[#allocation2 + $0x1330] ss:$36 sps:$4 sm:$0xff]  }
 0x331   :  { %8182 = vmatprep.subr.bf16.mxu0 %v13795_v7  ;;  %8510 = vmatprep.subr.bf16.mxu1 %v13798_v8  ;;  %v13856_v7 = vld [vmem:[#allocation2 + $0x1338] ss:$36 sps:$4 sm:$0xff]  }
 0x332   :  { %v13861_v8 = vld [vmem:[#allocation2 + $0x137c] ss:$36 sps:$4 sm:$0xff]  }
 0x334   :  { %8183 = vmatpush1.bf16.msra.mxu0 %v13793_v9  ;;  %8511 = vmatpush1.bf16.msra.mxu1 %v13796_v10  ;;  %v13864_v9 = vld [vmem:[#allocation2 + $0x1384] ss:$36 sps:$4 sm:$0xff]   ;;  %v13859_v10 = vld [vmem:[#allocation2 + $0x1378] ss:$36 sps:$4 sm:$0xff]  }
 0x335   :  { %8184 = vmatprep.subr.bf16.mxu0 %v13801_v11  ;;  %8512 = vmatprep.subr.bf16.mxu1 %v13804_v14  ;;  %v13862_v11 = vld [vmem:[#allocation2 + $0x1380] ss:$36 sps:$4 sm:$0xff]  }
 0x336   :  { %v13867_v14 = vld [vmem:[#allocation2 + $0x13c4] ss:$36 sps:$4 sm:$0xff]  }
 0x338   :  { %8185 = vmatpush1.bf16.msra.mxu0 %v13799_v15  ;;  %8513 = vmatpush1.bf16.msra.mxu1 %v13802_v16  ;;  %v13870_v15 = vld [vmem:[#allocation2 + $0x13cc] ss:$36 sps:$4 sm:$0xff]   ;;  %v13865_v16 = vld [vmem:[#allocation2 + $0x13c0] ss:$36 sps:$4 sm:$0xff]  }
 0x339   :  { %8186 = vmatprep.subr.bf16.mxu0 %v13807_v18  ;;  %8514 = vmatprep.subr.bf16.mxu1 %v13810_v19  ;;  %v13868_v18 = vld [vmem:[#allocation2 + $0x13c8] ss:$36 sps:$4 sm:$0xff]  }
 0x33a   :  { %v13873_v19 = vld [vmem:[#allocation2 + $0x140c] ss:$36 sps:$4 sm:$0xff]  }
 0x33c   :  { %8187 = vmatpush1.bf16.msra.mxu0 %v13805_v20  ;;  %8515 = vmatpush1.bf16.msra.mxu1 %v13808_v23  ;;  %v13876_v20 = vld [vmem:[#allocation2 + $0x1414] ss:$36 sps:$4 sm:$0xff]   ;;  %v13871_v23 = vld [vmem:[#allocation2 + $0x1408] ss:$36 sps:$4 sm:$0xff]  }
 0x33d   :  { %8188 = vmatprep.subr.bf16.mxu0 %v13813_v24  ;;  %8516 = vmatprep.subr.bf16.mxu1 %v13816_v28  ;;  %v13874_v24 = vld [vmem:[#allocation2 + $0x1410] ss:$36 sps:$4 sm:$0xff]  }
 0x33e   :  { %v13879_v28 = vld [vmem:[#allocation2 + $0x1454] ss:$36 sps:$4 sm:$0xff]  }
 0x340   :  { %8189 = vmatpush1.bf16.msra.mxu0 %v13811_v29  ;;  %8517 = vmatpush1.bf16.msra.mxu1 %v13814_v30  ;;  %v13882_v29 = vld [vmem:[#allocation2 + $0x145c] ss:$36 sps:$4 sm:$0xff]   ;;  %v13877_v30 = vld [vmem:[#allocation2 + $0x1450] ss:$36 sps:$4 sm:$0xff]  }
 0x341   :  { %8190 = vmatprep.subr.bf16.mxu0 %v13819_v31  ;;  %8518 = vmatprep.subr.bf16.mxu1 %v13822_v32  ;;  %v13880_v31 = vld [vmem:[#allocation2 + $0x1458] ss:$36 sps:$4 sm:$0xff]  }
 0x342   :  { %v13885_v32 = vld [vmem:[#allocation2 + $0x149c] ss:$36 sps:$4 sm:$0xff]  }
 0x344   :  { %8191 = vmatpush1.bf16.msra.mxu0 %v13817_v34  ;;  %8519 = vmatpush1.bf16.msra.mxu1 %v13820_v35  ;;  %v13888_v34 = vld [vmem:[#allocation2 + $0x14a4] ss:$36 sps:$4 sm:$0xff]   ;;  %v13883_v35 = vld [vmem:[#allocation2 + $0x1498] ss:$36 sps:$4 sm:$0xff]  }
 0x345   :  { %8192 = vmatprep.subr.bf16.mxu0 %v13825_v36  ;;  %8520 = vmatprep.subr.bf16.mxu1 %v13828_v37  ;;  %v13886_v36 = vld [vmem:[#allocation2 + $0x14a0] ss:$36 sps:$4 sm:$0xff]  }
 0x346   :  { %v13891_v37 = vld [vmem:[#allocation2 + $0x14e4] ss:$36 sps:$4 sm:$0xff]  }
 0x348   :  { %8193 = vmatpush1.bf16.msra.mxu0 %v13823_v38  ;;  %8521 = vmatpush1.bf16.msra.mxu1 %v13826_v39  ;;  %v13894_v38 = vld [vmem:[#allocation2 + $0x14ec] ss:$36 sps:$4 sm:$0xff]   ;;  %v13889_v39 = vld [vmem:[#allocation2 + $0x14e0] ss:$36 sps:$4 sm:$0xff]  }
 0x349   :  { %8203 = vmatprep.subr.bf16.mxu0 %v13831_v40  ;;  %8531 = vmatprep.subr.bf16.mxu1 %v13834_v50  ;;  %v13892_v40 = vld [vmem:[#allocation2 + $0x14e8] ss:$36 sps:$4 sm:$0xff]  }
 0x34a   :  { %v13897_v50 = vld [vmem:[#allocation2 + $0x152c] ss:$36 sps:$4 sm:$0xff]  }
 0x34b   :  { %8195 = vmatmul.mubr.bf16.vlgmr.msra.gmra.mrb[4].mxu0 %v14967_v33  ;;  %8523 = vmatmul.mubr.bf16.vlgmr.msra.gmra.mrb[4].mxu1 %v14967_v33 }
 0x34c   :  { %8204 = vmatpush1.bf16.msra.mxu0 %v13829_v51  ;;  %8532 = vmatpush1.bf16.msra.mxu1 %v13832_v49  ;;  %v13900_v51 = vld [vmem:[#allocation2 + $0x1534] ss:$36 sps:$4 sm:$0xff]   ;;  %v13895_v49 = vld [vmem:[#allocation2 + $0x1528] ss:$36 sps:$4 sm:$0xff]  }
 0x34d   :  { %8205 = vmatprep.subr.bf16.mxu0 %v13837_v53  ;;  %8533 = vmatprep.subr.bf16.mxu1 %v13840_v55  ;;  %v13898_v53 = vld [vmem:[#allocation2 + $0x1530] ss:$36 sps:$4 sm:$0xff]  }
 0x34e   :  { %8235 = vmatprep.mubr.bf16.mxu0 %v14988_v52  ;;  %8563 = vmatprep.mubr.bf16.mxu1 %v14988_v52  ;;  %v13903_v55 = vld [vmem:[#allocation2 + $0x1574] ss:$36 sps:$4 sm:$0xff]  }
 0x350   :  { %8206 = vmatpush1.bf16.msra.mxu0 %v13835_v56  ;;  %8534 = vmatpush1.bf16.msra.mxu1 %v13838_v57  ;;  %v13906_v56 = vld [vmem:[#allocation2 + $0x157c] ss:$36 sps:$4 sm:$0xff]   ;;  %v13901_v57 = vld [vmem:[#allocation2 + $0x1570] ss:$36 sps:$4 sm:$0xff]  }
 0x351   :  { %8207 = vmatprep.subr.bf16.mxu0 %v13843_v59  ;;  %8535 = vmatprep.subr.bf16.mxu1 %v13846_v60  ;;  %v13904_v59 = vld [vmem:[#allocation2 + $0x1578] ss:$36 sps:$4 sm:$0xff]  }
 0x352   :  { %v13909_v60 = vld [vmem:[#allocation2 + $0x15bc] ss:$36 sps:$4 sm:$0xff]  }
 0x354   :  { %8208 = vmatpush1.bf16.msra.mxu0 %v13841_v61  ;;  %8536 = vmatpush1.bf16.msra.mxu1 %v13844_v62  ;;  %v13912_v61 = vld [vmem:[#allocation2 + $0x15c4] ss:$36 sps:$4 sm:$0xff]   ;;  %v13907_v62 = vld [vmem:[#allocation2 + $0x15b8] ss:$36 sps:$4 sm:$0xff]  }
 0x355   :  { %8209 = vmatprep.subr.bf16.mxu0 %v13849_v63  ;;  %8537 = vmatprep.subr.bf16.mxu1 %v13852_v0  ;;  %v13910_v63 = vld [vmem:[#allocation2 + $0x15c0] ss:$36 sps:$4 sm:$0xff]  }
 0x356   :  { %v13915_v0 = vld [vmem:[#allocation2 + $0x1604] ss:$36 sps:$4 sm:$0xff]  }
 0x358   :  { %8210 = vmatpush1.bf16.msra.mxu0 %v13847_v2  ;;  %8538 = vmatpush1.bf16.msra.mxu1 %v13850_v3  ;;  %v13918_v2 = vld [vmem:[#allocation2 + $0x160c] ss:$36 sps:$4 sm:$0xff]   ;;  %v13913_v3 = vld [vmem:[#allocation2 + $0x1600] ss:$36 sps:$4 sm:$0xff]  }
 0x359   :  { %8211 = vmatprep.subr.bf16.mxu0 %v13855_v4  ;;  %8539 = vmatprep.subr.bf16.mxu1 %v13858_v5  ;;  %v13916_v4 = vld [vmem:[#allocation2 + $0x1608] ss:$36 sps:$4 sm:$0xff]  }
 0x35a   :  { %v13921_v5 = vld [vmem:[#allocation2 + $0x164c] ss:$36 sps:$4 sm:$0xff]  }
 0x35c   :  { %8212 = vmatpush1.bf16.msra.mxu0 %v13853_v6  ;;  %8540 = vmatpush1.bf16.msra.mxu1 %v13856_v7  ;;  %v13924_v6 = vld [vmem:[#allocation2 + $0x1654] ss:$36 sps:$4 sm:$0xff]   ;;  %v13919_v7 = vld [vmem:[#allocation2 + $0x1648] ss:$36 sps:$4 sm:$0xff]  }
 0x35d   :  { %8213 = vmatprep.subr.bf16.mxu0 %v13861_v8  ;;  %8541 = vmatprep.subr.bf16.mxu1 %v13864_v9  ;;  %v13922_v8 = vld [vmem:[#allocation2 + $0x1650] ss:$36 sps:$4 sm:$0xff]  }
 0x35e   :  { %v13927_v9 = vld [vmem:[#allocation2 + $0x1694] ss:$36 sps:$4 sm:$0xff]  }
 0x360   :  { %8214 = vmatpush1.bf16.msra.mxu0 %v13859_v10  ;;  %8542 = vmatpush1.bf16.msra.mxu1 %v13862_v11  ;;  %v13930_v10 = vld [vmem:[#allocation2 + $0x169c] ss:$36 sps:$4 sm:$0xff]   ;;  %v13925_v11 = vld [vmem:[#allocation2 + $0x1690] ss:$36 sps:$4 sm:$0xff]  }
 0x361   :  { %8215 = vmatprep.subr.bf16.mxu0 %v13867_v14  ;;  %8543 = vmatprep.subr.bf16.mxu1 %v13870_v15  ;;  %v13928_v14 = vld [vmem:[#allocation2 + $0x1698] ss:$36 sps:$4 sm:$0xff]  }
 0x362   :  { %v13933_v15 = vld [vmem:[#allocation2 + $0x16dc] ss:$36 sps:$4 sm:$0xff]  }
 0x364   :  { %8216 = vmatpush1.bf16.msra.mxu0 %v13865_v16  ;;  %8544 = vmatpush1.bf16.msra.mxu1 %v13868_v18  ;;  %v13936_v16 = vld [vmem:[#allocation2 + $0x16e4] ss:$36 sps:$4 sm:$0xff]   ;;  %v13931_v18 = vld [vmem:[#allocation2 + $0x16d8] ss:$36 sps:$4 sm:$0xff]  }
 0x365   :  { %8217 = vmatprep.subr.bf16.mxu0 %v13873_v19  ;;  %8545 = vmatprep.subr.bf16.mxu1 %v13876_v20  ;;  %v13934_v19 = vld [vmem:[#allocation2 + $0x16e0] ss:$36 sps:$4 sm:$0xff]  }
 0x366   :  { %v13939_v20 = vld [vmem:[#allocation2 + $0x1724] ss:$36 sps:$4 sm:$0xff]  }
 0x368   :  { %8218 = vmatpush1.bf16.msra.mxu0 %v13871_v23  ;;  %8546 = vmatpush1.bf16.msra.mxu1 %v13874_v24  ;;  %v13942_v23 = vld [vmem:[#allocation2 + $0x172c] ss:$36 sps:$4 sm:$0xff]   ;;  %v13937_v24 = vld [vmem:[#allocation2 + $0x1720] ss:$36 sps:$4 sm:$0xff]  }
 0x369   :  { %8219 = vmatprep.subr.bf16.mxu0 %v13879_v28  ;;  %8547 = vmatprep.subr.bf16.mxu1 %v13882_v29  ;;  %v13940_v28 = vld [vmem:[#allocation2 + $0x1728] ss:$36 sps:$4 sm:$0xff]  }
 0x36a   :  { %v13945_v29 = vld [vmem:[#allocation2 + $0x176c] ss:$36 sps:$4 sm:$0xff]  }
 0x36c   :  { %8220 = vmatpush1.bf16.msra.mxu0 %v13877_v30  ;;  %8548 = vmatpush1.bf16.msra.mxu1 %v13880_v31  ;;  %v13948_v30 = vld [vmem:[#allocation2 + $0x1774] ss:$36 sps:$4 sm:$0xff]   ;;  %v13943_v31 = vld [vmem:[#allocation2 + $0x1768] ss:$36 sps:$4 sm:$0xff]  }
 0x36d   :  { %8221 = vmatprep.subr.bf16.mxu0 %v13885_v32  ;;  %8549 = vmatprep.subr.bf16.mxu1 %v13888_v34  ;;  %v13946_v32 = vld [vmem:[#allocation2 + $0x1770] ss:$36 sps:$4 sm:$0xff]  }
 0x36e   :  { %v13951_v34 = vld [vmem:[#allocation2 + $0x17b4] ss:$36 sps:$4 sm:$0xff]  }
 0x370   :  { %8222 = vmatpush1.bf16.msra.mxu0 %v13883_v35  ;;  %8550 = vmatpush1.bf16.msra.mxu1 %v13886_v36  ;;  %v13954_v35 = vld [vmem:[#allocation2 + $0x17bc] ss:$36 sps:$4 sm:$0xff]   ;;  %v13949_v36 = vld [vmem:[#allocation2 + $0x17b0] ss:$36 sps:$4 sm:$0xff]  }
 0x371   :  { %8223 = vmatprep.subr.bf16.mxu0 %v13891_v37  ;;  %8551 = vmatprep.subr.bf16.mxu1 %v13894_v38  ;;  %v13952_v37 = vld [vmem:[#allocation2 + $0x17b8] ss:$36 sps:$4 sm:$0xff]  }
 0x372   :  { %v13957_v38 = vld [vmem:[#allocation2 + $0x17fc] ss:$36 sps:$4 sm:$0xff]  }
 0x374   :  { %8224 = vmatpush1.bf16.msra.mxu0 %v13889_v39  ;;  %8552 = vmatpush1.bf16.msra.mxu1 %v13892_v40  ;;  %v13960_v39 = vld [vmem:[#allocation2 + $0x1804] ss:$36 sps:$4 sm:$0xff]   ;;  %v13955_v40 = vld [vmem:[#allocation2 + $0x17f8] ss:$36 sps:$4 sm:$0xff]  }
 0x375   :  { %8225 = vmatprep.subr.bf16.mxu0 %v13897_v50  ;;  %8553 = vmatprep.subr.bf16.mxu1 %v13900_v51  ;;  %v13958_v50 = vld [vmem:[#allocation2 + $0x1800] ss:$36 sps:$4 sm:$0xff]  }
 0x376   :  { %v13963_v51 = vld [vmem:[#allocation2 + $0x1844] ss:$36 sps:$4 sm:$0xff]  }
 0x378   :  { %8226 = vmatpush1.bf16.msra.mxu0 %v13895_v49  ;;  %8554 = vmatpush1.bf16.msra.mxu1 %v13898_v53  ;;  %v13966_v49 = vld [vmem:[#allocation2 + $0x184c] ss:$36 sps:$4 sm:$0xff]   ;;  %v13961_v53 = vld [vmem:[#allocation2 + $0x1840] ss:$36 sps:$4 sm:$0xff]  }
 0x379   :  { %8227 = vmatprep.subr.bf16.mxu0 %v13903_v55  ;;  %8555 = vmatprep.subr.bf16.mxu1 %v13906_v56  ;;  %v13964_v55 = vld [vmem:[#allocation2 + $0x1848] ss:$36 sps:$4 sm:$0xff]  }
 0x37a   :  { %v13969_v56 = vld [vmem:[#allocation2 + $0x188c] ss:$36 sps:$4 sm:$0xff]  }
 0x37c   :  { %8228 = vmatpush1.bf16.msra.mxu0 %v13901_v57  ;;  %8556 = vmatpush1.bf16.msra.mxu1 %v13904_v59  ;;  %v13972_v57 = vld [vmem:[#allocation2 + $0x1894] ss:$36 sps:$4 sm:$0xff]   ;;  %v13967_v59 = vld [vmem:[#allocation2 + $0x1888] ss:$36 sps:$4 sm:$0xff]  }
 0x37d   :  { %8229 = vmatprep.subr.bf16.mxu0 %v13909_v60  ;;  %8557 = vmatprep.subr.bf16.mxu1 %v13912_v61  ;;  %v13970_v60 = vld [vmem:[#allocation2 + $0x1890] ss:$36 sps:$4 sm:$0xff]  }
 0x37e   :  { %v13975_v61 = vld [vmem:[#allocation2 + $0x18d4] ss:$36 sps:$4 sm:$0xff]  }
 0x380   :  { %8230 = vmatpush1.bf16.msra.mxu0 %v13907_v62  ;;  %8558 = vmatpush1.bf16.msra.mxu1 %v13910_v63  ;;  %v13978_v62 = vld [vmem:[#allocation2 + $0x18dc] ss:$36 sps:$4 sm:$0xff]   ;;  %v13973_v63 = vld [vmem:[#allocation2 + $0x18d0] ss:$36 sps:$4 sm:$0xff]  }
 0x381   :  { %8231 = vmatprep.subr.bf16.mxu0 %v13915_v0  ;;  %8559 = vmatprep.subr.bf16.mxu1 %v13918_v2  ;;  %v13976_v0 = vld [vmem:[#allocation2 + $0x18d8] ss:$36 sps:$4 sm:$0xff]  }
 0x382   :  { %v13981_v2 = vld [vmem:[#allocation2 + $0x191c] ss:$36 sps:$4 sm:$0xff]  }
 0x384   :  { %8232 = vmatpush1.bf16.msra.mxu0 %v13913_v3  ;;  %8560 = vmatpush1.bf16.msra.mxu1 %v13916_v4  ;;  %v13984_v3 = vld [vmem:[#allocation2 + $0x1924] ss:$36 sps:$4 sm:$0xff]   ;;  %v13979_v4 = vld [vmem:[#allocation2 + $0x1918] ss:$36 sps:$4 sm:$0xff]  }
 0x385   :  { %8233 = vmatprep.subr.bf16.mxu0 %v13921_v5  ;;  %8561 = vmatprep.subr.bf16.mxu1 %v13924_v6  ;;  %v13982_v5 = vld [vmem:[#allocation2 + $0x1920] ss:$36 sps:$4 sm:$0xff]  }
 0x386   :  { %v13987_v6 = vld [vmem:[#allocation2 + $0x1964] ss:$36 sps:$4 sm:$0xff]  }
 0x388   :  { %8234 = vmatpush1.bf16.msra.mxu0 %v13919_v7  ;;  %8562 = vmatpush1.bf16.msra.mxu1 %v13922_v8  ;;  %v13990_v7 = vld [vmem:[#allocation2 + $0x196c] ss:$36 sps:$4 sm:$0xff]   ;;  %v13985_v8 = vld [vmem:[#allocation2 + $0x1960] ss:$36 sps:$4 sm:$0xff]  }
 0x389   :  { %8244 = vmatprep.subr.bf16.mxu0 %v13927_v9  ;;  %8572 = vmatprep.subr.bf16.mxu1 %v13930_v10  ;;  %v13988_v9 = vld [vmem:[#allocation2 + $0x1968] ss:$36 sps:$4 sm:$0xff]  }
 0x38a   :  { %v13993_v10 = vld [vmem:[#allocation2 + $0x19ac] ss:$36 sps:$4 sm:$0xff]  }
 0x38b   :  { %8236 = vmatmul.mubr.bf16.vlgmr.msra.gmra.mrb[4].mxu0 %v14984_v46  ;;  %8564 = vmatmul.mubr.bf16.vlgmr.msra.gmra.mrb[4].mxu1 %v14984_v46 }
 0x38c   :  { %8245 = vmatpush1.bf16.msra.mxu0 %v13925_v11  ;;  %8573 = vmatpush1.bf16.msra.mxu1 %v13928_v14  ;;  %v13996_v11 = vld [vmem:[#allocation2 + $0x19b4] ss:$36 sps:$4 sm:$0xff]   ;;  %v13991_v14 = vld [vmem:[#allocation2 + $0x19a8] ss:$36 sps:$4 sm:$0xff]  }
 0x38d   :  { %8246 = vmatprep.subr.bf16.mxu0 %v13933_v15  ;;  %8574 = vmatprep.subr.bf16.mxu1 %v13936_v16  ;;  %v13994_v15 = vld [vmem:[#allocation2 + $0x19b0] ss:$36 sps:$4 sm:$0xff]  }
 0x38e   :  { %8276 = vmatprep.mubr.bf16.mxu0 %v15001_v41  ;;  %8604 = vmatprep.mubr.bf16.mxu1 %v15001_v41  ;;  %v13999_v16 = vld [vmem:[#allocation2 + $0x19f4] ss:$36 sps:$4 sm:$0xff]  }
 0x390   :  { %8247 = vmatpush1.bf16.msra.mxu0 %v13931_v18  ;;  %8575 = vmatpush1.bf16.msra.mxu1 %v13934_v19  ;;  %v14002_v18 = vld [vmem:[#allocation2 + $0x19fc] ss:$36 sps:$4 sm:$0xff]   ;;  %v13997_v19 = vld [vmem:[#allocation2 + $0x19f0] ss:$36 sps:$4 sm:$0xff]  }
 0x391   :  { %8248 = vmatprep.subr.bf16.mxu0 %v13939_v20  ;;  %8576 = vmatprep.subr.bf16.mxu1 %v13942_v23  ;;  %v14000_v20 = vld [vmem:[#allocation2 + $0x19f8] ss:$36 sps:$4 sm:$0xff]  }
 0x392   :  { %v14005_v23 = vld [vmem:[#allocation2 + $0x1a3c] ss:$36 sps:$4 sm:$0xff]  }
 0x394   :  { %8249 = vmatpush1.bf16.msra.mxu0 %v13937_v24  ;;  %8577 = vmatpush1.bf16.msra.mxu1 %v13940_v28  ;;  %v14008_v24 = vld [vmem:[#allocation2 + $0x1a44] ss:$36 sps:$4 sm:$0xff]   ;;  %v14003_v28 = vld [vmem:[#allocation2 + $0x1a38] ss:$36 sps:$4 sm:$0xff]  }
 0x395   :  { %8250 = vmatprep.subr.bf16.mxu0 %v13945_v29  ;;  %8578 = vmatprep.subr.bf16.mxu1 %v13948_v30  ;;  %v14006_v29 = vld [vmem:[#allocation2 + $0x1a40] ss:$36 sps:$4 sm:$0xff]  }
 0x396   :  { %v14011_v30 = vld [vmem:[#allocation2 + $0x1a84] ss:$36 sps:$4 sm:$0xff]  }
 0x398   :  { %8251 = vmatpush1.bf16.msra.mxu0 %v13943_v31  ;;  %8579 = vmatpush1.bf16.msra.mxu1 %v13946_v32  ;;  %v14014_v31 = vld [vmem:[#allocation2 + $0x1a8c] ss:$36 sps:$4 sm:$0xff]   ;;  %v14009_v32 = vld [vmem:[#allocation2 + $0x1a80] ss:$36 sps:$4 sm:$0xff]  }
 0x399   :  { %8252 = vmatprep.subr.bf16.mxu0 %v13951_v34  ;;  %8580 = vmatprep.subr.bf16.mxu1 %v13954_v35  ;;  %v14012_v34 = vld [vmem:[#allocation2 + $0x1a88] ss:$36 sps:$4 sm:$0xff]  }
 0x39a   :  { %v14017_v35 = vld [vmem:[#allocation2 + $0x1acc] ss:$36 sps:$4 sm:$0xff]  }
 0x39c   :  { %8253 = vmatpush1.bf16.msra.mxu0 %v13949_v36  ;;  %8581 = vmatpush1.bf16.msra.mxu1 %v13952_v37  ;;  %v14020_v36 = vld [vmem:[#allocation2 + $0x1ad4] ss:$36 sps:$4 sm:$0xff]   ;;  %v14015_v37 = vld [vmem:[#allocation2 + $0x1ac8] ss:$36 sps:$4 sm:$0xff]  }
 0x39d   :  { %8254 = vmatprep.subr.bf16.mxu0 %v13957_v38  ;;  %8582 = vmatprep.subr.bf16.mxu1 %v13960_v39  ;;  %v14018_v38 = vld [vmem:[#allocation2 + $0x1ad0] ss:$36 sps:$4 sm:$0xff]  }
 0x39e   :  { %v14023_v39 = vld [vmem:[#allocation2 + $0x1b14] ss:$36 sps:$4 sm:$0xff]  }
 0x3a0   :  { %8255 = vmatpush1.bf16.msra.mxu0 %v13955_v40  ;;  %8583 = vmatpush1.bf16.msra.mxu1 %v13958_v50  ;;  %v14026_v40 = vld [vmem:[#allocation2 + $0x1b1c] ss:$36 sps:$4 sm:$0xff]   ;;  %v14021_v50 = vld [vmem:[#allocation2 + $0x1b10] ss:$36 sps:$4 sm:$0xff]  }
 0x3a1   :  { %8256 = vmatprep.subr.bf16.mxu0 %v13963_v51  ;;  %8584 = vmatprep.subr.bf16.mxu1 %v13966_v49  ;;  %v14024_v51 = vld [vmem:[#allocation2 + $0x1b18] ss:$36 sps:$4 sm:$0xff]  }
 0x3a2   :  { %v14029_v49 = vld [vmem:[#allocation2 + $0x1b5c] ss:$36 sps:$4 sm:$0xff]  }
 0x3a4   :  { %8257 = vmatpush1.bf16.msra.mxu0 %v13961_v53  ;;  %8585 = vmatpush1.bf16.msra.mxu1 %v13964_v55  ;;  %v14032_v53 = vld [vmem:[#allocation2 + $0x1b64] ss:$36 sps:$4 sm:$0xff]   ;;  %v14027_v55 = vld [vmem:[#allocation2 + $0x1b58] ss:$36 sps:$4 sm:$0xff]  }
 0x3a5   :  { %8258 = vmatprep.subr.bf16.mxu0 %v13969_v56  ;;  %8586 = vmatprep.subr.bf16.mxu1 %v13972_v57  ;;  %v14030_v56 = vld [vmem:[#allocation2 + $0x1b60] ss:$36 sps:$4 sm:$0xff]  }
 0x3a6   :  { %v14035_v57 = vld [vmem:[#allocation2 + $0x1ba4] ss:$36 sps:$4 sm:$0xff]  }
 0x3a8   :  { %8259 = vmatpush1.bf16.msra.mxu0 %v13967_v59  ;;  %8587 = vmatpush1.bf16.msra.mxu1 %v13970_v60  ;;  %v14038_v59 = vld [vmem:[#allocation2 + $0x1bac] ss:$36 sps:$4 sm:$0xff]   ;;  %v14033_v60 = vld [vmem:[#allocation2 + $0x1ba0] ss:$36 sps:$4 sm:$0xff]  }
 0x3a9   :  { %8260 = vmatprep.subr.bf16.mxu0 %v13975_v61  ;;  %8588 = vmatprep.subr.bf16.mxu1 %v13978_v62  ;;  %v14036_v61 = vld [vmem:[#allocation2 + $0x1ba8] ss:$36 sps:$4 sm:$0xff]  }
 0x3aa   :  { %v14041_v62 = vld [vmem:[#allocation2 + $0x1bec] ss:$36 sps:$4 sm:$0xff]  }
 0x3ac   :  { %8261 = vmatpush1.bf16.msra.mxu0 %v13973_v63  ;;  %8589 = vmatpush1.bf16.msra.mxu1 %v13976_v0  ;;  %v14044_v63 = vld [vmem:[#allocation2 + $0x1bf4] ss:$36 sps:$4 sm:$0xff]   ;;  %v14039_v0 = vld [vmem:[#allocation2 + $0x1be8] ss:$36 sps:$4 sm:$0xff]  }
 0x3ad   :  { %8262 = vmatprep.subr.bf16.mxu0 %v13981_v2  ;;  %8590 = vmatprep.subr.bf16.mxu1 %v13984_v3  ;;  %v14042_v2 = vld [vmem:[#allocation2 + $0x1bf0] ss:$36 sps:$4 sm:$0xff]  }
 0x3ae   :  { %v14047_v3 = vld [vmem:[#allocation2 + $0x1c34] ss:$36 sps:$4 sm:$0xff]  }
 0x3b0   :  { %8263 = vmatpush1.bf16.msra.mxu0 %v13979_v4  ;;  %8591 = vmatpush1.bf16.msra.mxu1 %v13982_v5  ;;  %v14050_v4 = vld [vmem:[#allocation2 + $0x1c3c] ss:$36 sps:$4 sm:$0xff]   ;;  %v14045_v5 = vld [vmem:[#allocation2 + $0x1c30] ss:$36 sps:$4 sm:$0xff]  }
 0x3b1   :  { %8264 = vmatprep.subr.bf16.mxu0 %v13987_v6  ;;  %8592 = vmatprep.subr.bf16.mxu1 %v13990_v7  ;;  %v14048_v6 = vld [vmem:[#allocation2 + $0x1c38] ss:$36 sps:$4 sm:$0xff]  }
 0x3b2   :  { %v14053_v7 = vld [vmem:[#allocation2 + $0x1c7c] ss:$36 sps:$4 sm:$0xff]  }
 0x3b4   :  { %8265 = vmatpush1.bf16.msra.mxu0 %v13985_v8  ;;  %8593 = vmatpush1.bf16.msra.mxu1 %v13988_v9  ;;  %v14056_v8 = vld [vmem:[#allocation2 + $0x1c84] ss:$36 sps:$4 sm:$0xff]   ;;  %v14051_v9 = vld [vmem:[#allocation2 + $0x1c78] ss:$36 sps:$4 sm:$0xff]  }
 0x3b5   :  { %8266 = vmatprep.subr.bf16.mxu0 %v13993_v10  ;;  %8594 = vmatprep.subr.bf16.mxu1 %v13996_v11  ;;  %v14054_v10 = vld [vmem:[#allocation2 + $0x1c80] ss:$36 sps:$4 sm:$0xff]  }
 0x3b6   :  { %v14059_v11 = vld [vmem:[#allocation2 + $0x1cc4] ss:$36 sps:$4 sm:$0xff]  }
 0x3b8   :  { %8267 = vmatpush1.bf16.msra.mxu0 %v13991_v14  ;;  %8595 = vmatpush1.bf16.msra.mxu1 %v13994_v15  ;;  %v14062_v14 = vld [vmem:[#allocation2 + $0x1ccc] ss:$36 sps:$4 sm:$0xff]   ;;  %v14057_v15 = vld [vmem:[#allocation2 + $0x1cc0] ss:$36 sps:$4 sm:$0xff]  }
 0x3b9   :  { %8268 = vmatprep.subr.bf16.mxu0 %v13999_v16  ;;  %8596 = vmatprep.subr.bf16.mxu1 %v14002_v18  ;;  %v14060_v16 = vld [vmem:[#allocation2 + $0x1cc8] ss:$36 sps:$4 sm:$0xff]  }
 0x3ba   :  { %v14065_v18 = vld [vmem:[#allocation2 + $0x1d0c] ss:$36 sps:$4 sm:$0xff]  }
 0x3bc   :  { %8269 = vmatpush1.bf16.msra.mxu0 %v13997_v19  ;;  %8597 = vmatpush1.bf16.msra.mxu1 %v14000_v20  ;;  %v14068_v19 = vld [vmem:[#allocation2 + $0x1d14] ss:$36 sps:$4 sm:$0xff]   ;;  %v14063_v20 = vld [vmem:[#allocation2 + $0x1d08] ss:$36 sps:$4 sm:$0xff]  }
 0x3bd   :  { %8270 = vmatprep.subr.bf16.mxu0 %v14005_v23  ;;  %8598 = vmatprep.subr.bf16.mxu1 %v14008_v24  ;;  %v14066_v23 = vld [vmem:[#allocation2 + $0x1d10] ss:$36 sps:$4 sm:$0xff]  }
 0x3be   :  { %v14071_v24 = vld [vmem:[#allocation2 + $0x1d54] ss:$36 sps:$4 sm:$0xff]  }
 0x3c0   :  { %8271 = vmatpush1.bf16.msra.mxu0 %v14003_v28  ;;  %8599 = vmatpush1.bf16.msra.mxu1 %v14006_v29  ;;  %v14074_v28 = vld [vmem:[#allocation2 + $0x1d5c] ss:$36 sps:$4 sm:$0xff]   ;;  %v14069_v29 = vld [vmem:[#allocation2 + $0x1d50] ss:$36 sps:$4 sm:$0xff]  }
 0x3c1   :  { %8272 = vmatprep.subr.bf16.mxu0 %v14011_v30  ;;  %8600 = vmatprep.subr.bf16.mxu1 %v14014_v31  ;;  %v14072_v30 = vld [vmem:[#allocation2 + $0x1d58] ss:$36 sps:$4 sm:$0xff]  }
 0x3c2   :  { %v14077_v31 = vld [vmem:[#allocation2 + $0x1d9c] ss:$36 sps:$4 sm:$0xff]  }
 0x3c4   :  { %8273 = vmatpush1.bf16.msra.mxu0 %v14009_v32  ;;  %8601 = vmatpush1.bf16.msra.mxu1 %v14012_v34  ;;  %v14080_v32 = vld [vmem:[#allocation2 + $0x1da4] ss:$36 sps:$4 sm:$0xff]   ;;  %v14075_v34 = vld [vmem:[#allocation2 + $0x1d98] ss:$36 sps:$4 sm:$0xff]  }
 0x3c5   :  { %8274 = vmatprep.subr.bf16.mxu0 %v14017_v35  ;;  %8602 = vmatprep.subr.bf16.mxu1 %v14020_v36  ;;  %v14078_v35 = vld [vmem:[#allocation2 + $0x1da0] ss:$36 sps:$4 sm:$0xff]  }
 0x3c6   :  { %v14083_v36 = vld [vmem:[#allocation2 + $0x1de4] ss:$36 sps:$4 sm:$0xff]  }
 0x3c8   :  { %8275 = vmatpush1.bf16.msra.mxu0 %v14015_v37  ;;  %8603 = vmatpush1.bf16.msra.mxu1 %v14018_v38  ;;  %v14086_v37 = vld [vmem:[#allocation2 + $0x1dec] ss:$36 sps:$4 sm:$0xff]   ;;  %v14081_v38 = vld [vmem:[#allocation2 + $0x1de0] ss:$36 sps:$4 sm:$0xff]  }
 0x3c9   :  { %8285 = vmatprep.subr.bf16.mxu0 %v14023_v39  ;;  %8613 = vmatprep.subr.bf16.mxu1 %v14026_v40  ;;  %v14084_v39 = vld [vmem:[#allocation2 + $0x1de8] ss:$36 sps:$4 sm:$0xff]  }
 0x3ca   :  { %v14089_v40 = vld [vmem:[#allocation2 + $0x1e2c] ss:$36 sps:$4 sm:$0xff]  }
 0x3cb   :  { %8277 = vmatmul.mubr.bf16.vlgmr.msra.gmra.mrb[4].mxu0 %v14997_v1  ;;  %8605 = vmatmul.mubr.bf16.vlgmr.msra.gmra.mrb[4].mxu1 %v14997_v1 }
 0x3cc   :  { %8286 = vmatpush1.bf16.msra.mxu0 %v14021_v50  ;;  %8614 = vmatpush1.bf16.msra.mxu1 %v14024_v51  ;;  %v14092_v50 = vld [vmem:[#allocation2 + $0x1e34] ss:$36 sps:$4 sm:$0xff]   ;;  %v14087_v51 = vld [vmem:[#allocation2 + $0x1e28] ss:$36 sps:$4 sm:$0xff]  }
 0x3cd   :  { %8287 = vmatprep.subr.bf16.mxu0 %v14029_v49  ;;  %8615 = vmatprep.subr.bf16.mxu1 %v14032_v53  ;;  %v14090_v49 = vld [vmem:[#allocation2 + $0x1e30] ss:$36 sps:$4 sm:$0xff]  }
 0x3ce   :  { %8317 = vmatprep.mubr.bf16.mxu0 %v15018_v27  ;;  %8645 = vmatprep.mubr.bf16.mxu1 %v15018_v27  ;;  %v14095_v53 = vld [vmem:[#allocation2 + $0x1e74] ss:$36 sps:$4 sm:$0xff]  }
 0x3d0   :  { %8288 = vmatpush1.bf16.msra.mxu0 %v14027_v55  ;;  %8616 = vmatpush1.bf16.msra.mxu1 %v14030_v56  ;;  %v14098_v55 = vld [vmem:[#allocation2 + $0x1e7c] ss:$36 sps:$4 sm:$0xff]   ;;  %v14093_v56 = vld [vmem:[#allocation2 + $0x1e70] ss:$36 sps:$4 sm:$0xff]  }
 0x3d1   :  { %8289 = vmatprep.subr.bf16.mxu0 %v14035_v57  ;;  %8617 = vmatprep.subr.bf16.mxu1 %v14038_v59  ;;  %v14096_v57 = vld [vmem:[#allocation2 + $0x1e78] ss:$36 sps:$4 sm:$0xff]  }
 0x3d2   :  { %v14101_v59 = vld [vmem:[#allocation2 + $0x1ebc] ss:$36 sps:$4 sm:$0xff]  }
 0x3d4   :  { %8290 = vmatpush1.bf16.msra.mxu0 %v14033_v60  ;;  %8618 = vmatpush1.bf16.msra.mxu1 %v14036_v61  ;;  %v14104_v60 = vld [vmem:[#allocation2 + $0x1ec4] ss:$36 sps:$4 sm:$0xff]   ;;  %v14099_v61 = vld [vmem:[#allocation2 + $0x1eb8] ss:$36 sps:$4 sm:$0xff]  }
 0x3d5   :  { %8291 = vmatprep.subr.bf16.mxu0 %v14041_v62  ;;  %8619 = vmatprep.subr.bf16.mxu1 %v14044_v63  ;;  %v14102_v62 = vld [vmem:[#allocation2 + $0x1ec0] ss:$36 sps:$4 sm:$0xff]  }
 0x3d6   :  { %v14107_v63 = vld [vmem:[#allocation2 + $0x1f04] ss:$36 sps:$4 sm:$0xff]  }
 0x3d8   :  { %8292 = vmatpush1.bf16.msra.mxu0 %v14039_v0  ;;  %8620 = vmatpush1.bf16.msra.mxu1 %v14042_v2  ;;  %v14110_v0 = vld [vmem:[#allocation2 + $0x1f0c] ss:$36 sps:$4 sm:$0xff]   ;;  %v14105_v2 = vld [vmem:[#allocation2 + $0x1f00] ss:$36 sps:$4 sm:$0xff]  }
 0x3d9   :  { %8293 = vmatprep.subr.bf16.mxu0 %v14047_v3  ;;  %8621 = vmatprep.subr.bf16.mxu1 %v14050_v4  ;;  %v14108_v3 = vld [vmem:[#allocation2 + $0x1f08] ss:$36 sps:$4 sm:$0xff]  }
 0x3da   :  { %v14113_v4 = vld [vmem:[#allocation2 + $0x1f4c] ss:$36 sps:$4 sm:$0xff]  }
 0x3dc   :  { %8294 = vmatpush1.bf16.msra.mxu0 %v14045_v5  ;;  %8622 = vmatpush1.bf16.msra.mxu1 %v14048_v6  ;;  %v14116_v5 = vld [vmem:[#allocation2 + $0x1f54] ss:$36 sps:$4 sm:$0xff]   ;;  %v14111_v6 = vld [vmem:[#allocation2 + $0x1f48] ss:$36 sps:$4 sm:$0xff]  }
 0x3dd   :  { %8295 = vmatprep.subr.bf16.mxu0 %v14053_v7  ;;  %8623 = vmatprep.subr.bf16.mxu1 %v14056_v8  ;;  %v14114_v7 = vld [vmem:[#allocation2 + $0x1f50] ss:$36 sps:$4 sm:$0xff]  }
 0x3de   :  { %v14119_v8 = vld [vmem:[#allocation2 + $0x1f94] ss:$36 sps:$4 sm:$0xff]  }
 0x3e0   :  { %8296 = vmatpush1.bf16.msra.mxu0 %v14051_v9  ;;  %8624 = vmatpush1.bf16.msra.mxu1 %v14054_v10  ;;  %v14122_v9 = vld [vmem:[#allocation2 + $0x1f9c] ss:$36 sps:$4 sm:$0xff]   ;;  %v14117_v10 = vld [vmem:[#allocation2 + $0x1f90] ss:$36 sps:$4 sm:$0xff]  }
 0x3e1   :  { %8297 = vmatprep.subr.bf16.mxu0 %v14059_v11  ;;  %8625 = vmatprep.subr.bf16.mxu1 %v14062_v14  ;;  %v14120_v11 = vld [vmem:[#allocation2 + $0x1f98] ss:$36 sps:$4 sm:$0xff]  }
 0x3e2   :  { %v14125_v14 = vld [vmem:[#allocation2 + $0x1fdc] ss:$36 sps:$4 sm:$0xff]  }
 0x3e4   :  { %8298 = vmatpush1.bf16.msra.mxu0 %v14057_v15  ;;  %8626 = vmatpush1.bf16.msra.mxu1 %v14060_v16  ;;  %v14128_v15 = vld [vmem:[#allocation2 + $0x1fe4] ss:$36 sps:$4 sm:$0xff]   ;;  %v14123_v16 = vld [vmem:[#allocation2 + $0x1fd8] ss:$36 sps:$4 sm:$0xff]  }
 0x3e5   :  { %8299 = vmatprep.subr.bf16.mxu0 %v14065_v18  ;;  %8627 = vmatprep.subr.bf16.mxu1 %v14068_v19  ;;  %v14126_v18 = vld [vmem:[#allocation2 + $0x1fe0] ss:$36 sps:$4 sm:$0xff]  }
 0x3e6   :  { %v14131_v19 = vld [vmem:[#allocation2 + $0x2024] ss:$36 sps:$4 sm:$0xff]  }
 0x3e8   :  { %8300 = vmatpush1.bf16.msra.mxu0 %v14063_v20  ;;  %8628 = vmatpush1.bf16.msra.mxu1 %v14066_v23  ;;  %v14134_v20 = vld [vmem:[#allocation2 + $0x202c] ss:$36 sps:$4 sm:$0xff]   ;;  %v14129_v23 = vld [vmem:[#allocation2 + $0x2020] ss:$36 sps:$4 sm:$0xff]  }
 0x3e9   :  { %8301 = vmatprep.subr.bf16.mxu0 %v14071_v24  ;;  %8629 = vmatprep.subr.bf16.mxu1 %v14074_v28  ;;  %v14132_v24 = vld [vmem:[#allocation2 + $0x2028] ss:$36 sps:$4 sm:$0xff]  }
 0x3ea   :  { %v14137_v28 = vld [vmem:[#allocation2 + $0x206c] ss:$36 sps:$4 sm:$0xff]  }
 0x3ec   :  { %8302 = vmatpush1.bf16.msra.mxu0 %v14069_v29  ;;  %8630 = vmatpush1.bf16.msra.mxu1 %v14072_v30  ;;  %v14140_v29 = vld [vmem:[#allocation2 + $0x2074] ss:$36 sps:$4 sm:$0xff]   ;;  %v14135_v30 = vld [vmem:[#allocation2 + $0x2068] ss:$36 sps:$4 sm:$0xff]  }
 0x3ed   :  { %8303 = vmatprep.subr.bf16.mxu0 %v14077_v31  ;;  %8631 = vmatprep.subr.bf16.mxu1 %v14080_v32  ;;  %v14138_v31 = vld [vmem:[#allocation2 + $0x2070] ss:$36 sps:$4 sm:$0xff]  }
 0x3ee   :  { %v14143_v32 = vld [vmem:[#allocation2 + $0x20b4] ss:$36 sps:$4 sm:$0xff]  }
 0x3f0   :  { %8304 = vmatpush1.bf16.msra.mxu0 %v14075_v34  ;;  %8632 = vmatpush1.bf16.msra.mxu1 %v14078_v35  ;;  %v14146_v34 = vld [vmem:[#allocation2 + $0x20bc] ss:$36 sps:$4 sm:$0xff]   ;;  %v14141_v35 = vld [vmem:[#allocation2 + $0x20b0] ss:$36 sps:$4 sm:$0xff]  }
 0x3f1   :  { %8305 = vmatprep.subr.bf16.mxu0 %v14083_v36  ;;  %8633 = vmatprep.subr.bf16.mxu1 %v14086_v37  ;;  %v14144_v36 = vld [vmem:[#allocation2 + $0x20b8] ss:$36 sps:$4 sm:$0xff]  }
 0x3f2   :  { %v14149_v37 = vld [vmem:[#allocation2 + $0x20fc] ss:$36 sps:$4 sm:$0xff]  }
 0x3f4   :  { %8306 = vmatpush1.bf16.msra.mxu0 %v14081_v38  ;;  %8634 = vmatpush1.bf16.msra.mxu1 %v14084_v39  ;;  %v14152_v38 = vld [vmem:[#allocation2 + $0x2104] ss:$36 sps:$4 sm:$0xff]   ;;  %v14147_v39 = vld [vmem:[#allocation2 + $0x20f8] ss:$36 sps:$4 sm:$0xff]  }
 0x3f5   :  { %8307 = vmatprep.subr.bf16.mxu0 %v14089_v40  ;;  %8635 = vmatprep.subr.bf16.mxu1 %v14092_v50  ;;  %v14150_v40 = vld [vmem:[#allocation2 + $0x2100] ss:$36 sps:$4 sm:$0xff]  }
 0x3f6   :  { %v14155_v50 = vld [vmem:[#allocation2 + $0x2144] ss:$36 sps:$4 sm:$0xff]  }
 0x3f8   :  { %8308 = vmatpush1.bf16.msra.mxu0 %v14087_v51  ;;  %8636 = vmatpush1.bf16.msra.mxu1 %v14090_v49  ;;  %v14158_v51 = vld [vmem:[#allocation2 + $0x214c] ss:$36 sps:$4 sm:$0xff]   ;;  %v14153_v49 = vld [vmem:[#allocation2 + $0x2140] ss:$36 sps:$4 sm:$0xff]  }
 0x3f9   :  { %8309 = vmatprep.subr.bf16.mxu0 %v14095_v53  ;;  %8637 = vmatprep.subr.bf16.mxu1 %v14098_v55  ;;  %v14156_v53 = vld [vmem:[#allocation2 + $0x2148] ss:$36 sps:$4 sm:$0xff]  }
 0x3fa   :  { %v14161_v55 = vld [vmem:[#allocation2 + $0x218c] ss:$36 sps:$4 sm:$0xff]  }
 0x3fc   :  { %8310 = vmatpush1.bf16.msra.mxu0 %v14093_v56  ;;  %8638 = vmatpush1.bf16.msra.mxu1 %v14096_v57  ;;  %v14164_v56 = vld [vmem:[#allocation2 + $0x2194] ss:$36 sps:$4 sm:$0xff]   ;;  %v14159_v57 = vld [vmem:[#allocation2 + $0x2188] ss:$36 sps:$4 sm:$0xff]  }
 0x3fd   :  { %8311 = vmatprep.subr.bf16.mxu0 %v14101_v59  ;;  %8639 = vmatprep.subr.bf16.mxu1 %v14104_v60  ;;  %v14162_v59 = vld [vmem:[#allocation2 + $0x2190] ss:$36 sps:$4 sm:$0xff]  }
 0x3fe   :  { %v14167_v60 = vld [vmem:[#allocation2 + $0x21d4] ss:$36 sps:$4 sm:$0xff]  }
 0x400   :  { %8312 = vmatpush1.bf16.msra.mxu0 %v14099_v61  ;;  %8640 = vmatpush1.bf16.msra.mxu1 %v14102_v62  ;;  %v14170_v61 = vld [vmem:[#allocation2 + $0x21dc] ss:$36 sps:$4 sm:$0xff]   ;;  %v14165_v62 = vld [vmem:[#allocation2 + $0x21d0] ss:$36 sps:$4 sm:$0xff]  }
 0x401   :  { %8313 = vmatprep.subr.bf16.mxu0 %v14107_v63  ;;  %8641 = vmatprep.subr.bf16.mxu1 %v14110_v0  ;;  %v14168_v63 = vld [vmem:[#allocation2 + $0x21d8] ss:$36 sps:$4 sm:$0xff]  }
 0x402   :  { %v14173_v0 = vld [vmem:[#allocation2 + $0x221c] ss:$36 sps:$4 sm:$0xff]  }
 0x404   :  { %8314 = vmatpush1.bf16.msra.mxu0 %v14105_v2  ;;  %8642 = vmatpush1.bf16.msra.mxu1 %v14108_v3  ;;  %v14176_v2 = vld [vmem:[#allocation2 + $0x2224] ss:$36 sps:$4 sm:$0xff]   ;;  %v14171_v3 = vld [vmem:[#allocation2 + $0x2218] ss:$36 sps:$4 sm:$0xff]  }
 0x405   :  { %8315 = vmatprep.subr.bf16.mxu0 %v14113_v4  ;;  %8643 = vmatprep.subr.bf16.mxu1 %v14116_v5  ;;  %v14174_v4 = vld [vmem:[#allocation2 + $0x2220] ss:$36 sps:$4 sm:$0xff]  }
 0x406   :  { %v14179_v5 = vld [vmem:[#allocation2 + $0x2264] ss:$36 sps:$4 sm:$0xff]  }
 0x408   :  { %8316 = vmatpush1.bf16.msra.mxu0 %v14111_v6  ;;  %8644 = vmatpush1.bf16.msra.mxu1 %v14114_v7  ;;  %v14182_v6 = vld [vmem:[#allocation2 + $0x226c] ss:$36 sps:$4 sm:$0xff]   ;;  %v14177_v7 = vld [vmem:[#allocation2 + $0x2260] ss:$36 sps:$4 sm:$0xff]  }
 0x409   :  { %8326 = vmatprep.subr.bf16.mxu0 %v14119_v8  ;;  %8654 = vmatprep.subr.bf16.mxu1 %v14122_v9  ;;  %v14180_v8 = vld [vmem:[#allocation2 + $0x2268] ss:$36 sps:$4 sm:$0xff]  }
 0x40a   :  { %v14185_v9 = vld [vmem:[#allocation2 + $0x22ac] ss:$36 sps:$4 sm:$0xff]  }
 0x40b   :  { %8318 = vmatmul.mubr.bf16.vlgmr.msra.gmra.mrb[4].mxu0 %v15014_v21  ;;  %8646 = vmatmul.mubr.bf16.vlgmr.msra.gmra.mrb[4].mxu1 %v15014_v21 }
 0x40c   :  { %8327 = vmatpush1.bf16.msra.mxu0 %v14117_v10  ;;  %8655 = vmatpush1.bf16.msra.mxu1 %v14120_v11  ;;  %v14188_v10 = vld [vmem:[#allocation2 + $0x22b4] ss:$36 sps:$4 sm:$0xff]   ;;  %v14183_v11 = vld [vmem:[#allocation2 + $0x22a8] ss:$36 sps:$4 sm:$0xff]  }
 0x40d   :  { %8328 = vmatprep.subr.bf16.mxu0 %v14125_v14  ;;  %8656 = vmatprep.subr.bf16.mxu1 %v14128_v15  ;;  %v14186_v14 = vld [vmem:[#allocation2 + $0x22b0] ss:$36 sps:$4 sm:$0xff]  }
 0x40e   :  { %8358 = vmatprep.mubr.bf16.mxu0 %v15031_v13  ;;  %8686 = vmatprep.mubr.bf16.mxu1 %v15031_v13  ;;  %v14191_v15 = vld [vmem:[#allocation2 + $0x22f4] ss:$36 sps:$4 sm:$0xff]  }
 0x410   :  { %8329 = vmatpush1.bf16.msra.mxu0 %v14123_v16  ;;  %8657 = vmatpush1.bf16.msra.mxu1 %v14126_v18  ;;  %v14194_v16 = vld [vmem:[#allocation2 + $0x22fc] ss:$36 sps:$4 sm:$0xff]   ;;  %v14189_v18 = vld [vmem:[#allocation2 + $0x22f0] ss:$36 sps:$4 sm:$0xff]  }
 0x411   :  { %8330 = vmatprep.subr.bf16.mxu0 %v14131_v19  ;;  %8658 = vmatprep.subr.bf16.mxu1 %v14134_v20  ;;  %v14192_v19 = vld [vmem:[#allocation2 + $0x22f8] ss:$36 sps:$4 sm:$0xff]  }
 0x412   :  { %v14197_v20 = vld [vmem:[#allocation2 + $0x233c] ss:$36 sps:$4 sm:$0xff]  }
 0x414   :  { %8331 = vmatpush1.bf16.msra.mxu0 %v14129_v23  ;;  %8659 = vmatpush1.bf16.msra.mxu1 %v14132_v24  ;;  %v14200_v23 = vld [vmem:[#allocation2 + $0x2344] ss:$36 sps:$4 sm:$0xff]   ;;  %v14195_v24 = vld [vmem:[#allocation2 + $0x2338] ss:$36 sps:$4 sm:$0xff]  }
 0x415   :  { %8332 = vmatprep.subr.bf16.mxu0 %v14137_v28  ;;  %8660 = vmatprep.subr.bf16.mxu1 %v14140_v29  ;;  %v14198_v28 = vld [vmem:[#allocation2 + $0x2340] ss:$36 sps:$4 sm:$0xff]  }
 0x416   :  { %v14203_v29 = vld [vmem:[#allocation2 + $0x2384] ss:$36 sps:$4 sm:$0xff]  }
 0x418   :  { %8333 = vmatpush1.bf16.msra.mxu0 %v14135_v30  ;;  %8661 = vmatpush1.bf16.msra.mxu1 %v14138_v31  ;;  %v14206_v30 = vld [vmem:[#allocation2 + $0x238c] ss:$36 sps:$4 sm:$0xff]   ;;  %v14201_v31 = vld [vmem:[#allocation2 + $0x2380] ss:$36 sps:$4 sm:$0xff]  }
 0x419   :  { %8334 = vmatprep.subr.bf16.mxu0 %v14143_v32  ;;  %8662 = vmatprep.subr.bf16.mxu1 %v14146_v34  ;;  %v14204_v32 = vld [vmem:[#allocation2 + $0x2388] ss:$36 sps:$4 sm:$0xff]  }
 0x41a   :  { %v14209_v34 = vld [vmem:[#allocation2 + $0x23cc] ss:$36 sps:$4 sm:$0xff]  }
 0x41c   :  { %8335 = vmatpush1.bf16.msra.mxu0 %v14141_v35  ;;  %8663 = vmatpush1.bf16.msra.mxu1 %v14144_v36  ;;  %v14212_v35 = vld [vmem:[#allocation2 + $0x23d4] ss:$36 sps:$4 sm:$0xff]   ;;  %v14207_v36 = vld [vmem:[#allocation2 + $0x23c8] ss:$36 sps:$4 sm:$0xff]  }
 0x41d   :  { %8336 = vmatprep.subr.bf16.mxu0 %v14149_v37  ;;  %8664 = vmatprep.subr.bf16.mxu1 %v14152_v38  ;;  %v14210_v37 = vld [vmem:[#allocation2 + $0x23d0] ss:$36 sps:$4 sm:$0xff]   ;;  %v14213_v38 = vld [vmem:[#allocation2 + $0x260] ss:$36 sps:$4 sm:$0xff]  }
 0x420   :  { %8337 = vmatpush1.bf16.msra.mxu0 %v14147_v39  ;;  %8665 = vmatpush1.bf16.msra.mxu1 %v14150_v40  ;;  %v14214_v39 = vld [vmem:[#allocation2 + $0x6e0] ss:$36 sps:$4 sm:$0xff]  }
 0x421   :  { %8338 = vmatprep.subr.bf16.mxu0 %v14155_v50  ;;  %8666 = vmatprep.subr.bf16.mxu1 %v14158_v51  ;;  %v14215_v40 = vld [vmem:[#allocation2 + $0x20] ss:$36 sps:$4 sm:$0xff]   ;;  %v14217_v51 = vld [vmem:[#allocation2 + $0x2a8] ss:$36 sps:$4 sm:$0xff]  }
 0x422   :  { %v14216_v50 = vld [vmem:[#allocation2 + $0x4a0] ss:$36 sps:$4 sm:$0xff]  }
 0x424   :  { %8339 = vmatpush1.bf16.msra.mxu0 %v14153_v49  ;;  %8667 = vmatpush1.bf16.msra.mxu1 %v14156_v53  ;;  %v14218_v49 = vld [vmem:[#allocation2 + $0x728] ss:$36 sps:$4 sm:$0xff]  }
 0x425   :  { %8340 = vmatprep.subr.bf16.mxu0 %v14161_v55  ;;  %8668 = vmatprep.subr.bf16.mxu1 %v14164_v56  ;;  %v14219_v53 = vld [vmem:[#allocation2 + $0x68] ss:$36 sps:$4 sm:$0xff]   ;;  %v14221_v56 = vld [vmem:[#allocation2 + $0x2f0] ss:$36 sps:$4 sm:$0xff]  }
 0x426   :  { %v14220_v55 = vld [vmem:[#allocation2 + $0x4e8] ss:$36 sps:$4 sm:$0xff]  }
 0x428   :  { %8341 = vmatpush1.bf16.msra.mxu0 %v14159_v57  ;;  %8669 = vmatpush1.bf16.msra.mxu1 %v14162_v59  ;;  %v14222_v57 = vld [vmem:[#allocation2 + $0x770] ss:$36 sps:$4 sm:$0xff]  }
 0x429   :  { %8342 = vmatprep.subr.bf16.mxu0 %v14167_v60  ;;  %8670 = vmatprep.subr.bf16.mxu1 %v14170_v61  ;;  %v14223_v59 = vld [vmem:[#allocation2 + $0xb0] ss:$36 sps:$4 sm:$0xff]   ;;  %v14225_v61 = vld [vmem:[#allocation2 + $0x338] ss:$36 sps:$4 sm:$0xff]  }
 0x42a   :  { %v14224_v60 = vld [vmem:[#allocation2 + $0x530] ss:$36 sps:$4 sm:$0xff]  }
 0x42c   :  { %8343 = vmatpush1.bf16.msra.mxu0 %v14165_v62  ;;  %8671 = vmatpush1.bf16.msra.mxu1 %v14168_v63  ;;  %v14226_v62 = vld [vmem:[#allocation2 + $0x7b8] ss:$36 sps:$4 sm:$0xff]  }
 0x42d   :  { %8344 = vmatprep.subr.bf16.mxu0 %v14173_v0  ;;  %8672 = vmatprep.subr.bf16.mxu1 %v14176_v2  ;;  %v14227_v63 = vld [vmem:[#allocation2 + $0xf8] ss:$36 sps:$4 sm:$0xff]   ;;  %v14229_v2 = vld [vmem:[#allocation2 + $0x380] ss:$36 sps:$4 sm:$0xff]  }
 0x42e   :  { %v14228_v0 = vld [vmem:[#allocation2 + $0x578] ss:$36 sps:$4 sm:$0xff]  }
 0x430   :  { %8345 = vmatpush1.bf16.msra.mxu0 %v14171_v3  ;;  %8673 = vmatpush1.bf16.msra.mxu1 %v14174_v4  ;;  %v14230_v3 = vld [vmem:[#allocation2 + $0x800] ss:$36 sps:$4 sm:$0xff]   ;;  %v14233_v4 = vld [vmem:[#allocation2 + $0x3c8] ss:$36 sps:$4 sm:$0xff]  }
 0x431   :  { %8346 = vmatprep.subr.bf16.mxu0 %v14179_v5  ;;  %8674 = vmatprep.subr.bf16.mxu1 %v14182_v6  ;;  %v14234_v5 = vld [vmem:[#allocation2 + $0x848] ss:$36 sps:$4 sm:$0xff]  }
 0x432   :  { %v14235_v6 = vld [vmem:[#allocation2 + $0x188] ss:$36 sps:$4 sm:$0xff]  }
 0x434   :  { %8347 = vmatpush1.bf16.msra.mxu0 %v14177_v7  ;;  %8675 = vmatpush1.bf16.msra.mxu1 %v14180_v8  ;;  %v14236_v7 = vld [vmem:[#allocation2 + $0x608] ss:$36 sps:$4 sm:$0xff]   ;;  %v14237_v8 = vld [vmem:[#allocation2 + $0x410] ss:$36 sps:$4 sm:$0xff]  }
 0x435   :  { %8348 = vmatprep.subr.bf16.mxu0 %v14185_v9  ;;  %8676 = vmatprep.subr.bf16.mxu1 %v14188_v10  ;;  %v14238_v9 = vld [vmem:[#allocation2 + $0x890] ss:$36 sps:$4 sm:$0xff]  }
 0x436   :  { %v14239_v10 = vld [vmem:[#allocation2 + $0x1d0] ss:$36 sps:$4 sm:$0xff]  }
 0x438   :  { %8349 = vmatpush1.bf16.msra.mxu0 %v14183_v11  ;;  %8677 = vmatpush1.bf16.msra.mxu1 %v14186_v14  ;;  %v14240_v11 = vld [vmem:[#allocation2 + $0x650] ss:$36 sps:$4 sm:$0xff]   ;;  %v14241_v14 = vld [vmem:[#allocation2 + $0x458] ss:$36 sps:$4 sm:$0xff]  }
 0x439   :  { %8350 = vmatprep.subr.bf16.mxu0 %v14191_v15  ;;  %8678 = vmatprep.subr.bf16.mxu1 %v14194_v16  ;;  %v14242_v15 = vld [vmem:[#allocation2 + $0x8d8] ss:$36 sps:$4 sm:$0xff]  }
 0x43a   :  { %v14243_v16 = vld [vmem:[#allocation2 + $0x218] ss:$36 sps:$4 sm:$0xff]  }
 0x43c   :  { %8351 = vmatpush1.bf16.msra.mxu0 %v14189_v18  ;;  %8679 = vmatpush1.bf16.msra.mxu1 %v14192_v19  ;;  %v14244_v18 = vld [vmem:[#allocation2 + $0x698] ss:$36 sps:$4 sm:$0xff]   ;;  %v14245_v19 = vld [vmem:[#allocation2 + $0xb60] ss:$36 sps:$4 sm:$0xff]  }
 0x43d   :  { %8352 = vmatprep.subr.bf16.mxu0 %v14197_v20  ;;  %8680 = vmatprep.subr.bf16.mxu1 %v14200_v23  ;;  %v14246_v20 = vld [vmem:[#allocation2 + $0xfe0] ss:$36 sps:$4 sm:$0xff]  }
 0x43e   :  { %v14247_v23 = vld [vmem:[#allocation2 + $0x920] ss:$36 sps:$4 sm:$0xff]  }
 0x440   :  { %8353 = vmatpush1.bf16.msra.mxu0 %v14195_v24  ;;  %8681 = vmatpush1.bf16.msra.mxu1 %v14198_v28  ;;  %v14248_v24 = vld [vmem:[#allocation2 + $0xda0] ss:$36 sps:$4 sm:$0xff]   ;;  %v14249_v28 = vld [vmem:[#allocation2 + $0xba8] ss:$36 sps:$4 sm:$0xff]  }
 0x441   :  { %8354 = vmatprep.subr.bf16.mxu0 %v14203_v29  ;;  %8682 = vmatprep.subr.bf16.mxu1 %v14206_v30  ;;  %v14250_v29 = vld [vmem:[#allocation2 + $0x1028] ss:$36 sps:$4 sm:$0xff]  }
 0x442   :  { %v14251_v30 = vld [vmem:[#allocation2 + $0x968] ss:$36 sps:$4 sm:$0xff]  }
 0x444   :  { %8355 = vmatpush1.bf16.msra.mxu0 %v14201_v31  ;;  %8683 = vmatpush1.bf16.msra.mxu1 %v14204_v32  ;;  %v14252_v31 = vld [vmem:[#allocation2 + $0xde8] ss:$36 sps:$4 sm:$0xff]   ;;  %v14253_v32 = vld [vmem:[#allocation2 + $0xbf0] ss:$36 sps:$4 sm:$0xff]  }
 0x445   :  { %8356 = vmatprep.subr.bf16.mxu0 %v14209_v34  ;;  %8684 = vmatprep.subr.bf16.mxu1 %v14212_v35  ;;  %v14254_v34 = vld [vmem:[#allocation2 + $0x1070] ss:$36 sps:$4 sm:$0xff]  }
 0x446   :  { %v14255_v35 = vld [vmem:[#allocation2 + $0x9b0] ss:$36 sps:$4 sm:$0xff]  }
 0x448   :  { %8357 = vmatpush1.bf16.msra.mxu0 %v14207_v36  ;;  %8685 = vmatpush1.bf16.msra.mxu1 %v14210_v37  ;;  %v14256_v36 = vld [vmem:[#allocation2 + $0xe30] ss:$36 sps:$4 sm:$0xff]   ;;  %v14259_v37 = vld [vmem:[#allocation2 + $0x9f8] ss:$36 sps:$4 sm:$0xff]  }
 0x449   :  { %12340 = vmatprep.subr.bf16.mxu0 %v14213_v38  ;;  %12362 = vmatprep.subr.bf16.mxu1 %v14214_v39  ;;  %v14260_v38 = vld [vmem:[#allocation2 + $0xe78] ss:$36 sps:$4 sm:$0xff]   ;;  %v14261_v39 = vld [vmem:[#allocation2 + $0xc80] ss:$36 sps:$4 sm:$0xff]  }
 0x44b   :  { %8359 = vmatmul.mubr.bf16.vlgmr.msra.gmra.mrb[4].mxu0 %v15027_v45  ;;  %8687 = vmatmul.mubr.bf16.vlgmr.msra.gmra.mrb[4].mxu1 %v15027_v45 }
 0x44c   :  { %12341 = vmatpush3.bf16.msra.mxu0 %v14215_v40  ;;  %12363 = vmatpush3.bf16.msra.mxu1 %v14216_v50  ;;  %v14262_v40 = vld [vmem:[#allocation2 + $0x1100] ss:$36 sps:$4 sm:$0xff]   ;;  %v14265_v50 = vld [vmem:[#allocation2 + $0xcc8] ss:$36 sps:$4 sm:$0xff]  }
 0x44d   :  { %12342 = vmatprep.subr.bf16.mxu0 %v14217_v51  ;;  %12364 = vmatprep.subr.bf16.mxu1 %v14218_v49  ;;  %v14266_v51 = vld [vmem:[#allocation2 + $0x1148] ss:$36 sps:$4 sm:$0xff]  }
 0x44e   :  { %8727 = vmatprep.mubr.bf16.mxu0 %v14932_v58  ;;  %8767 = vmatprep.mubr.bf16.mxu1 %v14941_v17  ;;  %v14231_v58 = vld [vmem:[#allocation2 + $0x140] ss:$36 sps:$4 sm:$0xff]   ;;  %v14267_v49 = vld [vmem:[#allocation2 + $0xa88] ss:$36 sps:$4 sm:$0xff]  }
 0x44f   :  { %v14232_v17 = vld [vmem:[#allocation2 + $0x5c0] ss:$36 sps:$4 sm:$0xff]  }
 0x450   :  { %12343 = vmatpush3.bf16.msra.mxu0 %v14219_v53  ;;  %12365 = vmatpush3.bf16.msra.mxu1 %v14220_v55  ;;  %v14268_v53 = vld [vmem:[#allocation2 + $0xf08] ss:$36 sps:$4 sm:$0xff]   ;;  %v14269_v55 = vld [vmem:[#allocation2 + $0xd10] ss:$36 sps:$4 sm:$0xff]  }
 0x451   :  { %12344 = vmatprep.subr.bf16.mxu0 %v14221_v56  ;;  %12366 = vmatprep.subr.bf16.mxu1 %v14222_v57  ;;  %v14270_v56 = vld [vmem:[#allocation2 + $0x1190] ss:$36 sps:$4 sm:$0xff]  }
 0x452   :  { %v14271_v57 = vld [vmem:[#allocation2 + $0xad0] ss:$36 sps:$4 sm:$0xff]  }
 0x454   :  { %12345 = vmatpush3.bf16.msra.mxu0 %v14223_v59  ;;  %12367 = vmatpush3.bf16.msra.mxu1 %v14224_v60  ;;  %v14272_v59 = vld [vmem:[#allocation2 + $0xf50] ss:$36 sps:$4 sm:$0xff]   ;;  %v14273_v60 = vld [vmem:[#allocation2 + $0xd58] ss:$36 sps:$4 sm:$0xff]  }
 0x455   :  { %12346 = vmatprep.subr.bf16.mxu0 %v14225_v61  ;;  %12368 = vmatprep.subr.bf16.mxu1 %v14226_v62  ;;  %v14274_v61 = vld [vmem:[#allocation2 + $0x11d8] ss:$36 sps:$4 sm:$0xff]  }
 0x456   :  { %v14275_v62 = vld [vmem:[#allocation2 + $0xb18] ss:$36 sps:$4 sm:$0xff]  }
 0x458   :  { %12347 = vmatpush3.bf16.msra.mxu0 %v14227_v63  ;;  %12369 = vmatpush3.bf16.msra.mxu1 %v14228_v0  ;;  %v14276_v63 = vld [vmem:[#allocation2 + $0xf98] ss:$36 sps:$4 sm:$0xff]   ;;  %v14277_v0 = vld [vmem:[#allocation2 + $0x1460] ss:$36 sps:$4 sm:$0xff]  }
 0x459   :  { %12348 = vmatprep.subr.bf16.mxu0 %v14229_v2  ;;  %12370 = vmatprep.subr.bf16.mxu1 %v14230_v3  ;;  %v14278_v2 = vld [vmem:[#allocation2 + $0x18e0] ss:$36 sps:$4 sm:$0xff]  }
 0x45a   :  { %v14279_v3 = vld [vmem:[#allocation2 + $0x1220] ss:$36 sps:$4 sm:$0xff]  }
 0x45c   :  { %12349 = vmatpush3.bf16.msra.mxu0 %v14231_v58  ;;  %12371 = vmatpush3.bf16.msra.mxu1 %v14232_v17  ;;  %v14280_v58 = vld [vmem:[#allocation2 + $0x16a0] ss:$36 sps:$4 sm:$0xff]   ;;  %v14281_v17 = vld [vmem:[#allocation2 + $0x14a8] ss:$36 sps:$4 sm:$0xff]  }
 0x45d   :  { %12350 = vmatprep.subr.bf16.mxu0 %v14233_v4  ;;  %12372 = vmatprep.subr.bf16.mxu1 %v14234_v5  ;;  %v14282_v4 = vld [vmem:[#allocation2 + $0x1928] ss:$36 sps:$4 sm:$0xff]  }
 0x45e   :  { %v14283_v5 = vld [vmem:[#allocation2 + $0x1268] ss:$36 sps:$4 sm:$0xff]  }
 0x460   :  { %12351 = vmatpush3.bf16.msra.mxu0 %v14235_v6  ;;  %12373 = vmatpush3.bf16.msra.mxu1 %v14236_v7  ;;  %v14284_v6 = vld [vmem:[#allocation2 + $0x16e8] ss:$36 sps:$4 sm:$0xff]   ;;  %v14285_v7 = vld [vmem:[#allocation2 + $0x14f0] ss:$36 sps:$4 sm:$0xff]  }
 0x461   :  { %12352 = vmatprep.subr.bf16.mxu0 %v14237_v8  ;;  %12374 = vmatprep.subr.bf16.mxu1 %v14238_v9  ;;  %v14286_v8 = vld [vmem:[#allocation2 + $0x1970] ss:$36 sps:$4 sm:$0xff]  }
 0x462   :  { %v14287_v9 = vld [vmem:[#allocation2 + $0x12b0] ss:$36 sps:$4 sm:$0xff]  }
 0x464   :  { %12353 = vmatpush3.bf16.msra.mxu0 %v14239_v10  ;;  %12375 = vmatpush3.bf16.msra.mxu1 %v14240_v11  ;;  %v14288_v10 = vld [vmem:[#allocation2 + $0x1730] ss:$36 sps:$4 sm:$0xff]   ;;  %v14291_v11 = vld [vmem:[#allocation2 + $0x12f8] ss:$36 sps:$4 sm:$0xff]  }
 0x465   :  { %12354 = vmatprep.subr.bf16.mxu0 %v14241_v14  ;;  %12376 = vmatprep.subr.bf16.mxu1 %v14242_v15  ;;  %v14292_v14 = vld [vmem:[#allocation2 + $0x1778] ss:$36 sps:$4 sm:$0xff]   ;;  %v14293_v15 = vld [vmem:[#allocation2 + $0x1580] ss:$36 sps:$4 sm:$0xff]  }
 0x468   :  { %12355 = vmatpush3.bf16.msra.mxu0 %v14243_v16  ;;  %12377 = vmatpush3.bf16.msra.mxu1 %v14244_v18  ;;  %v14294_v16 = vld [vmem:[#allocation2 + $0x1a00] ss:$36 sps:$4 sm:$0xff]   ;;  %v14297_v18 = vld [vmem:[#allocation2 + $0x15c8] ss:$36 sps:$4 sm:$0xff]  }
 0x469   :  { %12384 = vmatprep.subr.bf16.mxu0 %v14245_v19  ;;  %12406 = vmatprep.subr.bf16.mxu1 %v14246_v20  ;;  %v14298_v19 = vld [vmem:[#allocation2 + $0x1a48] ss:$36 sps:$4 sm:$0xff]  }
 0x46a   :  { %v14299_v20 = vld [vmem:[#allocation2 + $0x1388] ss:$36 sps:$4 sm:$0xff]  }
 0x46b   :  { %8728 = vmatmul.mubr.bf16.vlgmr.msra.gmra.mrb[8].mxu0 %v14928_v54  ;;  %8768 = vmatmul.mubr.bf16.vlgmr.msra.gmra.mrb[8].mxu1 %v14937_v12  ;;  %v14257_v54 = vld [vmem:[#allocation2 + $0xc38] ss:$36 sps:$4 sm:$0xff]  }
 0x46c   :  { %12385 = vmatpush3.bf16.msra.mxu0 %v14247_v23  ;;  %12407 = vmatpush3.bf16.msra.mxu1 %v14248_v24  ;;  %v14258_v12 = vld [vmem:[#allocation2 + $0x10b8] ss:$36 sps:$4 sm:$0xff]   ;;  %v14300_v23 = vld [vmem:[#allocation2 + $0x1808] ss:$36 sps:$4 sm:$0xff]   ;;  %v14301_v24 = vld [vmem:[#allocation2 + $0x1610] ss:$36 sps:$4 sm:$0xff]  }
 0x46d   :  { %12386 = vmatprep.subr.bf16.mxu0 %v14249_v28  ;;  %12408 = vmatprep.subr.bf16.mxu1 %v14250_v29  ;;  %v14302_v28 = vld [vmem:[#allocation2 + $0x1a90] ss:$36 sps:$4 sm:$0xff]  }
 0x46e   :  { %8807 = vmatprep.mubr.bf16.mxu0 %v14960_v26  ;;  %8847 = vmatprep.mubr.bf16.mxu1 %v14971_v22  ;;  %v14263_v26 = vld [vmem:[#allocation2 + $0xa40] ss:$36 sps:$4 sm:$0xff]   ;;  %v14303_v29 = vld [vmem:[#allocation2 + $0x13d0] ss:$36 sps:$4 sm:$0xff]  }
 0x46f   :  { %v14264_v22 = vld [vmem:[#allocation2 + $0xec0] ss:$36 sps:$4 sm:$0xff]  }
 0x470   :  { %12387 = vmatpush3.bf16.msra.mxu0 %v14251_v30  ;;  %12409 = vmatpush3.bf16.msra.mxu1 %v14252_v31  ;;  %v14304_v30 = vld [vmem:[#allocation2 + $0x1850] ss:$36 sps:$4 sm:$0xff]   ;;  %v14305_v31 = vld [vmem:[#allocation2 + $0x1658] ss:$36 sps:$4 sm:$0xff]  }
 0x471   :  { %12388 = vmatprep.subr.bf16.mxu0 %v14253_v32  ;;  %12410 = vmatprep.subr.bf16.mxu1 %v14254_v34  ;;  %v14306_v32 = vld [vmem:[#allocation2 + $0x1ad8] ss:$36 sps:$4 sm:$0xff]  }
 0x472   :  { %v14307_v34 = vld [vmem:[#allocation2 + $0x1418] ss:$36 sps:$4 sm:$0xff]  }
 0x474   :  { %12389 = vmatpush3.bf16.msra.mxu0 %v14255_v35  ;;  %12411 = vmatpush3.bf16.msra.mxu1 %v14256_v36  ;;  %v14308_v35 = vld [vmem:[#allocation2 + $0x1898] ss:$36 sps:$4 sm:$0xff]   ;;  %v14309_v36 = vld [vmem:[#allocation2 + $0x1d60] ss:$36 sps:$4 sm:$0xff]  }
 0x475   :  { %12390 = vmatprep.subr.bf16.mxu0 %v14257_v54  ;;  %12412 = vmatprep.subr.bf16.mxu1 %v14258_v12  ;;  %v14310_v54 = vld [vmem:[#allocation2 + $0x21e0] ss:$36 sps:$4 sm:$0xff]  }
 0x476   :  { %v14311_v12 = vld [vmem:[#allocation2 + $0x1b20] ss:$36 sps:$4 sm:$0xff]  }
 0x478   :  { %12391 = vmatpush3.bf16.msra.mxu0 %v14259_v37  ;;  %12413 = vmatpush3.bf16.msra.mxu1 %v14260_v38  ;;  %v14312_v37 = vld [vmem:[#allocation2 + $0x1fa0] ss:$36 sps:$4 sm:$0xff]   ;;  %v14313_v38 = vld [vmem:[#allocation2 + $0x1da8] ss:$36 sps:$4 sm:$0xff]  }
 0x479   :  { %12392 = vmatprep.subr.bf16.mxu0 %v14261_v39  ;;  %12414 = vmatprep.subr.bf16.mxu1 %v14262_v40  ;;  %v14314_v39 = vld [vmem:[#allocation2 + $0x2228] ss:$36 sps:$4 sm:$0xff]  }
 0x47a   :  { %v14315_v40 = vld [vmem:[#allocation2 + $0x1b68] ss:$36 sps:$4 sm:$0xff]  }
 0x47c   :  { %12393 = vmatpush3.bf16.msra.mxu0 %v14263_v26  ;;  %12415 = vmatpush3.bf16.msra.mxu1 %v14264_v22  ;;  %v14316_v26 = vld [vmem:[#allocation2 + $0x1fe8] ss:$36 sps:$4 sm:$0xff]   ;;  %v14317_v22 = vld [vmem:[#allocation2 + $0x1df0] ss:$36 sps:$4 sm:$0xff]  }
 0x47d   :  { %12394 = vmatprep.subr.bf16.mxu0 %v14265_v50  ;;  %12416 = vmatprep.subr.bf16.mxu1 %v14266_v51  ;;  %v14318_v50 = vld [vmem:[#allocation2 + $0x2270] ss:$36 sps:$4 sm:$0xff]  }
 0x47e   :  { %v14319_v51 = vld [vmem:[#allocation2 + $0x1bb0] ss:$36 sps:$4 sm:$0xff]  }
 0x480   :  { %12395 = vmatpush3.bf16.msra.mxu0 %v14267_v49  ;;  %12417 = vmatpush3.bf16.msra.mxu1 %v14268_v53  ;;  %v14320_v49 = vld [vmem:[#allocation2 + $0x2030] ss:$36 sps:$4 sm:$0xff]   ;;  %v14323_v53 = vld [vmem:[#allocation2 + $0x1bf8] ss:$36 sps:$4 sm:$0xff]  }
 0x481   :  { %12396 = vmatprep.subr.bf16.mxu0 %v14269_v55  ;;  %12418 = vmatprep.subr.bf16.mxu1 %v14270_v56  ;;  %v14324_v55 = vld [vmem:[#allocation2 + $0x2078] ss:$36 sps:$4 sm:$0xff]   ;;  %v14325_v56 = vld [vmem:[#allocation2 + $0x1e80] ss:$36 sps:$4 sm:$0xff]  }
 0x484   :  { %12397 = vmatpush3.bf16.msra.mxu0 %v14271_v57  ;;  %12419 = vmatpush3.bf16.msra.mxu1 %v14272_v59  ;;  %v14326_v57 = vld [vmem:[#allocation2 + $0x2300] ss:$36 sps:$4 sm:$0xff]   ;;  %v14329_v59 = vld [vmem:[#allocation2 + $0x1ec8] ss:$36 sps:$4 sm:$0xff]  }
 0x485   :  { %12398 = vmatprep.subr.bf16.mxu0 %v14273_v60  ;;  %12420 = vmatprep.subr.bf16.mxu1 %v14274_v61  ;;  %v14330_v60 = vld [vmem:[#allocation2 + $0x2348] ss:$36 sps:$4 sm:$0xff]  }
 0x486   :  { %v14331_v61 = vld [vmem:[#allocation2 + $0x1c88] ss:$36 sps:$4 sm:$0xff]  }
 0x488   :  { %12399 = vmatpush3.bf16.msra.mxu0 %v14275_v62  ;;  %12421 = vmatpush3.bf16.msra.mxu1 %v14276_v63  ;;  %v14332_v62 = vld [vmem:[#allocation2 + $0x2108] ss:$36 sps:$4 sm:$0xff]   ;;  %v14333_v63 = vld [vmem:[#allocation2 + $0x1f10] ss:$36 sps:$4 sm:$0xff]  }
 0x489   :  { %12428 = vmatprep.subr.bf16.mxu0 %v14277_v0  ;;  %12450 = vmatprep.subr.bf16.mxu1 %v14278_v2  ;;  %v14334_v0 = vld [vmem:[#allocation2 + $0x2390] ss:$36 sps:$4 sm:$0xff]   ;;  %v1368_v2 = vsub.s32 1, %v14919_v42 }
 0x48b   :  { %8808 = vmatmul.mubr.bf16.vlgmr.msra.gmra.mrb[12].mxu0 %v14954_v25  ;;  %8848 = vmatmul.mubr.bf16.vlgmr.msra.gmra.mrb[12].mxu1 %v14967_v33  ;;  %v14289_v25 = vld [vmem:[#allocation2 + $0x1538] ss:$36 sps:$4 sm:$0xff]  }
 0x48c   :  { %12429 = vmatpush3.bf16.msra.mxu0 %v14279_v3  ;;  %12451 = vmatpush3.bf16.msra.mxu1 %v14280_v58  ;;  %v14290_v33 = vld [vmem:[#allocation2 + $0x19b8] ss:$36 sps:$4 sm:$0xff]   ;;  %v15094_v3 = vld [vmem:[#allocation4] sm:$0xff]  ;;  %v14335_v58 = vld [vmem:[#allocation2 + $0x1cd0] ss:$36 sps:$4 sm:$0xff]  }
 0x48d   :  { %12430 = vmatprep.subr.bf16.mxu0 %v14281_v17  ;;  %12452 = vmatprep.subr.bf16.mxu1 %v14282_v4  ;;  %v14336_v17 = vld [vmem:[#allocation2 + $0x2150] ss:$36 sps:$4 sm:$0xff]   ;;  %v14337_v4 = vld [vmem:[#allocation2 + $0x1f58] ss:$36 sps:$4 sm:$0xff]  }
 0x48e   :  { %8887 = vmatprep.mubr.bf16.mxu0 %v14988_v52  ;;  %8927 = vmatprep.mubr.bf16.mxu1 %v15001_v41  ;;  %v14295_v52 = vld [vmem:[#allocation2 + $0x1340] ss:$36 sps:$4 sm:$0xff]  }
 0x48f   :  { %v14296_v41 = vld [vmem:[#allocation2 + $0x17c0] ss:$36 sps:$4 sm:$0xff]  }
 0x490   :  { %12431 = vmatpush3.bf16.msra.mxu0 %v14283_v5  ;;  %12453 = vmatpush3.bf16.msra.mxu1 %v14284_v6  ;;  %v14338_v5 = vld [vmem:[#allocation2 + $0x23d8] ss:$36 sps:$4 sm:$0xff]   ;;  %v1369_v6 = vrot.slane %v15094_v3, %v1368_v2 }
 0x491   :  { %12432 = vmatprep.subr.bf16.mxu0 %v14285_v7  ;;  %12454 = vmatprep.subr.bf16.mxu1 %v14286_v8  ;;  %v14339_v7 = vld [vmem:[#allocation2 + $0x1d18] ss:$36 sps:$4 sm:$0xff]  }
 0x492   :  { %v14340_v8 = vld [vmem:[#allocation2 + $0x2198] ss:$36 sps:$4 sm:$0xff]  }
 0x494   :  { %12433 = vmatpush3.bf16.msra.mxu0 %v14287_v9  ;;  %12455 = vmatpush3.bf16.msra.mxu1 %v14288_v10  ;;  %v14343_v9 = vld [vmem:[#allocation6 + $0x4] ss:$16 sps:$4 sm:$0xff]   ;;  %v14346_v10 = vld [vmem:[#allocation6 + $0xc] ss:$16 sps:$4 sm:$0xff]  }
 0x495   :  { %12434 = vmatprep.subr.bf16.mxu0 %v14289_v25  ;;  %12456 = vmatprep.subr.bf16.mxu1 %v14290_v33  ;;  %v12517_v25 = vadd.f32 %v15057_v47, %v1369_v6  ;;  %v14341_v33 = vld [vmem:[#allocation6] ss:$16 sps:$4 sm:$0xff]   ;;  %v14355_v47 = vld [vmem:[#allocation6 + $0x44] ss:$16 sps:$4 sm:$0xff]   ;;  %v14424_v6 = vld [vmem:[#allocation6 + $0x1ac] ss:$16 sps:$4 sm:$0xff]  }
 0x498   :  { %12435 = vmatpush3.bf16.msra.mxu0 %v14291_v11  ;;  %12457 = vmatpush3.bf16.msra.mxu1 %v14292_v14  ;;  %v14344_v11 = vld [vmem:[#allocation6 + $0x8] ss:$16 sps:$4 sm:$0xff]   ;;  %v9016_v14 = vpack.c.bf16 %v12517_v25, %v12517_v25  ;;  %v14430_v25 = vld [vmem:[#allocation6 + $0x1cc] ss:$16 sps:$4 sm:$0xff]  }
 0x499   :  { %12436 = vmatprep.subr.bf16.mxu0 %v14293_v15  ;;  %12458 = vmatprep.subr.bf16.mxu1 %v14294_v16  ;;  %v14349_v15 = vld [vmem:[#allocation6 + $0x24] ss:$16 sps:$4 sm:$0xff]   ;;  %v14352_v16 = vld [vmem:[#allocation6 + $0x2c] ss:$16 sps:$4 sm:$0xff]  }
 0x49c   :  { %12437 = vmatpush3.bf16.msra.mxu0 %v14295_v52  ;;  %12459 = vmatpush3.bf16.msra.mxu1 %v14296_v41  ;;  %v14347_v52 = vld [vmem:[#allocation6 + $0x20] ss:$16 sps:$4 sm:$0xff]   ;;  %v14350_v41 = vld [vmem:[#allocation6 + $0x28] ss:$16 sps:$4 sm:$0xff]  }
 0x49d   :  { %12438 = vmatprep.subr.bf16.mxu0 %v14297_v18  ;;  %12460 = vmatprep.subr.bf16.mxu1 %v14298_v19  ;;  %v14358_v18 = vld [vmem:[#allocation6 + $0x4c] ss:$16 sps:$4 sm:$0xff]   ;;  %v14353_v19 = vld [vmem:[#allocation6 + $0x40] ss:$16 sps:$4 sm:$0xff]  }
 0x4a0   :  { %12439 = vmatpush3.bf16.msra.mxu0 %v14299_v20  ;;  %12461 = vmatpush3.bf16.msra.mxu1 %v14300_v23  ;;  %v14356_v20 = vld [vmem:[#allocation6 + $0x48] ss:$16 sps:$4 sm:$0xff]   ;;  %v14361_v23 = vld [vmem:[#allocation6 + $0x64] ss:$16 sps:$4 sm:$0xff]  }
 0x4a1   :  { %12440 = vmatprep.subr.bf16.mxu0 %v14301_v24  ;;  %12462 = vmatprep.subr.bf16.mxu1 %v14302_v28  ;;  %v14362_v24 = vld [vmem:[#allocation6 + $0x68] ss:$16 sps:$4 sm:$0xff]   ;;  %v14367_v28 = vld [vmem:[#allocation6 + $0x84] ss:$16 sps:$4 sm:$0xff]  }
 0x4a4   :  { %12441 = vmatpush3.bf16.msra.mxu0 %v14303_v29  ;;  %12463 = vmatpush3.bf16.msra.mxu1 %v14304_v30  ;;  %v14370_v29 = vld [vmem:[#allocation6 + $0x8c] ss:$16 sps:$4 sm:$0xff]   ;;  %v14365_v30 = vld [vmem:[#allocation6 + $0x80] ss:$16 sps:$4 sm:$0xff]  }
 0x4a5   :  { %12442 = vmatprep.subr.bf16.mxu0 %v14305_v31  ;;  %12464 = vmatprep.subr.bf16.mxu1 %v14306_v32  ;;  %v14368_v31 = vld [vmem:[#allocation6 + $0x88] ss:$16 sps:$4 sm:$0xff]   ;;  %v14373_v32 = vld [vmem:[#allocation6 + $0xa4] ss:$16 sps:$4 sm:$0xff]  }
 0x4a8   :  { %12443 = vmatpush3.bf16.msra.mxu0 %v14307_v34  ;;  %12465 = vmatpush3.bf16.msra.mxu1 %v14308_v35  ;;  %v14376_v34 = vld [vmem:[#allocation6 + $0xac] ss:$16 sps:$4 sm:$0xff]   ;;  %v14371_v35 = vld [vmem:[#allocation6 + $0xa0] ss:$16 sps:$4 sm:$0xff]  }
 0x4a9   :  { %12472 = vmatprep.subr.bf16.mxu0 %v14309_v36  ;;  %12494 = vmatprep.subr.bf16.mxu1 %v14310_v54  ;;  %v14374_v36 = vld [vmem:[#allocation6 + $0xa8] ss:$16 sps:$4 sm:$0xff]   ;;  %v14379_v54 = vld [vmem:[#allocation6 + $0xc4] ss:$16 sps:$4 sm:$0xff]  }
 0x4ab   :  { %8888 = vmatmul.mubr.bf16.vlgmr.msra.gmra.mrb[16].mxu0 %v14984_v46  ;;  %8928 = vmatmul.mubr.bf16.vlgmr.msra.gmra.mrb[16].mxu1 %v14997_v1  ;;  %v14321_v46 = vld [vmem:[#allocation2 + $0x1e38] ss:$36 sps:$4 sm:$0xff]  }
 0x4ac   :  { %12473 = vmatpush3.bf16.msra.mxu0 %v14311_v12  ;;  %12495 = vmatpush3.bf16.msra.mxu1 %v14312_v37  ;;  %v14322_v1 = vld [vmem:[#allocation2 + $0x22b8] ss:$36 sps:$4 sm:$0xff]  }
 0x4ad   :  { %12474 = vmatprep.subr.bf16.mxu0 %v14313_v38  ;;  %12496 = vmatprep.subr.bf16.mxu1 %v14314_v39  ;;  %v14382_v12 = vld [vmem:[#allocation6 + $0xcc] ss:$16 sps:$4 sm:$0xff]   ;;  %v14377_v37 = vld [vmem:[#allocation6 + $0xc0] ss:$16 sps:$4 sm:$0xff]   ;;  %v14380_v38 = vld [vmem:[#allocation6 + $0xc8] ss:$16 sps:$4 sm:$0xff]  }
 0x4ae   :  { %8967 = vmatprep.mubr.bf16.mxu0 %v15018_v27  ;;  %9007 = vmatprep.mubr.bf16.mxu1 %v15031_v13  ;;  %v14327_v27 = vld [vmem:[#allocation2 + $0x1c40] ss:$36 sps:$4 sm:$0xff]  }
 0x4af   :  { %v14328_v13 = vld [vmem:[#allocation2 + $0x20c0] ss:$36 sps:$4 sm:$0xff]  }
 0x4b0   :  { %12475 = vmatpush3.bf16.msra.mxu0 %v14315_v40  ;;  %12497 = vmatpush3.bf16.msra.mxu1 %v14316_v26  ;;  %v14385_v39 = vld [vmem:[#allocation6 + $0xe4] ss:$16 sps:$4 sm:$0xff]   ;;  %v14388_v40 = vld [vmem:[#allocation6 + $0xec] ss:$16 sps:$4 sm:$0xff]   ;;  %v14383_v26 = vld [vmem:[#allocation6 + $0xe0] ss:$16 sps:$4 sm:$0xff]  }
 0x4b1   :  { %12476 = vmatprep.subr.bf16.mxu0 %v14317_v22  ;;  %12498 = vmatprep.subr.bf16.mxu1 %v14318_v50  ;;  %v14386_v22 = vld [vmem:[#allocation6 + $0xe8] ss:$16 sps:$4 sm:$0xff]   ;;  %v14391_v50 = vld [vmem:[#allocation6 + $0x104] ss:$16 sps:$4 sm:$0xff]  }
 0x4b4   :  { %12477 = vmatpush3.bf16.msra.mxu0 %v14319_v51  ;;  %12499 = vmatpush3.bf16.msra.mxu1 %v14320_v49  ;;  %v14394_v51 = vld [vmem:[#allocation6 + $0x10c] ss:$16 sps:$4 sm:$0xff]   ;;  %v14389_v49 = vld [vmem:[#allocation6 + $0x100] ss:$16 sps:$4 sm:$0xff]  }
 0x4b5   :  { %12478 = vmatprep.subr.bf16.mxu0 %v14321_v46  ;;  %12500 = vmatprep.subr.bf16.mxu1 %v14322_v1  ;;  %v14392_v46 = vld [vmem:[#allocation6 + $0x108] ss:$16 sps:$4 sm:$0xff]   ;;  %v14397_v1 = vld [vmem:[#allocation6 + $0x124] ss:$16 sps:$4 sm:$0xff]  }
 0x4b8   :  { %12479 = vmatpush3.bf16.msra.mxu0 %v14323_v53  ;;  %12501 = vmatpush3.bf16.msra.mxu1 %v14324_v55  ;;  %v14400_v53 = vld [vmem:[#allocation6 + $0x12c] ss:$16 sps:$4 sm:$0xff]   ;;  %v14395_v55 = vld [vmem:[#allocation6 + $0x120] ss:$16 sps:$4 sm:$0xff]  }
 0x4b9   :  { %12480 = vmatprep.subr.bf16.mxu0 %v14325_v56  ;;  %12502 = vmatprep.subr.bf16.mxu1 %v14326_v57  ;;  %v14398_v56 = vld [vmem:[#allocation6 + $0x128] ss:$16 sps:$4 sm:$0xff]   ;;  %v14403_v57 = vld [vmem:[#allocation6 + $0x144] ss:$16 sps:$4 sm:$0xff]  }
 0x4bc   :  { %12481 = vmatpush3.bf16.msra.mxu0 %v14327_v27  ;;  %12503 = vmatpush3.bf16.msra.mxu1 %v14328_v13  ;;  %v14406_v27 = vld [vmem:[#allocation6 + $0x14c] ss:$16 sps:$4 sm:$0xff]   ;;  %v14401_v13 = vld [vmem:[#allocation6 + $0x140] ss:$16 sps:$4 sm:$0xff]  }
 0x4bd   :  { %12482 = vmatprep.subr.bf16.mxu0 %v14329_v59  ;;  %12504 = vmatprep.subr.bf16.mxu1 %v14330_v60  ;;  %v14404_v59 = vld [vmem:[#allocation6 + $0x148] ss:$16 sps:$4 sm:$0xff]   ;;  %v14409_v60 = vld [vmem:[#allocation6 + $0x164] ss:$16 sps:$4 sm:$0xff]  }
 0x4c0   :  { %12483 = vmatpush3.bf16.msra.mxu0 %v14331_v61  ;;  %12505 = vmatpush3.bf16.msra.mxu1 %v14332_v62  ;;  %v14412_v61 = vld [vmem:[#allocation6 + $0x16c] ss:$16 sps:$4 sm:$0xff]   ;;  %v14407_v62 = vld [vmem:[#allocation6 + $0x160] ss:$16 sps:$4 sm:$0xff]  }
 0x4c1   :  { %12484 = vmatprep.subr.bf16.mxu0 %v14333_v63  ;;  %12506 = vmatprep.subr.bf16.mxu1 %v14334_v0  ;;  %v14410_v63 = vld [vmem:[#allocation6 + $0x168] ss:$16 sps:$4 sm:$0xff]   ;;  %v14415_v0 = vld [vmem:[#allocation6 + $0x184] ss:$16 sps:$4 sm:$0xff]  }
 0x4c4   :  { %12485 = vmatpush3.bf16.msra.mxu0 %v14335_v58  ;;  %12507 = vmatpush3.bf16.msra.mxu1 %v14336_v17  ;;  %v14418_v58 = vld [vmem:[#allocation6 + $0x18c] ss:$16 sps:$4 sm:$0xff]   ;;  %v14413_v17 = vld [vmem:[#allocation6 + $0x180] ss:$16 sps:$4 sm:$0xff]  }
 0x4c5   :  { %12486 = vmatprep.subr.bf16.mxu0 %v14337_v4  ;;  %12508 = vmatprep.subr.bf16.mxu1 %v14338_v5  ;;  %v14416_v4 = vld [vmem:[#allocation6 + $0x188] ss:$16 sps:$4 sm:$0xff]   ;;  %v14421_v5 = vld [vmem:[#allocation6 + $0x1a4] ss:$16 sps:$4 sm:$0xff]  }
 0x4c8   :  { %12487 = vmatpush3.bf16.msra.mxu0 %v14339_v7  ;;  %12509 = vmatpush3.bf16.msra.mxu1 %v14340_v8  ;;  %v14419_v7 = vld [vmem:[#allocation6 + $0x1a0] ss:$16 sps:$4 sm:$0xff]   ;;  %v1364_v8 = vsub.s32 0, %v14919_v42 }
 0x4c9   :  { %10581 = vmatprep.subr.bf16.mxu0 %v14343_v9  ;;  %10745 = vmatprep.subr.bf16.mxu1 %v14346_v10  ;;  %v14422_v9 = vld [vmem:[#allocation6 + $0x1a8] ss:$16 sps:$4 sm:$0xff]   ;;  %v14427_v10 = vld [vmem:[#allocation6 + $0x1c4] ss:$16 sps:$4 sm:$0xff]  }
 0x4cb   :  { %8968 = vmatmul.mubr.bf16.vlgmr.msra.gmra.mrb[20].mxu0 %v15014_v21  ;;  %9008 = vmatmul.mubr.bf16.vlgmr.msra.gmra.mrb[20].mxu1 %v15027_v45  ;;  %v14364_v21 = vld [vmem:[#allocation6 + $0x6c] ss:$16 sps:$4 sm:$0xff]   ;;  %v14359_v45 = vld [vmem:[#allocation6 + $0x60] ss:$16 sps:$4 sm:$0xff]  }
 0x4cc   :  { %10582 = vmatpush1.bf16.msra.mxu0 %v14341_v33  ;;  %10613 = vmatprep.mubr.bf16.mxu0 %v9016_v14  ;;  %v1376_v33 = vsub.s32 3, %v14919_v42 }
 0x4cd   :  { %10746 = vmatpush1.bf16.msra.mxu1 %v14344_v11  ;;  %10777 = vmatprep.mubr.bf16.mxu1 %v9016_v14  ;;  %v14425_v11 = vld [vmem:[#allocation6 + $0x1c0] ss:$16 sps:$4 sm:$0xff]   ;;  %v1365_v14 = vrot.slane %v15094_v3, %v1364_v8 }
 0x4ce   :  { %10583 = vmatprep.subr.bf16.mxu0 %v14349_v15  ;;  %10747 = vmatprep.subr.bf16.mxu1 %v14352_v16  ;;  %v14428_v15 = vld [vmem:[#allocation6 + $0x1c8] ss:$16 sps:$4 sm:$0xff]   ;;  %v14433_v16 = vld [vmem:[#allocation6 + $0x1e4] ss:$16 sps:$4 sm:$0xff]  }
 0x4d0   :  { %10584 = vmatpush1.bf16.msra.mxu0 %v14347_v52  ;;  %v14436_v52 = vld [vmem:[#allocation6 + $0x1ec] ss:$16 sps:$4 sm:$0xff]  }
 0x4d1   :  { %10748 = vmatpush1.bf16.msra.mxu1 %v14350_v41  ;;  %10585 = vmatprep.subr.bf16.mxu0 %v14355_v47  ;;  %v1377_v41 = vrot.slane %v15094_v3, %v1376_v33  ;;  %v14431_v47 = vld [vmem:[#allocation6 + $0x1e0] ss:$16 sps:$4 sm:$0xff]  }
 0x4d2   :  { %10749 = vmatprep.subr.bf16.mxu1 %v14358_v18  ;;  %v12516_v18 = vadd.f32 %v15053_v43, %v1365_v14  ;;  %v14443_v43 = vld [vmem:[#allocation6 + $0x220] ss:$16 sps:$4 sm:$0xff]   ;;  %v14494_v14 = vld [vmem:[#allocation6 + $0x328] ss:$16 sps:$4 sm:$0xff]  }
 0x4d4   :  { %10586 = vmatpush1.bf16.msra.mxu0 %v14353_v19  ;;  %v14434_v19 = vld [vmem:[#allocation6 + $0x1e8] ss:$16 sps:$4 sm:$0xff]  }
 0x4d5   :  { %10750 = vmatpush1.bf16.msra.mxu1 %v14356_v20  ;;  %10587 = vmatprep.subr.bf16.mxu0 %v14361_v23  ;;  %v14439_v20 = vld [vmem:[#allocation6 + $0x204] ss:$16 sps:$4 sm:$0xff]   ;;  %v14442_v23 = vld [vmem:[#allocation6 + $0x20c] ss:$16 sps:$4 sm:$0xff]  }
 0x4d6   :  { %10751 = vmatprep.subr.bf16.mxu1 %v14364_v21  ;;  %v12519_v21 = vadd.f32 %v15059_v48, %v1377_v41  ;;  %v14454_v48 = vld [vmem:[#allocation6 + $0x24c] ss:$16 sps:$4 sm:$0xff]   ;;  %v14500_v41 = vld [vmem:[#allocation6 + $0x348] ss:$16 sps:$4 sm:$0xff]  }
 0x4d8   :  { %10588 = vmatpush1.bf16.msra.mxu0 %v14359_v45  ;;  %v14437_v45 = vld [vmem:[#allocation6 + $0x200] ss:$16 sps:$4 sm:$0xff]  }
 0x4d9   :  { %10752 = vmatpush1.bf16.msra.mxu1 %v14362_v24  ;;  %10589 = vmatprep.subr.bf16.mxu0 %v14367_v28  ;;  %v9015_v24 = vpack.c.bf16 %v12516_v18, %v12516_v18  ;;  %v14440_v28 = vld [vmem:[#allocation6 + $0x208] ss:$16 sps:$4 sm:$0xff]   ;;  %v14508_v18 = vld [vmem:[#allocation6 + $0x36c] ss:$16 sps:$4 sm:$0xff]  }
 0x4da   :  { %10753 = vmatprep.subr.bf16.mxu1 %v14370_v29  ;;  %v14445_v29 = vld [vmem:[#allocation6 + $0x224] ss:$16 sps:$4 sm:$0xff]  }
 0x4dc   :  { %10590 = vmatpush1.bf16.msra.mxu0 %v14365_v30  ;;  %v9018_v30 = vpack.c.bf16 %v12519_v21, %v12519_v21  ;;  %v14514_v21 = vld [vmem:[#allocation6 + $0x38c] ss:$16 sps:$4 sm:$0xff]  }
 0x4dd   :  { %10754 = vmatpush1.bf16.msra.mxu1 %v14368_v31  ;;  %10591 = vmatprep.subr.bf16.mxu0 %v14373_v32  ;;  %v14448_v31 = vld [vmem:[#allocation6 + $0x22c] ss:$16 sps:$4 sm:$0xff]   ;;  %v14446_v32 = vld [vmem:[#allocation6 + $0x228] ss:$16 sps:$4 sm:$0xff]  }
 0x4de   :  { %10755 = vmatprep.subr.bf16.mxu1 %v14376_v34  ;;  %v14451_v34 = vld [vmem:[#allocation6 + $0x244] ss:$16 sps:$4 sm:$0xff]  }
 0x4e0   :  { %10592 = vmatpush1.bf16.msra.mxu0 %v14371_v35  ;;  %v14449_v35 = vld [vmem:[#allocation6 + $0x240] ss:$16 sps:$4 sm:$0xff]  }
 0x4e1   :  { %10756 = vmatpush1.bf16.msra.mxu1 %v14374_v36  ;;  %10593 = vmatprep.subr.bf16.mxu0 %v14379_v54  ;;  %v14452_v36 = vld [vmem:[#allocation6 + $0x248] ss:$16 sps:$4 sm:$0xff]   ;;  %v14457_v54 = vld [vmem:[#allocation6 + $0x264] ss:$16 sps:$4 sm:$0xff]  }
 0x4e2   :  { %10757 = vmatprep.subr.bf16.mxu1 %v14382_v12  ;;  %v14460_v12 = vld [vmem:[#allocation6 + $0x26c] ss:$16 sps:$4 sm:$0xff]  }
 0x4e4   :  { %10594 = vmatpush1.bf16.msra.mxu0 %v14377_v37  ;;  %v14455_v37 = vld [vmem:[#allocation6 + $0x260] ss:$16 sps:$4 sm:$0xff]  }
 0x4e5   :  { %10758 = vmatpush1.bf16.msra.mxu1 %v14380_v38  ;;  %10595 = vmatprep.subr.bf16.mxu0 %v14385_v39  ;;  %v14458_v38 = vld [vmem:[#allocation6 + $0x268] ss:$16 sps:$4 sm:$0xff]   ;;  %v14463_v39 = vld [vmem:[#allocation6 + $0x284] ss:$16 sps:$4 sm:$0xff]  }
 0x4e6   :  { %10759 = vmatprep.subr.bf16.mxu1 %v14388_v40  ;;  %v14466_v40 = vld [vmem:[#allocation6 + $0x28c] ss:$16 sps:$4 sm:$0xff]  }
 0x4e8   :  { %10596 = vmatpush1.bf16.msra.mxu0 %v14383_v26  ;;  %v14461_v26 = vld [vmem:[#allocation6 + $0x280] ss:$16 sps:$4 sm:$0xff]  }
 0x4e9   :  { %10760 = vmatpush1.bf16.msra.mxu1 %v14386_v22  ;;  %10597 = vmatprep.subr.bf16.mxu0 %v14391_v50  ;;  %v14464_v22 = vld [vmem:[#allocation6 + $0x288] ss:$16 sps:$4 sm:$0xff]   ;;  %v14469_v50 = vld [vmem:[#allocation6 + $0x2a4] ss:$16 sps:$4 sm:$0xff]  }
 0x4ea   :  { %10761 = vmatprep.subr.bf16.mxu1 %v14394_v51  ;;  %v14472_v51 = vld [vmem:[#allocation6 + $0x2ac] ss:$16 sps:$4 sm:$0xff]  }
 0x4ec   :  { %10598 = vmatpush1.bf16.msra.mxu0 %v14389_v49  ;;  %v14467_v49 = vld [vmem:[#allocation6 + $0x2a0] ss:$16 sps:$4 sm:$0xff]  }
 0x4ed   :  { %10762 = vmatpush1.bf16.msra.mxu1 %v14392_v46  ;;  %10599 = vmatprep.subr.bf16.mxu0 %v14397_v1  ;;  %v14470_v46 = vld [vmem:[#allocation6 + $0x2a8] ss:$16 sps:$4 sm:$0xff]   ;;  %v14475_v1 = vld [vmem:[#allocation6 + $0x2c4] ss:$16 sps:$4 sm:$0xff]  }
 0x4ee   :  { %10763 = vmatprep.subr.bf16.mxu1 %v14400_v53 }
 0x4f0   :  { %10600 = vmatpush1.bf16.msra.mxu0 %v14395_v55 }
 0x4f1   :  { %10764 = vmatpush1.bf16.msra.mxu1 %v14398_v56  ;;  %10601 = vmatprep.subr.bf16.mxu0 %v14403_v57  ;;  %v14478_v56 = vld [vmem:[#allocation6 + $0x2cc] ss:$16 sps:$4 sm:$0xff]  }
 0x4f2   :  { %10765 = vmatprep.subr.bf16.mxu1 %v14406_v27 }
 0x4f4   :  { %10602 = vmatpush1.bf16.msra.mxu0 %v14401_v13 }
 0x4f5   :  { %10766 = vmatpush1.bf16.msra.mxu1 %v14404_v59  ;;  %10603 = vmatprep.subr.bf16.mxu0 %v14409_v60  ;;  %v14473_v60 = vld [vmem:[#allocation6 + $0x2c0] ss:$16 sps:$4 sm:$0xff]  }
 0x4f6   :  { %10767 = vmatprep.subr.bf16.mxu1 %v14412_v61 }
 0x4f8   :  { %10604 = vmatpush1.bf16.msra.mxu0 %v14407_v62 }
 0x4f9   :  { %10768 = vmatpush1.bf16.msra.mxu1 %v14410_v63  ;;  %10605 = vmatprep.subr.bf16.mxu0 %v14415_v0  ;;  %v14476_v63 = vld [vmem:[#allocation6 + $0x2c8] ss:$16 sps:$4 sm:$0xff]   ;;  %v14481_v0 = vld [vmem:[#allocation6 + $0x2e4] ss:$16 sps:$4 sm:$0xff]  }
 0x4fa   :  { %10769 = vmatprep.subr.bf16.mxu1 %v14418_v58  ;;  %v14484_v58 = vld [vmem:[#allocation6 + $0x2ec] ss:$16 sps:$4 sm:$0xff]  }
 0x4fc   :  { %10606 = vmatpush1.bf16.msra.mxu0 %v14413_v17  ;;  %v14479_v17 = vld [vmem:[#allocation6 + $0x2e0] ss:$16 sps:$4 sm:$0xff]  }
 0x4fd   :  { %10770 = vmatpush1.bf16.msra.mxu1 %v14416_v4  ;;  %10607 = vmatprep.subr.bf16.mxu0 %v14421_v5  ;;  %v14482_v4 = vld [vmem:[#allocation6 + $0x2e8] ss:$16 sps:$4 sm:$0xff]   ;;  %v14487_v5 = vld [vmem:[#allocation6 + $0x304] ss:$16 sps:$4 sm:$0xff]  }
 0x4fe   :  { %10771 = vmatprep.subr.bf16.mxu1 %v14424_v6  ;;  %v14490_v6 = vld [vmem:[#allocation6 + $0x30c] ss:$16 sps:$4 sm:$0xff]  }
 0x500   :  { %10608 = vmatpush1.bf16.msra.mxu0 %v14419_v7  ;;  %v14485_v7 = vld [vmem:[#allocation6 + $0x300] ss:$16 sps:$4 sm:$0xff]  }
 0x501   :  { %10772 = vmatpush1.bf16.msra.mxu1 %v14422_v9  ;;  %10609 = vmatprep.subr.bf16.mxu0 %v14427_v10  ;;  %v14488_v9 = vld [vmem:[#allocation6 + $0x308] ss:$16 sps:$4 sm:$0xff]   ;;  %v14493_v10 = vld [vmem:[#allocation6 + $0x324] ss:$16 sps:$4 sm:$0xff]  }
 0x502   :  { %10773 = vmatprep.subr.bf16.mxu1 %v14430_v25  ;;  %v14496_v25 = vld [vmem:[#allocation6 + $0x32c] ss:$16 sps:$4 sm:$0xff]  }
 0x504   :  { %10610 = vmatpush1.bf16.msra.mxu0 %v14425_v11  ;;  %v14491_v11 = vld [vmem:[#allocation6 + $0x320] ss:$16 sps:$4 sm:$0xff]  }
 0x505   :  { %10774 = vmatpush1.bf16.msra.mxu1 %v14428_v15  ;;  %10611 = vmatprep.subr.bf16.mxu0 %v14433_v16  ;;  %v14499_v15 = vld [vmem:[#allocation6 + $0x344] ss:$16 sps:$4 sm:$0xff]   ;;  %v14502_v16 = vld [vmem:[#allocation6 + $0x34c] ss:$16 sps:$4 sm:$0xff]  }
 0x506   :  { %10775 = vmatprep.subr.bf16.mxu1 %v14436_v52  ;;  %v14497_v52 = vld [vmem:[#allocation6 + $0x340] ss:$16 sps:$4 sm:$0xff]  }
 0x508   :  { %10612 = vmatpush1.bf16.msra.mxu0 %v14431_v47  ;;  %v14505_v47 = vld [vmem:[#allocation6 + $0x364] ss:$16 sps:$4 sm:$0xff]  }
 0x509   :  { %10776 = vmatpush1.bf16.msra.mxu1 %v14434_v19  ;;  %10622 = vmatprep.subr.bf16.mxu0 %v14439_v20  ;;  %v14503_v19 = vld [vmem:[#allocation6 + $0x360] ss:$16 sps:$4 sm:$0xff]   ;;  %v14506_v20 = vld [vmem:[#allocation6 + $0x368] ss:$16 sps:$4 sm:$0xff]  }
 0x50a   :  { %10786 = vmatprep.subr.bf16.mxu1 %v14442_v23  ;;  %v14511_v23 = vld [vmem:[#allocation6 + $0x384] ss:$16 sps:$4 sm:$0xff]  }
 0x50b   :  { %10614 = vmatmul.mubr.bf16.vlgmr.msra.gmra.mrb[24].mxu0 %v9015_v24 }
 0x50c   :  { %10778 = vmatmul.mubr.bf16.vlgmr.msra.gmra.mrb[24].mxu1 %v9015_v24  ;;  %10623 = vmatpush1.bf16.msra.mxu0 %v14437_v45  ;;  %v14509_v45 = vld [vmem:[#allocation6 + $0x380] ss:$16 sps:$4 sm:$0xff]   ;;  %v14512_v24 = vld [vmem:[#allocation6 + $0x388] ss:$16 sps:$4 sm:$0xff]  }
 0x50d   :  { %10654 = vmatprep.mubr.bf16.mxu0 %v9018_v30  ;;  %10787 = vmatpush1.bf16.msra.mxu1 %v14440_v28  ;;  %v14517_v28 = vld [vmem:[#allocation6 + $0x3a4] ss:$16 sps:$4 sm:$0xff]  }
 0x50e   :  { %10818 = vmatprep.mubr.bf16.mxu1 %v9018_v30  ;;  %10624 = vmatprep.subr.bf16.mxu0 %v14445_v29  ;;  %v14520_v29 = vld [vmem:[#allocation6 + $0x3ac] ss:$16 sps:$4 sm:$0xff]   ;;  %v14515_v30 = vld [vmem:[#allocation6 + $0x3a0] ss:$16 sps:$4 sm:$0xff]  }
 0x50f   :  { %10788 = vmatprep.subr.bf16.mxu1 %v14448_v31  ;;  %v1372_v31 = vsub.s32 2, %v14919_v42 }
 0x510   :  { %10625 = vmatpush1.bf16.msra.mxu0 %v14443_v43  ;;  %v14518_v43 = vld [vmem:[#allocation6 + $0x3a8] ss:$16 sps:$4 sm:$0xff]  }
 0x511   :  { %10789 = vmatpush1.bf16.msra.mxu1 %v14446_v32  ;;  %10626 = vmatprep.subr.bf16.mxu0 %v14451_v34  ;;  %v14523_v32 = vld [vmem:[#allocation6 + $0x3c4] ss:$16 sps:$4 sm:$0xff]  }
 0x512   :  { %10790 = vmatprep.subr.bf16.mxu1 %v14454_v48 }
 0x514   :  { %10627 = vmatpush1.bf16.msra.mxu0 %v14449_v35  ;;  %v14526_v35 = vld [vmem:[#allocation6 + $0x3cc] ss:$16 sps:$4 sm:$0xff]  }
 0x515   :  { %10791 = vmatpush1.bf16.msra.mxu1 %v14452_v36  ;;  %10628 = vmatprep.subr.bf16.mxu0 %v14457_v54  ;;  %v1384_v36 = vsub.s32 5, %v14919_v42  ;;  %v10931_v54 = vld [vmem:[#allocation4 + $0x8] ss:$0 sm:$0xff] }
 0x516   :  { %10792 = vmatprep.subr.bf16.mxu1 %v14460_v12 }
 0x518   :  { %10629 = vmatpush1.bf16.msra.mxu0 %v14455_v37 }
 0x519   :  { %10793 = vmatpush1.bf16.msra.mxu1 %v14458_v38  ;;  %10630 = vmatprep.subr.bf16.mxu0 %v14463_v39 }
 0x51a   :  { %10794 = vmatprep.subr.bf16.mxu1 %v14466_v40 }
 0x51c   :  { %10631 = vmatpush1.bf16.msra.mxu0 %v14461_v26 }
 0x51d   :  { %10795 = vmatpush1.bf16.msra.mxu1 %v14464_v22  ;;  %10632 = vmatprep.subr.bf16.mxu0 %v14469_v50  ;;  %v14521_v22 = vld [vmem:[#allocation6 + $0x3c0] ss:$16 sps:$4 sm:$0xff]   ;;  %v1373_v50 = vrot.slane %v15094_v3, %v1372_v31 }
 0x51e   :  { %v15112_v53 = vpop.f32.mrb[4].mxu0  ;;  %v15114_v55 = vpop.f32.mrb[4].mxu1  ;;  %10796 = vmatprep.subr.bf16.mxu1 %v14472_v51 }
 0x51f   :  { %v15116_v57 = vpop.f32.mrb[5].mxu0  ;;  %v15118_v27 = vpop.f32.mrb[5].mxu1 }
 0x520   :  { %v8364_v13 = vpop.f32.mrb[6].mxu0  ;;  %v8692_v59 = vpop.f32.mrb[6].mxu1  ;;  %10633 = vmatpush1.bf16.msra.mxu0 %v14467_v49 }
 0x521   :  { %10797 = vmatpush1.bf16.msra.mxu1 %v14470_v46  ;;  %v8365_v61 = vpop.f32.mrb[7].mxu0  ;;  %v8693_v62 = vpop.f32.mrb[7].mxu1  ;;  %10634 = vmatprep.subr.bf16.mxu0 %v14475_v1  ;;  %v14524_v46 = vld [vmem:[#allocation6 + $0x3c8] ss:$16 sps:$4 sm:$0xff]   ;;  %v14529_v1 = vld [vmem:[#allocation6 + $0x3e4] ss:$16 sps:$4 sm:$0xff]   ;;  %v1385_v59 = vrot.slane %v15094_v3, %v1384_v36 }
 0x522   :  { %10798 = vmatprep.subr.bf16.mxu1 %v14478_v56  ;;  %v14532_v13 = vld [vmem:[#allocation6 + $0x3ec] ss:$16 sps:$4 sm:$0xff]   ;;  %v14527_v61 = vld [vmem:[#allocation6 + $0x3e0] ss:$16 sps:$4 sm:$0xff]   ;;  %v12518_v62 = vadd.f32 %v15055_v44, %v1373_v50 }
 0x523   :  { %v14539_v44 = vld [vmem:[#allocation6 + $0x420] ss:$16 sps:$4 sm:$0xff]   ;;  %v14580_v50 = vld [vmem:[#allocation6 + $0x4ec] ss:$16 sps:$4 sm:$0xff]  }
 0x524   :  { %10635 = vmatpush1.bf16.msra.mxu0 %v14473_v60 }
 0x525   :  { %10799 = vmatpush1.bf16.msra.mxu1 %v14476_v63  ;;  %10636 = vmatprep.subr.bf16.mxu0 %v14481_v0  ;;  %v14530_v63 = vld [vmem:[#allocation6 + $0x3e8] ss:$16 sps:$4 sm:$0xff]   ;;  %v14535_v0 = vld [vmem:[#allocation6 + $0x404] ss:$16 sps:$4 sm:$0xff]  }
 0x526   :  { %10800 = vmatprep.subr.bf16.mxu1 %v14484_v58  ;;  %v14538_v58 = vld [vmem:[#allocation6 + $0x40c] ss:$16 sps:$4 sm:$0xff]  }
 0x528   :  { %10637 = vmatpush1.bf16.msra.mxu0 %v14479_v17  ;;  %v12521_v17 = vadd.f32 %v15116_v57, %v1385_v59  ;;  %v14550_v57 = vld [vmem:[#allocation6 + $0x44c] ss:$16 sps:$4 sm:$0xff]   ;;  %v14584_v59 = vld [vmem:[#allocation6 + $0x508] ss:$16 sps:$4 sm:$0xff]  }
 0x529   :  { %10801 = vmatpush1.bf16.msra.mxu1 %v14482_v4  ;;  %10638 = vmatprep.subr.bf16.mxu0 %v14487_v5  ;;  %v14533_v4 = vld [vmem:[#allocation6 + $0x400] ss:$16 sps:$4 sm:$0xff]   ;;  %v9017_v5 = vpack.c.bf16 %v12518_v62, %v12518_v62 }
 0x52a   :  { %10802 = vmatprep.subr.bf16.mxu1 %v14490_v6  ;;  %v14536_v6 = vld [vmem:[#allocation6 + $0x408] ss:$16 sps:$4 sm:$0xff]   ;;  %v14587_v62 = vld [vmem:[#allocation6 + $0x520] ss:$16 sps:$4 sm:$0xff]  }
 0x52c   :  { %10639 = vmatpush1.bf16.msra.mxu0 %v14485_v7  ;;  %v14541_v7 = vld [vmem:[#allocation6 + $0x424] ss:$16 sps:$4 sm:$0xff]  }
 0x52d   :  { %10803 = vmatpush1.bf16.msra.mxu1 %v14488_v9  ;;  %10640 = vmatprep.subr.bf16.mxu0 %v14493_v10  ;;  %v9020_v9 = vpack.c.bf16 %v12521_v17, %v12521_v17  ;;  %v14544_v10 = vld [vmem:[#allocation6 + $0x42c] ss:$16 sps:$4 sm:$0xff]   ;;  %v14593_v17 = vld [vmem:[#allocation6 + $0x540] ss:$16 sps:$4 sm:$0xff]  }
 0x52e   :  { %10804 = vmatprep.subr.bf16.mxu1 %v14496_v25  ;;  %v14542_v25 = vld [vmem:[#allocation6 + $0x428] ss:$16 sps:$4 sm:$0xff]  }
 0x530   :  { %10641 = vmatpush1.bf16.msra.mxu0 %v14491_v11  ;;  %v14547_v11 = vld [vmem:[#allocation6 + $0x444] ss:$16 sps:$4 sm:$0xff]  }
 0x531   :  { %10805 = vmatpush1.bf16.msra.mxu1 %v14494_v14  ;;  %10642 = vmatprep.subr.bf16.mxu0 %v14499_v15  ;;  %v14545_v14 = vld [vmem:[#allocation6 + $0x440] ss:$16 sps:$4 sm:$0xff]   ;;  %v14548_v15 = vld [vmem:[#allocation6 + $0x448] ss:$16 sps:$4 sm:$0xff]  }
 0x532   :  { %10806 = vmatprep.subr.bf16.mxu1 %v14502_v16  ;;  %v14553_v16 = vld [vmem:[#allocation6 + $0x464] ss:$16 sps:$4 sm:$0xff]  }
 0x534   :  { %10643 = vmatpush1.bf16.msra.mxu0 %v14497_v52  ;;  %v14556_v52 = vld [vmem:[#allocation6 + $0x46c] ss:$16 sps:$4 sm:$0xff]  }
 0x535   :  { %10807 = vmatpush1.bf16.msra.mxu1 %v14500_v41  ;;  %10644 = vmatprep.subr.bf16.mxu0 %v14505_v47  ;;  %v14551_v41 = vld [vmem:[#allocation6 + $0x460] ss:$16 sps:$4 sm:$0xff]   ;;  %v14554_v47 = vld [vmem:[#allocation6 + $0x468] ss:$16 sps:$4 sm:$0xff]  }
 0x536   :  { %10808 = vmatprep.subr.bf16.mxu1 %v14508_v18  ;;  %v14559_v18 = vld [vmem:[#allocation6 + $0x484] ss:$16 sps:$4 sm:$0xff]  }
 0x538   :  { %10645 = vmatpush1.bf16.msra.mxu0 %v14503_v19  ;;  %v14562_v19 = vld [vmem:[#allocation6 + $0x48c] ss:$16 sps:$4 sm:$0xff]  }
 0x539   :  { %10809 = vmatpush1.bf16.msra.mxu1 %v14506_v20  ;;  %10646 = vmatprep.subr.bf16.mxu0 %v14511_v23  ;;  %v14557_v20 = vld [vmem:[#allocation6 + $0x480] ss:$16 sps:$4 sm:$0xff]   ;;  %v14560_v23 = vld [vmem:[#allocation6 + $0x488] ss:$16 sps:$4 sm:$0xff]  }
 0x53a   :  { %10810 = vmatprep.subr.bf16.mxu1 %v14514_v21  ;;  %v14565_v21 = vld [vmem:[#allocation6 + $0x4a4] ss:$16 sps:$4 sm:$0xff]  }
 0x53c   :  { %10647 = vmatpush1.bf16.msra.mxu0 %v14509_v45  ;;  %v14568_v45 = vld [vmem:[#allocation6 + $0x4ac] ss:$16 sps:$4 sm:$0xff]  }
 0x53d   :  { %10811 = vmatpush1.bf16.msra.mxu1 %v14512_v24  ;;  %10648 = vmatprep.subr.bf16.mxu0 %v14517_v28  ;;  %v14563_v24 = vld [vmem:[#allocation6 + $0x4a0] ss:$16 sps:$4 sm:$0xff]   ;;  %v14566_v28 = vld [vmem:[#allocation6 + $0x4a8] ss:$16 sps:$4 sm:$0xff]  }
 0x53e   :  { %v12356_v34 = vpop.f32.mrb[8].mxu0  ;;  %v12378_v48 = vpop.f32.mrb[8].mxu1  ;;  %10812 = vmatprep.subr.bf16.mxu1 %v14520_v29  ;;  %v14571_v29 = vld [vmem:[#allocation6 + $0x4c4] ss:$16 sps:$4 sm:$0xff]  }
 0x53f   :  { %v12357_v12 = vpop.f32.mrb[9].mxu0  ;;  %v12379_v37 = vpop.f32.mrb[9].mxu1 }
 0x540   :  { %v12358_v38 = vadd.f32 %v12357_v12, %v12356_v34  ;;  %v12380_v39 = vadd.f32 %v12379_v37, %v12378_v48  ;;  %v12359_v40 = vpop.f32.mrb[10].mxu0  ;;  %v12381_v26 = vpop.f32.mrb[10].mxu1  ;;  %10649 = vmatpush1.bf16.msra.mxu0 %v14515_v30  ;;  %v14569_v37 = vld [vmem:[#allocation6 + $0x4c0] ss:$16 sps:$4 sm:$0xff]  }
 0x541   :  { %10813 = vmatpush1.bf16.msra.mxu1 %v14518_v43  ;;  %v12360_v51 = vpop.f32.mrb[11].mxu0  ;;  %v12382_v49 = vpop.f32.mrb[11].mxu1  ;;  %10650 = vmatprep.subr.bf16.mxu0 %v14523_v32  ;;  %v14574_v32 = vld [vmem:[#allocation6 + $0x4cc] ss:$16 sps:$4 sm:$0xff]   ;;  %v14572_v40 = vld [vmem:[#allocation6 + $0x4c8] ss:$16 sps:$4 sm:$0xff]  }
 0x542   :  { %v8730_v56 = vadd.f32 %v12358_v38, %v10931_v54  ;;  %10814 = vmatprep.subr.bf16.mxu1 %v14526_v35  ;;  %v14577_v26 = vld [vmem:[#allocation6 + $0x4e4] ss:$16 sps:$4 sm:$0xff]   ;;  %v14575_v49 = vld [vmem:[#allocation6 + $0x4e0] ss:$16 sps:$4 sm:$0xff]  }
 0x544   :  { %v15126_v60 = vadd.f32 %v12380_v39, %v8730_v56  ;;  %10651 = vmatpush1.bf16.msra.mxu0 %v14521_v22  ;;  %v14586_v56 = vld [vmem:[#allocation6 + $0x50c] ss:$16 sps:$4 sm:$0xff]  }
 0x545   :  { %10815 = vmatpush1.bf16.msra.mxu1 %v14524_v46  ;;  %10652 = vmatprep.subr.bf16.mxu0 %v14529_v1  ;;  %v14578_v46 = vld [vmem:[#allocation6 + $0x4e8] ss:$16 sps:$4 sm:$0xff]   ;;  %v14583_v1 = vld [vmem:[#allocation6 + $0x504] ss:$16 sps:$4 sm:$0xff]  }
 0x546   :  { %10816 = vmatprep.subr.bf16.mxu1 %v14532_v13  ;;  %v14581_v13 = vld [vmem:[#allocation6 + $0x500] ss:$16 sps:$4 sm:$0xff]  }
 0x548   :  { %10653 = vmatpush1.bf16.msra.mxu0 %v14527_v61  ;;  %v14589_v61 = vld [vmem:[#allocation6 + $0x524] ss:$16 sps:$4 sm:$0xff]  }
 0x549   :  { %10817 = vmatpush1.bf16.msra.mxu1 %v14530_v63  ;;  %10663 = vmatprep.subr.bf16.mxu0 %v14535_v0  ;;  %v14590_v63 = vld [vmem:[#allocation6 + $0x528] ss:$16 sps:$4 sm:$0xff]   ;;  %v14595_v0 = vld [vmem:[#allocation6 + $0x544] ss:$16 sps:$4 sm:$0xff]  }
 0x54a   :  { %10827 = vmatprep.subr.bf16.mxu1 %v14538_v58  ;;  %v14598_v58 = vld [vmem:[#allocation6 + $0x54c] ss:$16 sps:$4 sm:$0xff]  }
 0x54b   :  { %10655 = vmatmul.mubr.bf16.vlgmr.msra.gmra.mrb[24].mxu0 %v9017_v5 }
 0x54c   :  { %10819 = vmatmul.mubr.bf16.vlgmr.msra.gmra.mrb[24].mxu1 %v9017_v5  ;;  %10664 = vmatpush1.bf16.msra.mxu0 %v14533_v4  ;;  %v14596_v4 = vld [vmem:[#allocation6 + $0x548] ss:$16 sps:$4 sm:$0xff]   ;;  %v14601_v5 = vld [vmem:[#allocation6 + $0x564] ss:$16 sps:$4 sm:$0xff]  }
 0x54d   :  { %10695 = vmatprep.mubr.bf16.mxu0 %v9020_v9  ;;  %10828 = vmatpush1.bf16.msra.mxu1 %v14536_v6  ;;  %v14604_v6 = vld [vmem:[#allocation6 + $0x56c] ss:$16 sps:$4 sm:$0xff]  }
 0x54e   :  { %10859 = vmatprep.mubr.bf16.mxu1 %v9020_v9  ;;  %10665 = vmatprep.subr.bf16.mxu0 %v14541_v7  ;;  %v14599_v7 = vld [vmem:[#allocation6 + $0x560] ss:$16 sps:$4 sm:$0xff]   ;;  %v14602_v9 = vld [vmem:[#allocation6 + $0x568] ss:$16 sps:$4 sm:$0xff]  }
 0x54f   :  { %10829 = vmatprep.subr.bf16.mxu1 %v14544_v10  ;;  %v14607_v10 = vld [vmem:[#allocation6 + $0x584] ss:$16 sps:$4 sm:$0xff]  }
 0x550   :  { %10666 = vmatpush1.bf16.msra.mxu0 %v14539_v44  ;;  %v14610_v44 = vld [vmem:[#allocation6 + $0x58c] ss:$16 sps:$4 sm:$0xff]  }
 0x551   :  { %10830 = vmatpush1.bf16.msra.mxu1 %v14542_v25  ;;  %10667 = vmatprep.subr.bf16.mxu0 %v14547_v11  ;;  %v14605_v25 = vld [vmem:[#allocation6 + $0x580] ss:$16 sps:$4 sm:$0xff]   ;;  %v14608_v11 = vld [vmem:[#allocation6 + $0x588] ss:$16 sps:$4 sm:$0xff]  }
 0x552   :  { %10831 = vmatprep.subr.bf16.mxu1 %v14550_v57  ;;  %v14613_v57 = vld [vmem:[#allocation6 + $0x5a4] ss:$16 sps:$4 sm:$0xff]  }
 0x554   :  { %10668 = vmatpush1.bf16.msra.mxu0 %v14545_v14  ;;  %v14616_v14 = vld [vmem:[#allocation6 + $0x5ac] ss:$16 sps:$4 sm:$0xff]  }
 0x555   :  { %10832 = vmatpush1.bf16.msra.mxu1 %v14548_v15  ;;  %10669 = vmatprep.subr.bf16.mxu0 %v14553_v16  ;;  %v14611_v15 = vld [vmem:[#allocation6 + $0x5a0] ss:$16 sps:$4 sm:$0xff]   ;;  %v1380_v16 = vsub.s32 4, %v14919_v42 }
 0x556   :  { %10833 = vmatprep.subr.bf16.mxu1 %v14556_v52  ;;  %v14614_v52 = vld [vmem:[#allocation6 + $0x5a8] ss:$16 sps:$4 sm:$0xff]  }
 0x558   :  { %10670 = vmatpush1.bf16.msra.mxu0 %v14551_v41  ;;  %v14619_v41 = vld [vmem:[#allocation6 + $0x5c4] ss:$16 sps:$4 sm:$0xff]  }
 0x559   :  { %10834 = vmatpush1.bf16.msra.mxu1 %v14554_v47  ;;  %10671 = vmatprep.subr.bf16.mxu0 %v14559_v18 }
 0x55a   :  { %10835 = vmatprep.subr.bf16.mxu1 %v14562_v19  ;;  %v14622_v19 = vld [vmem:[#allocation6 + $0x5cc] ss:$16 sps:$4 sm:$0xff]  }
 0x55c   :  { %10672 = vmatpush1.bf16.msra.mxu0 %v14557_v20  ;;  %v1392_v20 = vsub.s32 7, %v14919_v42 }
 0x55d   :  { %10836 = vmatpush1.bf16.msra.mxu1 %v14560_v23  ;;  %10673 = vmatprep.subr.bf16.mxu0 %v14565_v21 }
 0x55e   :  { %v12400_v30 = vpop.f32.mrb[12].mxu0  ;;  %v12422_v43 = vpop.f32.mrb[12].mxu1  ;;  %10837 = vmatprep.subr.bf16.mxu1 %v14568_v45 }
 0x55f   :  { %v12401_v34 = vpop.f32.mrb[13].mxu0  ;;  %v12423_v48 = vpop.f32.mrb[13].mxu1 }
 0x560   :  { %v12402_v35 = vadd.f32 %v12401_v34, %v12400_v30  ;;  %v12424_v36 = vadd.f32 %v12423_v48, %v12422_v43  ;;  %v12403_v54 = vpop.f32.mrb[14].mxu0  ;;  %v12425_v12 = vpop.f32.mrb[14].mxu1  ;;  %10674 = vmatpush1.bf16.msra.mxu0 %v14563_v24  ;;  %v14617_v30 = vld [vmem:[#allocation6 + $0x5c0] ss:$16 sps:$4 sm:$0xff]   ;;  %v1381_v43 = vrot.slane %v15094_v3, %v1380_v16  ;;  %v14620_v48 = vld [vmem:[#allocation6 + $0x5c8] ss:$16 sps:$4 sm:$0xff]  }
 0x561   :  { %10838 = vmatpush1.bf16.msra.mxu1 %v14566_v28  ;;  %v12404_v38 = vpop.f32.mrb[15].mxu0  ;;  %v12426_v39 = vpop.f32.mrb[15].mxu1  ;;  %10675 = vmatprep.subr.bf16.mxu0 %v14571_v29  ;;  %v14628_v54 = vld [vmem:[#allocation6 + $0x5ec] ss:$16 sps:$4 sm:$0xff]   ;;  %v1393_v12 = vrot.slane %v15094_v3, %v1392_v20  ;;  %v14632_v3 = vld [vmem:[#allocation6 + $0x608] ss:$16 sps:$4 sm:$0xff]  }
 0x562   :  { %v8810_v22 = vadd.f32 %v12402_v35, %v15126_v60  ;;  %10839 = vmatprep.subr.bf16.mxu1 %v14574_v32  ;;  %v14592_v60 = vld [vmem:[#allocation6 + $0x52c] ss:$16 sps:$4 sm:$0xff]   ;;  %v14625_v35 = vld [vmem:[#allocation6 + $0x5e4] ss:$16 sps:$4 sm:$0xff]   ;;  %v14623_v38 = vld [vmem:[#allocation6 + $0x5e0] ss:$16 sps:$4 sm:$0xff]   ;;  %v12520_v39 = vadd.f32 %v15112_v53, %v1381_v43 }
 0x563   :  { %v14635_v53 = vld [vmem:[#allocation6 + $0x620] ss:$16 sps:$4 sm:$0xff]   ;;  %v14674_v43 = vld [vmem:[#allocation6 + $0x6e8] ss:$16 sps:$4 sm:$0xff]  }
 0x564   :  { %v15131_v51 = vadd.f32 %v12424_v36, %v8810_v22  ;;  %10676 = vmatpush1.bf16.msra.mxu0 %v14569_v37  ;;  %v14634_v22 = vld [vmem:[#allocation6 + $0x60c] ss:$16 sps:$4 sm:$0xff]  }
 0x565   :  { %10840 = vmatpush1.bf16.msra.mxu1 %v14572_v40  ;;  %10677 = vmatprep.subr.bf16.mxu0 %v14577_v26  ;;  %v14626_v40 = vld [vmem:[#allocation6 + $0x5e8] ss:$16 sps:$4 sm:$0xff]   ;;  %v14631_v26 = vld [vmem:[#allocation6 + $0x604] ss:$16 sps:$4 sm:$0xff]  }
 0x566   :  { %10841 = vmatprep.subr.bf16.mxu1 %v14580_v50  ;;  %v12523_v50 = vadd.f32 %v15118_v27, %v1393_v12  ;;  %v14646_v27 = vld [vmem:[#allocation6 + $0x64c] ss:$16 sps:$4 sm:$0xff]   ;;  %v14683_v12 = vld [vmem:[#allocation6 + $0x720] ss:$16 sps:$4 sm:$0xff]  }
 0x568   :  { %10678 = vmatpush1.bf16.msra.mxu0 %v14575_v49  ;;  %v9019_v49 = vpack.c.bf16 %v12520_v39, %v12520_v39  ;;  %v14694_v39 = vld [vmem:[#allocation6 + $0x74c] ss:$16 sps:$4 sm:$0xff]  }
 0x569   :  { %10842 = vmatpush1.bf16.msra.mxu1 %v14578_v46  ;;  %10679 = vmatprep.subr.bf16.mxu0 %v14583_v1  ;;  %v14637_v46 = vld [vmem:[#allocation6 + $0x624] ss:$16 sps:$4 sm:$0xff]   ;;  %v9022_v1 = vpack.c.bf16 %v12523_v50, %v12523_v50  ;;  %v14700_v50 = vld [vmem:[#allocation6 + $0x76c] ss:$16 sps:$4 sm:$0xff]  }
 0x56a   :  { %10843 = vmatprep.subr.bf16.mxu1 %v14586_v56  ;;  %v14640_v56 = vld [vmem:[#allocation6 + $0x62c] ss:$16 sps:$4 sm:$0xff]  }
 0x56c   :  { %10680 = vmatpush1.bf16.msra.mxu0 %v14581_v13  ;;  %v14638_v13 = vld [vmem:[#allocation6 + $0x628] ss:$16 sps:$4 sm:$0xff]  }
 0x56d   :  { %10844 = vmatpush1.bf16.msra.mxu1 %v14584_v59  ;;  %10681 = vmatprep.subr.bf16.mxu0 %v14589_v61  ;;  %v14643_v59 = vld [vmem:[#allocation6 + $0x644] ss:$16 sps:$4 sm:$0xff]   ;;  %v14641_v61 = vld [vmem:[#allocation6 + $0x640] ss:$16 sps:$4 sm:$0xff]  }
 0x56e   :  { %10845 = vmatprep.subr.bf16.mxu1 %v14592_v60  ;;  %v14644_v60 = vld [vmem:[#allocation6 + $0x648] ss:$16 sps:$4 sm:$0xff]  }
 0x570   :  { %10682 = vmatpush1.bf16.msra.mxu0 %v14587_v62  ;;  %v14649_v62 = vld [vmem:[#allocation6 + $0x664] ss:$16 sps:$4 sm:$0xff]  }
 0x571   :  { %10846 = vmatpush1.bf16.msra.mxu1 %v14590_v63  ;;  %10683 = vmatprep.subr.bf16.mxu0 %v14595_v0  ;;  %v14652_v63 = vld [vmem:[#allocation6 + $0x66c] ss:$16 sps:$4 sm:$0xff]   ;;  %v14647_v0 = vld [vmem:[#allocation6 + $0x660] ss:$16 sps:$4 sm:$0xff]  }
 0x572   :  { %10847 = vmatprep.subr.bf16.mxu1 %v14598_v58  ;;  %v14650_v58 = vld [vmem:[#allocation6 + $0x668] ss:$16 sps:$4 sm:$0xff]  }
 0x574   :  { %10684 = vmatpush1.bf16.msra.mxu0 %v14593_v17  ;;  %v14655_v17 = vld [vmem:[#allocation6 + $0x684] ss:$16 sps:$4 sm:$0xff]  }
 0x575   :  { %10848 = vmatpush1.bf16.msra.mxu1 %v14596_v4  ;;  %10685 = vmatprep.subr.bf16.mxu0 %v14601_v5  ;;  %v14658_v4 = vld [vmem:[#allocation6 + $0x68c] ss:$16 sps:$4 sm:$0xff]   ;;  %v14653_v5 = vld [vmem:[#allocation6 + $0x680] ss:$16 sps:$4 sm:$0xff]  }
 0x576   :  { %10849 = vmatprep.subr.bf16.mxu1 %v14604_v6  ;;  %v14656_v6 = vld [vmem:[#allocation6 + $0x688] ss:$16 sps:$4 sm:$0xff]  }
 0x578   :  { %10686 = vmatpush1.bf16.msra.mxu0 %v14599_v7  ;;  %v14661_v7 = vld [vmem:[#allocation6 + $0x6a4] ss:$16 sps:$4 sm:$0xff]  }
 0x579   :  { %10850 = vmatpush1.bf16.msra.mxu1 %v14602_v9  ;;  %10687 = vmatprep.subr.bf16.mxu0 %v14607_v10  ;;  %v14664_v9 = vld [vmem:[#allocation6 + $0x6ac] ss:$16 sps:$4 sm:$0xff]   ;;  %v14659_v10 = vld [vmem:[#allocation6 + $0x6a0] ss:$16 sps:$4 sm:$0xff]  }
 0x57a   :  { %10851 = vmatprep.subr.bf16.mxu1 %v14610_v44  ;;  %v14662_v44 = vld [vmem:[#allocation6 + $0x6a8] ss:$16 sps:$4 sm:$0xff]  }
 0x57c   :  { %10688 = vmatpush1.bf16.msra.mxu0 %v14605_v25  ;;  %v14667_v25 = vld [vmem:[#allocation6 + $0x6c4] ss:$16 sps:$4 sm:$0xff]  }
 0x57d   :  { %10852 = vmatpush1.bf16.msra.mxu1 %v14608_v11  ;;  %10689 = vmatprep.subr.bf16.mxu0 %v14613_v57 }
 0x57e   :  { %v12444_v47 = vpop.f32.mrb[16].mxu0  ;;  %v12466_v18 = vpop.f32.mrb[16].mxu1  ;;  %10853 = vmatprep.subr.bf16.mxu1 %v14616_v14  ;;  %v14670_v14 = vld [vmem:[#allocation6 + $0x6cc] ss:$16 sps:$4 sm:$0xff]  }
 0x57f   :  { %v12445_v23 = vpop.f32.mrb[17].mxu0  ;;  %v12467_v21 = vpop.f32.mrb[17].mxu1 }
 0x580   :  { %v12446_v45 = vadd.f32 %v12445_v23, %v12444_v47  ;;  %v12468_v24 = vadd.f32 %v12467_v21, %v12466_v18  ;;  %v12447_v28 = vpop.f32.mrb[18].mxu0  ;;  %v12469_v29 = vpop.f32.mrb[18].mxu1  ;;  %10690 = vmatpush1.bf16.msra.mxu0 %v14611_v15  ;;  %v14668_v21 = vld [vmem:[#allocation6 + $0x6c8] ss:$16 sps:$4 sm:$0xff]  }
 0x581   :  { %10854 = vmatpush1.bf16.msra.mxu1 %v14614_v52  ;;  %v12448_v32 = vpop.f32.mrb[19].mxu0  ;;  %v12470_v34 = vpop.f32.mrb[19].mxu1  ;;  %10691 = vmatprep.subr.bf16.mxu0 %v14619_v41  ;;  %v14676_v28 = vld [vmem:[#allocation6 + $0x6ec] ss:$16 sps:$4 sm:$0xff]  }
 0x582   :  { %v8890_v36 = vadd.f32 %v12446_v45, %v15131_v51  ;;  %10855 = vmatprep.subr.bf16.mxu1 %v14622_v19  ;;  %v14629_v51 = vld [vmem:[#allocation6 + $0x600] ss:$16 sps:$4 sm:$0xff]   ;;  %v14673_v45 = vld [vmem:[#allocation6 + $0x6e4] ss:$16 sps:$4 sm:$0xff]   ;;  %v14682_v34 = vld [vmem:[#allocation6 + $0x70c] ss:$16 sps:$4 sm:$0xff]  }
 0x583   :  { %v14665_v19 = vld [vmem:[#allocation6 + $0x6c0] ss:$16 sps:$4 sm:$0xff]   ;;  %v14679_v32 = vld [vmem:[#allocation6 + $0x704] ss:$16 sps:$4 sm:$0xff]  }
 0x584   :  { %v15138_v37 = vadd.f32 %v12468_v24, %v8890_v36  ;;  %10692 = vmatpush1.bf16.msra.mxu0 %v14617_v30  ;;  %v14671_v30 = vld [vmem:[#allocation6 + $0x6e0] ss:$16 sps:$4 sm:$0xff]   ;;  %v14685_v36 = vld [vmem:[#allocation6 + $0x724] ss:$16 sps:$4 sm:$0xff]  }
 0x585   :  { %10856 = vmatpush1.bf16.msra.mxu1 %v14620_v48  ;;  %10693 = vmatprep.subr.bf16.mxu0 %v14625_v35  ;;  %v14677_v48 = vld [vmem:[#allocation6 + $0x700] ss:$16 sps:$4 sm:$0xff]   ;;  %v14680_v35 = vld [vmem:[#allocation6 + $0x708] ss:$16 sps:$4 sm:$0xff]  }
 0x586   :  { %10857 = vmatprep.subr.bf16.mxu1 %v14628_v54  ;;  %v14688_v54 = vld [vmem:[#allocation6 + $0x72c] ss:$16 sps:$4 sm:$0xff]  }
 0x588   :  { %10694 = vmatpush1.bf16.msra.mxu0 %v14623_v38  ;;  %v14691_v38 = vld [vmem:[#allocation6 + $0x744] ss:$16 sps:$4 sm:$0xff]  }
 0x589   :  { %10858 = vmatpush1.bf16.msra.mxu1 %v14626_v40  ;;  %10704 = vmatprep.subr.bf16.mxu0 %v14631_v26  ;;  %v14689_v40 = vld [vmem:[#allocation6 + $0x740] ss:$16 sps:$4 sm:$0xff]   ;;  %v14692_v26 = vld [vmem:[#allocation6 + $0x748] ss:$16 sps:$4 sm:$0xff]  }
 0x58a   :  { %10868 = vmatprep.subr.bf16.mxu1 %v14634_v22  ;;  %v14697_v22 = vld [vmem:[#allocation6 + $0x764] ss:$16 sps:$4 sm:$0xff]  }
 0x58b   :  { %10696 = vmatmul.mubr.bf16.vlgmr.msra.gmra.mrb[24].mxu0 %v9019_v49 }
 0x58c   :  { %10860 = vmatmul.mubr.bf16.vlgmr.msra.gmra.mrb[24].mxu1 %v9019_v49  ;;  %10705 = vmatpush1.bf16.msra.mxu0 %v14629_v51  ;;  %v14695_v51 = vld [vmem:[#allocation6 + $0x760] ss:$16 sps:$4 sm:$0xff]   ;;  %v14698_v49 = vld [vmem:[#allocation6 + $0x768] ss:$16 sps:$4 sm:$0xff]  }
 0x58d   :  { %10736 = vmatprep.mubr.bf16.mxu0 %v9022_v1  ;;  %10869 = vmatpush1.bf16.msra.mxu1 %v14632_v3  ;;  %v14703_v3 = vld [vmem:[#allocation6 + $0x784] ss:$16 sps:$4 sm:$0xff]  }
 0x58e   :  { %10900 = vmatprep.mubr.bf16.mxu1 %v9022_v1  ;;  %10706 = vmatprep.subr.bf16.mxu0 %v14637_v46  ;;  %v14706_v46 = vld [vmem:[#allocation6 + $0x78c] ss:$16 sps:$4 sm:$0xff]   ;;  %v14701_v1 = vld [vmem:[#allocation6 + $0x780] ss:$16 sps:$4 sm:$0xff]  }
 0x58f   :  { %10870 = vmatprep.subr.bf16.mxu1 %v14640_v56  ;;  %v14704_v56 = vld [vmem:[#allocation6 + $0x788] ss:$16 sps:$4 sm:$0xff]  }
 0x590   :  { %10707 = vmatpush1.bf16.msra.mxu0 %v14635_v53  ;;  %v14709_v53 = vld [vmem:[#allocation6 + $0x7a4] ss:$16 sps:$4 sm:$0xff]  }
 0x591   :  { %10871 = vmatpush1.bf16.msra.mxu1 %v14638_v13  ;;  %10708 = vmatprep.subr.bf16.mxu0 %v14643_v59  ;;  %v14712_v13 = vld [vmem:[#allocation6 + $0x7ac] ss:$16 sps:$4 sm:$0xff]   ;;  %v14707_v59 = vld [vmem:[#allocation6 + $0x7a0] ss:$16 sps:$4 sm:$0xff]  }
 0x592   :  { %10872 = vmatprep.subr.bf16.mxu1 %v14646_v27  ;;  %v1388_v27 = vsub.s32 6, %v14919_v42 }
 0x594   :  { %10709 = vmatpush1.bf16.msra.mxu0 %v14641_v61  ;;  %v14710_v61 = vld [vmem:[#allocation6 + $0x7a8] ss:$16 sps:$4 sm:$0xff]  }
 0x595   :  { %10873 = vmatpush1.bf16.msra.mxu1 %v14644_v60  ;;  %10710 = vmatprep.subr.bf16.mxu0 %v14649_v62  ;;  %v14715_v60 = vld [vmem:[#allocation6 + $0x7c4] ss:$16 sps:$4 sm:$0xff]   ;;  %v14718_v62 = vld [vmem:[#allocation6 + $0x7cc] ss:$16 sps:$4 sm:$0xff]  }
 0x596   :  { %10874 = vmatprep.subr.bf16.mxu1 %v14652_v63  ;;  %v14713_v63 = vld [vmem:[#allocation6 + $0x7c0] ss:$16 sps:$4 sm:$0xff]  }
 0x598   :  { %10711 = vmatpush1.bf16.msra.mxu0 %v14647_v0  ;;  %v14725_v0 = vld [vmem:[#allocation4] sm:$0xff] }
 0x599   :  { %10875 = vmatpush1.bf16.msra.mxu1 %v14650_v58  ;;  %10712 = vmatprep.subr.bf16.mxu0 %v14655_v17  ;;  %v1389_v58 = vrot.slane %v14725_v0, %v1388_v27  ;;  %v14716_v17 = vld [vmem:[#allocation6 + $0x7c8] ss:$16 sps:$4 sm:$0xff]  }
 0x59a   :  { %10876 = vmatprep.subr.bf16.mxu1 %v14658_v4  ;;  %v14721_v4 = vld [vmem:[#allocation6 + $0x7e4] ss:$16 sps:$4 sm:$0xff]  }
 0x59c   :  { %10713 = vmatpush1.bf16.msra.mxu0 %v14653_v5  ;;  %v14724_v5 = vld [vmem:[#allocation6 + $0x7ec] ss:$16 sps:$4 sm:$0xff]  }
 0x59d   :  { %10877 = vmatpush1.bf16.msra.mxu1 %v14656_v6  ;;  %10714 = vmatprep.subr.bf16.mxu0 %v14661_v7  ;;  %v14719_v6 = vld [vmem:[#allocation6 + $0x7e0] ss:$16 sps:$4 sm:$0xff]   ;;  %v12522_v7 = vadd.f32 %v15114_v55, %v1389_v58 }
 0x59e   :  { %v12488_v11 = vpop.f32.mrb[20].mxu0  ;;  %v12510_v57 = vpop.f32.mrb[20].mxu1  ;;  %10878 = vmatprep.subr.bf16.mxu1 %v14664_v9  ;;  %v14722_v9 = vld [vmem:[#allocation6 + $0x7e8] ss:$16 sps:$4 sm:$0xff]  }
 0x59f   :  { %v12489_v15 = vpop.f32.mrb[21].mxu0  ;;  %v12511_v16 = vpop.f32.mrb[21].mxu1 }
 0x5a0   :  { %v12490_v52 = vadd.f32 %v12489_v15, %v12488_v11  ;;  %v12512_v41 = vadd.f32 %v12511_v16, %v12510_v57  ;;  %v12491_v47 = vpop.f32.mrb[22].mxu0  ;;  %v12513_v18 = vpop.f32.mrb[22].mxu1  ;;  %10715 = vmatpush1.bf16.msra.mxu0 %v14659_v10  ;;  %v9021_v10 = vpack.c.bf16 %v12522_v7, %v12522_v7 }
 0x5a1   :  { %10879 = vmatpush1.bf16.msra.mxu1 %v14662_v44  ;;  %v12492_v20 = vpop.f32.mrb[23].mxu0  ;;  %v12514_v23 = vpop.f32.mrb[23].mxu1  ;;  %10716 = vmatprep.subr.bf16.mxu0 %v14667_v25  ;;  %v9279_v44 = vld [vmem:[#allocation7] sm:$0xf] }
 0x5a2   :  { %v8970_v24 = vadd.f32 %v12490_v52, %v15138_v37  ;;  %10880 = vmatprep.subr.bf16.mxu1 %v14670_v14  ;;  %v14686_v37 = vld [vmem:[#allocation6 + $0x728] ss:$16 sps:$4 sm:$0xff]   ;;  %v9284_v25 = vrot.slane %v9279_v44, %v1364_v8  ;;  %v9292_v11 = vrot.slane %v9279_v44, %v1372_v31  ;;  %v9288_v57 = vrot.slane %v9279_v44, %v1368_v2 }
 0x5a3   :  { %v9296_v55 = vrot.slane %v9279_v44, %v1376_v33 }
 0x5a4   :  { %v9010_v29 = vadd.f32 %v12512_v41, %v8970_v24  ;;  %10717 = vmatpush1.bf16.msra.mxu0 %v14665_v19 }
 0x5a5   :  { %10881 = vmatpush1.bf16.msra.mxu1 %v14668_v21  ;;  %10718 = vmatprep.subr.bf16.mxu0 %v14673_v45 }
 0x5a6   :  { %10919 = vst [vmem:[%s15168_s6] sm:$0xf] %v9010_v29  ;;  %10882 = vmatprep.subr.bf16.mxu1 %v14676_v28 }
 0x5a8   :  { %10719 = vmatpush1.bf16.msra.mxu0 %v14671_v30 }
 0x5a9   :  { %10883 = vmatpush1.bf16.msra.mxu1 %v14674_v43  ;;  %10720 = vmatprep.subr.bf16.mxu0 %v14679_v32 }
 0x5aa   :  { %10884 = vmatprep.subr.bf16.mxu1 %v14682_v34 }
 0x5ac   :  { %10721 = vmatpush1.bf16.msra.mxu0 %v14677_v48 }
 0x5ad   :  { %10885 = vmatpush1.bf16.msra.mxu1 %v14680_v35  ;;  %10722 = vmatprep.subr.bf16.mxu0 %v14685_v36 }
 0x5ae   :  { %10886 = vmatprep.subr.bf16.mxu1 %v14688_v54 }
 0x5b0   :  { %10723 = vmatpush1.bf16.msra.mxu0 %v14683_v12 }
 0x5b1   :  { %10887 = vmatpush1.bf16.msra.mxu1 %v14686_v37  ;;  %10724 = vmatprep.subr.bf16.mxu0 %v14691_v38 }
 0x5b2   :  { %10888 = vmatprep.subr.bf16.mxu1 %v14694_v39 }
 0x5b4   :  { %10725 = vmatpush1.bf16.msra.mxu0 %v14689_v40 }
 0x5b5   :  { %10889 = vmatpush1.bf16.msra.mxu1 %v14692_v26  ;;  %10726 = vmatprep.subr.bf16.mxu0 %v14697_v22 }
 0x5b6   :  { %10890 = vmatprep.subr.bf16.mxu1 %v14700_v50 }
 0x5b8   :  { %10727 = vmatpush1.bf16.msra.mxu0 %v14695_v51 }
 0x5b9   :  { %10891 = vmatpush1.bf16.msra.mxu1 %v14698_v49  ;;  %10728 = vmatprep.subr.bf16.mxu0 %v14703_v3 }
 0x5ba   :  { %10892 = vmatprep.subr.bf16.mxu1 %v14706_v46 }
 0x5bc   :  { %10729 = vmatpush1.bf16.msra.mxu0 %v14701_v1 }
 0x5bd   :  { %10893 = vmatpush1.bf16.msra.mxu1 %v14704_v56  ;;  %10730 = vmatprep.subr.bf16.mxu0 %v14709_v53 }
 0x5be   :  { %10894 = vmatprep.subr.bf16.mxu1 %v14712_v13 }
 0x5c0   :  { %10731 = vmatpush1.bf16.msra.mxu0 %v14707_v59 }
 0x5c1   :  { %10895 = vmatpush1.bf16.msra.mxu1 %v14710_v61  ;;  %10732 = vmatprep.subr.bf16.mxu0 %v14715_v60 }
 0x5c2   :  { %10896 = vmatprep.subr.bf16.mxu1 %v14718_v62 }
 0x5c4   :  { %10733 = vmatpush1.bf16.msra.mxu0 %v14713_v63 }
 0x5c5   :  { %10897 = vmatpush1.bf16.msra.mxu1 %v14716_v17  ;;  %10734 = vmatprep.subr.bf16.mxu0 %v14721_v4 }
 0x5c6   :  { %10898 = vmatprep.subr.bf16.mxu1 %v14724_v5 }
 0x5c8   :  { %10735 = vmatpush1.bf16.msra.mxu0 %v14719_v6 }
 0x5c9   :  { %10899 = vmatpush1.bf16.msra.mxu1 %v14722_v9 }
 0x5cb   :  { %10737 = vmatmul.mubr.bf16.vlgmr.msra.gmra.mrb[24].mxu0 %v9021_v10 }
 0x5cc   :  { %10901 = vmatmul.mubr.bf16.vlgmr.msra.gmra.mrb[24].mxu1 %v9021_v10 }
 0x69e   :  { %v10738_v14 = vpop.f32.mrb[24].mxu0 }
 0x69f   :  { %v12524_v15 = vadd.f32 %v10738_v14, %v9284_v25  ;;  %v10902_v16 = vpop.f32.mrb[24].mxu1  ;;  %v10740_v52 = vpop.f32.mrb[25].mxu0 }
 0x6a0   :  { %v12526_v41 = vadd.f32 %v10902_v16, %v9292_v11  ;;  %v12525_v47 = vadd.f32 %v10740_v52, %v9288_v57  ;;  %v10904_v18 = vpop.f32.mrb[25].mxu1  ;;  %v10742_v19 = vpop.f32.mrb[26].mxu0 }
 0x6a1   :  { %v12527_v20 = vadd.f32 %v10904_v18, %v9296_v55  ;;  %v10906_v23 = vpop.f32.mrb[26].mxu1  ;;  %v10743_v8 = vpop.f32.mrb[27].mxu0 }
 0x6a2   :  { %v10913_v21 = vcombine.low %v12524_v15, %v12525_v47  ;;  %v10907_v45 = vpop.f32.mrb[27].mxu1 }
 0x6a3   :  { %v10914_v31 = vcombine.low %v12526_v41, %v12527_v20 }
 0x6a4   :  { %10917 = vst [vmem:[%s15167_s5] sm:$0xff] %v10913_v21 }
 0x6a5   :  { %10918 = vst [vmem:[%s15167_s5 + $0x8] sm:$0xff] %v10914_v31 }
 0x6a6   :  { %10928 = vsyncpa [#allocation3], 1 }
 0x6a7   :  { %10929 = vsyncpa [#allocation5], 1 }
 0x6a8   :  { %10930 = vsyncpa [#allocation8], 1 }

</bundles_post_ra>
